<compile_context>
chip_gen: v7x
topology: tpu7x:2x2x1
jax: 0.10.0
libtpu: 0.0.40
codegen_flags: <defaults>
</compile_context>

<pallas_src>
import functools
import math

import jax
import jax.numpy as jnp
from jax import lax
from jax.experimental import pallas as pl
from jax.experimental.pallas import tpu as pltpu


# ---------------------------------------------------------------------------
# Kernel: Q/K/V projection + per-head online-softmax attention + fused fc.
# Grid = (B, n_q); KV blocks are looped inside the kernel.
# ---------------------------------------------------------------------------
def _mha_flash_kernel(xq_ref, xkv_ref, wq_ref, bq_ref, wkv_ref, bkv_ref,
                      wfc_ref, bfc_ref, o_ref, m_ref, l_ref, acc_ref,
                      *, num_heads, head_dim, kv_block, num_kv):
    H, D = num_heads, head_dim
    E = H * D

    # Q projection for this query tile: one wide (Sq,E)@(E,E) bf16 MXU matmul
    # covering all heads.  The 1/D scale is already folded into wq/bq.
    q = (jnp.dot(xq_ref[...], wq_ref[...], preferred_element_type=jnp.float32)
         + bq_ref[...]).astype(jnp.bfloat16)                          # (Sq, E)

    # Online-softmax state in VMEM scratch.  acc_ref doubles as the lane-dense
    # "concatenated heads" slab that feeds the fused fc matmul at the end.
    m_ref[...] = jnp.full_like(m_ref, -jnp.inf)
    l_ref[...] = jnp.zeros_like(l_ref)
    acc_ref[...] = jnp.zeros_like(acc_ref)

    @pl.loop(0, num_kv)
    def _(kv):
        start = pl.multiple_of(kv * kv_block, kv_block)
        xkv = xkv_ref[pl.ds(start, kv_block), :]                      # (Skv, E) bf16
        # K|V for all heads in one wide (Skv,E)@(E,2E) matmul.
        kvp = (jnp.dot(xkv, wkv_ref[...], preferred_element_type=jnp.float32)
               + bkv_ref[...]).astype(jnp.bfloat16)                   # (Skv, 2E)

        # Per-head flash update (static unroll).  Head h's columns are
        # 128-lane aligned whenever D % 128 == 0.
        for h in range(H):
            sl = slice(h * D, (h + 1) * D)
            q_h = q[:, sl]                                            # (Sq, D)
            k_h = kvp[:, sl]                                          # (Skv, D)
            v_h = kvp[:, E + h * D:E + (h + 1) * D]                   # (Skv, D)

            # q_h @ k_h^T with no explicit transpose: contract the last dims.
            s = lax.dot_general(q_h, k_h, (((1,), (1,)), ((), ())),
                                preferred_element_type=jnp.float32)   # (Sq, Skv)

            m_prev = m_ref[:, h:h + 1]                                # (Sq, 1)
            m_new = jnp.maximum(m_prev, jnp.max(s, axis=-1, keepdims=True))
            alpha = jnp.exp(m_prev - m_new)
            p = jnp.exp(s - m_new)                                    # (Sq, Skv) f32
            l_ref[:, h:h + 1] = (alpha * l_ref[:, h:h + 1]
                                 + jnp.sum(p, axis=-1, keepdims=True))
            acc_ref[:, sl] = alpha * acc_ref[:, sl] + jnp.dot(
                p.astype(jnp.bfloat16), v_h,
                preferred_element_type=jnp.float32)
            m_ref[:, h:h + 1] = m_new

    # Finalize: per-head softmax normalization (EUP approx reciprocal), then
    # the fused fc matmul straight from the lane-dense slab.
    inv_l = pl.reciprocal(l_ref[...], approx=True)                    # (Sq, H)
    for h in range(H):
        sl = slice(h * D, (h + 1) * D)
        acc_ref[:, sl] = acc_ref[:, sl] * inv_l[:, h:h + 1]
    y = (jnp.dot(acc_ref[...].astype(jnp.bfloat16), wfc_ref[...],
                 preferred_element_type=jnp.float32) + bfc_ref[...])  # (Sq, E)
    o_ref[...] = y.astype(o_ref.dtype)


def _choose_tile(n, target):
    """Largest divisor of n that is <= target and sublane-friendly."""
    t = min(n, target)
    if t == n:
        return n
    for cand in range(t - t % 8, 0, -8):
        if n % cand == 0:
            return cand
    return n


# ---------------------------------------------------------------------------
# Wrapper
# ---------------------------------------------------------------------------
def multi_head_attention(x, wq, bq, wk, bk, wv, bv, w_fc, b_fc,
                         *, q_block=256, kv_block=512):
    """x: (B, S, E); wq/wk/wv: (H, E, D); bq/bk/bv: (H, D);
    w_fc: (E, E) stored (in, out) [already transposed vs nn.Linear.weight];
    b_fc: (E,)."""
    B, S, E = x.shape
    H, _, D = wq.shape
    assert H * D == E

    Sq = _choose_tile(S, q_block)
    Skv = _choose_tile(S, kv_block)
    n_q = S // Sq
    n_kv = S // Skv

    # Stack per-head projections: head h occupies columns h*D:(h+1)*D.
    def _stack(w):                                   # (H, E, D) -> (E, H*D)
        return jnp.transpose(w, (1, 0, 2)).reshape(E, H * D)

    # Reference divides by sqrt(D) twice -> net scale 1/D, folded into Q.
    scale = 1.0 / float(D)
    w_q = (_stack(wq) * scale).astype(jnp.bfloat16)                        # (E, E)
    b_q = (bq.reshape(1, E) * scale).astype(jnp.float32)                   # (1, E)
    w_kv = jnp.concatenate([_stack(wk), _stack(wv)], axis=1).astype(jnp.bfloat16)  # (E, 2E)
    b_kv = jnp.concatenate([bk.reshape(-1), bv.reshape(-1)]
                           ).reshape(1, 2 * E).astype(jnp.float32)
    w_o = w_fc.astype(jnp.bfloat16)                                        # (E, E)
    b_o = b_fc.reshape(1, E).astype(jnp.float32)
    x_bf = x.astype(jnp.bfloat16)

    kernel = functools.partial(_mha_flash_kernel, num_heads=H, head_dim=D,
                               kv_block=Skv, num_kv=n_kv)

    def _build(single_buffer_weights):
        def _wspec(shape):
            idx = lambda b, q: (0,) * len(shape)
            if single_buffer_weights:
                # Constant blocks -> no point double-buffering them.
                return pl.BlockSpec(shape, idx, pipeline_mode=pl.Buffered(1))
            return pl.BlockSpec(shape, idx)

        return pl.pallas_call(
            kernel,
            out_shape=jax.ShapeDtypeStruct((B, S, E), x.dtype),
            grid_spec=pltpu.PrefetchScalarGridSpec(
                num_scalar_prefetch=0,
                grid=(B, n_q),
                in_specs=[
                    pl.BlockSpec((None, Sq, E), lambda b, q: (b, q, 0)),  # query rows
                    pl.BlockSpec((None, S, E), lambda b, q: (b, 0, 0)),   # kv rows (full seq)
                    _wspec((E, E)),          # W_q (scale folded, resident)
                    _wspec((1, E)),          # b_q
                    _wspec((E, 2 * E)),      # W_k | W_v stacked
                    _wspec((1, 2 * E)),      # b_k | b_v
                    _wspec((E, E)),          # W_fc
                    _wspec((1, E)),          # b_fc
                ],
                out_specs=pl.BlockSpec((None, Sq, E), lambda b, q: (b, q, 0)),
                scratch_shapes=[
                    pltpu.VMEM((Sq, H), jnp.float32),   # running max  m
                    pltpu.VMEM((Sq, H), jnp.float32),   # running denom l
                    pltpu.VMEM((Sq, E), jnp.float32),   # acc / lane-dense concat slab
                ],
            ),
            compiler_params=pltpu.CompilerParams(
                dimension_semantics=("parallel", "parallel"),
                vmem_limit_bytes=64 * 1024 * 1024,
            ),
        )

    args = (x_bf, x_bf, w_q, b_q, w_kv, b_kv, w_o, b_o)
    try:
        return _build(True)(*args)
    except Exception:
        # pl.Buffered(1) (single-buffered resident weights) not supported by
        # this JAX/libtpu build -> fall back to default double buffering.
        return _build(False)(*args)


# ---------------------------------------------------------------------------
# Pure-JAX reference (mirrors the PyTorch forward exactly, in f32)
# ---------------------------------------------------------------------------
def reference(x, wq, bq, wk, bk, wv, bv, w_fc, b_fc):
    H = wq.shape[0]
    heads = []
    for h in range(H):
        q = x @ wq[h] + bq[h]
        k = x @ wk[h] + bk[h]
        v = x @ wv[h] + bv[h]
        d = q.shape[-1]
        scores = (q @ jnp.swapaxes(k, -2, -1)) / math.sqrt(d)
        scores = scores / (d ** 0.5)
        attn = jax.nn.softmax(scores, axis=-1)
        heads.append(attn @ v)
    cat = jnp.concatenate(heads, axis=-1)
    return cat @ w_fc + b_fc


if __name__ == "__main__":
    B, S, E, H = 2, 8, 32, 4
    D = E // H

    key = jax.random.PRNGKey(0)
    ks = jax.random.split(key, 10)

    # deterministic nn.Linear-style init (uniform +-1/sqrt(fan_in))
    bound = 1.0 / math.sqrt(E)
    x = jax.random.normal(ks[0], (B, S, E), dtype=jnp.float32)
    wq = jax.random.uniform(ks[1], (H, E, D), jnp.float32, -bound, bound)
    bq = jax.random.uniform(ks[2], (H, D), jnp.float32, -bound, bound)
    wk = jax.random.uniform(ks[3], (H, E, D), jnp.float32, -bound, bound)
    bk = jax.random.uniform(ks[4], (H, D), jnp.float32, -bound, bound)
    wv = jax.random.uniform(ks[5], (H, E, D), jnp.float32, -bound, bound)
    bv = jax.random.uniform(ks[6], (H, D), jnp.float32, -bound, bound)
    w_fc = jax.random.uniform(ks[7], (E, E), jnp.float32, -bound, bound)  # (in, out)
    b_fc = jax.random.uniform(ks[8], (E,), jnp.float32, -bound, bound)

    out = multi_head_attention(x, wq, bq, wk, bk, wv, bv, w_fc, b_fc)
    out = jax.block_until_ready(out)

    ref = reference(x, wq, bq, wk, bk, wv, bv, w_fc, b_fc)
    assert out.shape == (B, S, E)
    # bf16 matmul operands (f32 accumulation) + EUP approx reciprocal in the
    # softmax denominator -> tolerance relaxed to ~2e-2.
    err = float(jnp.max(jnp.abs(out - ref)))
    assert jnp.allclose(out, ref, atol=2e-2, rtol=2e-2), (
        f"mismatch vs reference (max abs err {err})")

    print("KERNEL_OK")
</pallas_src>

<mosaic_0001>
module attributes {stable_mosaic.version = 11 : i64} {
  func.func @_mha_flash_kernel(%arg0: i32, %arg1: i32, %arg2: memref<1x8x32xbf16, #tpu.memory_space<vmem>>, %arg3: memref<1x8x32xbf16, #tpu.memory_space<vmem>>, %arg4: memref<32x32xbf16, #tpu.memory_space<vmem>>, %arg5: memref<1x32xf32, #tpu.memory_space<vmem>>, %arg6: memref<32x64xbf16, #tpu.memory_space<vmem>>, %arg7: memref<1x64xf32, #tpu.memory_space<vmem>>, %arg8: memref<32x32xbf16, #tpu.memory_space<vmem>>, %arg9: memref<1x32xf32, #tpu.memory_space<vmem>>, %arg10: memref<1x8x32xf32, #tpu.memory_space<vmem>>, %arg11: memref<8x4xf32, #tpu.memory_space<vmem>>, %arg12: memref<8x4xf32, #tpu.memory_space<vmem>>, %arg13: memref<8x32xf32, #tpu.memory_space<vmem>>) attributes {dimension_semantics = [#tpu.dimension_semantics<parallel>, #tpu.dimension_semantics<parallel>], iteration_bounds = array<i64: 2, 1>, scalar_prefetch = 0 : i64, scratch_operands = 3 : i64, tpu.core_type = #tpu.core_type<tc>, window_params = [{transform_indices = @transform_0, window_bounds = array<i64: 1, 8, 32>}, {transform_indices = @transform_1, window_bounds = array<i64: 1, 8, 32>}, {pipeline_mode = #tpu.pipeline_mode<synchronous>, transform_indices = @transform_2, window_bounds = array<i64: 32, 32>}, {pipeline_mode = #tpu.pipeline_mode<synchronous>, transform_indices = @transform_3, window_bounds = array<i64: 1, 32>}, {pipeline_mode = #tpu.pipeline_mode<synchronous>, transform_indices = @transform_4, window_bounds = array<i64: 32, 64>}, {pipeline_mode = #tpu.pipeline_mode<synchronous>, transform_indices = @transform_5, window_bounds = array<i64: 1, 64>}, {pipeline_mode = #tpu.pipeline_mode<synchronous>, transform_indices = @transform_6, window_bounds = array<i64: 32, 32>}, {pipeline_mode = #tpu.pipeline_mode<synchronous>, transform_indices = @transform_7, window_bounds = array<i64: 1, 32>}, {transform_indices = @transform_8, window_bounds = array<i64: 1, 8, 32>}]} {
    %c0 = arith.constant 0 : index
    %c0_0 = arith.constant 0 : index
    %c0_1 = arith.constant 0 : index
    %0 = vector.load %arg2[%c0, %c0_0, %c0_1] : memref<1x8x32xbf16, #tpu.memory_space<vmem>>, vector<1x8x32xbf16>
    %1 = vector.shape_cast %0 : vector<1x8x32xbf16> to vector<8x32xbf16>
    %c0_2 = arith.constant 0 : index
    %c0_3 = arith.constant 0 : index
    %2 = vector.load %arg4[%c0_2, %c0_3] : memref<32x32xbf16, #tpu.memory_space<vmem>>, vector<32x32xbf16>
    %cst = arith.constant dense<0.000000e+00> : vector<8x32xf32>
    %3 = tpu.matmul %1, %2, %cst {dimension_numbers = #tpu.dot_dimension_numbers<[1], [0], [0], [1], [0, 0, 1, 1], [], []>} : vector<8x32xbf16>, vector<32x32xbf16>, vector<8x32xf32> -> vector<8x32xf32>
    %c0_4 = arith.constant 0 : index
    %c0_5 = arith.constant 0 : index
    %4 = vector.load %arg5[%c0_4, %c0_5] : memref<1x32xf32, #tpu.memory_space<vmem>>, vector<1x32xf32>
    %5 = vector.broadcast %4 : vector<1x32xf32> to vector<8x32xf32>
    %6 = arith.addf %3, %5 : vector<8x32xf32>
    %7 = arith.truncf %6 : vector<8x32xf32> to vector<8x32xbf16>
    %cst_6 = arith.constant 0xFF800000 : f32
    %8 = vector.broadcast %cst_6 : f32 to vector<8x4xf32>
    %c0_7 = arith.constant 0 : index
    %c0_8 = arith.constant 0 : index
    %9 = vector.load %arg11[%c0_7, %c0_8] : memref<8x4xf32, #tpu.memory_space<vmem>>, vector<8x4xf32>
    tpu.vector_store %arg11[%c0_7, %c0_8], %8 {strides = array<i32>} : memref<8x4xf32, #tpu.memory_space<vmem>>, vector<8x4xf32>,
    %cst_9 = arith.constant 0.000000e+00 : f32
    %10 = vector.broadcast %cst_9 : f32 to vector<8x4xf32>
    %c0_10 = arith.constant 0 : index
    %c0_11 = arith.constant 0 : index
    %11 = vector.load %arg12[%c0_10, %c0_11] : memref<8x4xf32, #tpu.memory_space<vmem>>, vector<8x4xf32>
    tpu.vector_store %arg12[%c0_10, %c0_11], %10 {strides = array<i32>} : memref<8x4xf32, #tpu.memory_space<vmem>>, vector<8x4xf32>,
    %cst_12 = arith.constant 0.000000e+00 : f32
    %12 = vector.broadcast %cst_12 : f32 to vector<8x32xf32>
    %c0_13 = arith.constant 0 : index
    %c0_14 = arith.constant 0 : index
    %13 = vector.load %arg13[%c0_13, %c0_14] : memref<8x32xf32, #tpu.memory_space<vmem>>, vector<8x32xf32>
    tpu.vector_store %arg13[%c0_13, %c0_14], %12 {strides = array<i32>} : memref<8x32xf32, #tpu.memory_space<vmem>>, vector<8x32xf32>,
    %c0_i32 = arith.constant 0 : i32
    %c1_i32 = arith.constant 1 : i32
    %14 = arith.muli %c0_i32, %c1_i32 : i32
    %c0_i32_15 = arith.constant 0 : i32
    %15 = arith.addi %c0_i32_15, %14 : i32
    %c8_i32 = arith.constant 8 : i32
    %16 = arith.muli %15, %c8_i32 : i32
    %17 = tpu.assume_multiple %16, 8 : i32
    %c0_16 = arith.constant 0 : index
    %18 = arith.index_cast %17 : i32 to index
    %c0_17 = arith.constant 0 : index
    %19 = vector.load %arg3[%c0_16, %18, %c0_17] : memref<1x8x32xbf16, #tpu.memory_space<vmem>>, vector<1x8x32xbf16>
    %20 = vector.shape_cast %19 : vector<1x8x32xbf16> to vector<8x32xbf16>
    %c0_18 = arith.constant 0 : index
    %c0_19 = arith.constant 0 : index
    %21 = vector.load %arg6[%c0_18, %c0_19] : memref<32x64xbf16, #tpu.memory_space<vmem>>, vector<32x64xbf16>
    %cst_20 = arith.constant dense<0.000000e+00> : vector<8x64xf32>
    %22 = tpu.matmul %20, %21, %cst_20 {dimension_numbers = #tpu.dot_dimension_numbers<[1], [0], [0], [1], [0, 0, 1, 1], [], []>} : vector<8x32xbf16>, vector<32x64xbf16>, vector<8x64xf32> -> vector<8x64xf32>
    %c0_21 = arith.constant 0 : index
    %c0_22 = arith.constant 0 : index
    %23 = vector.load %arg7[%c0_21, %c0_22] : memref<1x64xf32, #tpu.memory_space<vmem>>, vector<1x64xf32>
    %24 = vector.broadcast %23 : vector<1x64xf32> to vector<8x64xf32>
    %25 = arith.addf %22, %24 : vector<8x64xf32>
    %26 = arith.truncf %25 : vector<8x64xf32> to vector<8x64xbf16>
    %27 = vector.extract_strided_slice %7 {offsets = [0, 0], sizes = [8, 8], strides = [1, 1]} : vector<8x32xbf16> to vector<8x8xbf16>
    %28 = vector.extract_strided_slice %26 {offsets = [0, 0], sizes = [8, 8], strides = [1, 1]} : vector<8x64xbf16> to vector<8x8xbf16>
    %29 = vector.extract_strided_slice %26 {offsets = [0, 32], sizes = [8, 8], strides = [1, 1]} : vector<8x64xbf16> to vector<8x8xbf16>
    %cst_23 = arith.constant dense<0.000000e+00> : vector<8x8xf32>
    %30 = tpu.matmul %27, %28, %cst_23 {dimension_numbers = #tpu.dot_dimension_numbers<[1], [1], [0], [0], [0, 0, 1, 0], [], []>} : vector<8x8xbf16>, vector<8x8xbf16>, vector<8x8xf32> -> vector<8x8xf32>
    %c0_24 = arith.constant 0 : index
    %c0_25 = arith.constant 0 : index
    %31 = vector.load %arg11[%c0_24, %c0_25] : memref<8x4xf32, #tpu.memory_space<vmem>>, vector<8x1xf32>
    %cst_26 = arith.constant dense<0xFF800000> : vector<8xf32>
    %32 = vector.multi_reduction <maximumf>, %30, %cst_26 [1] : vector<8x8xf32> to vector<8xf32>
    %33 = vector.shape_cast %32 : vector<8xf32> to vector<8x1xf32>
    %34 = arith.maximumf %31, %33 : vector<8x1xf32>
    %35 = arith.subf %31, %34 : vector<8x1xf32>
    %36 = math.exp %35 : vector<8x1xf32>
    %37 = vector.broadcast %34 : vector<8x1xf32> to vector<8x8xf32>
    %38 = arith.subf %30, %37 : vector<8x8xf32>
    %39 = math.exp %38 : vector<8x8xf32>
    %c0_27 = arith.constant 0 : index
    %c0_28 = arith.constant 0 : index
    %40 = vector.load %arg12[%c0_27, %c0_28] : memref<8x4xf32, #tpu.memory_space<vmem>>, vector<8x1xf32>
    %41 = arith.mulf %36, %40 : vector<8x1xf32>
    %cst_29 = arith.constant dense<0.000000e+00> : vector<8xf32>
    %42 = vector.multi_reduction <add>, %39, %cst_29 [1] : vector<8x8xf32> to vector<8xf32>
    %43 = vector.shape_cast %42 : vector<8xf32> to vector<8x1xf32>
    %44 = arith.addf %41, %43 : vector<8x1xf32>
    %c0_30 = arith.constant 0 : index
    %c0_31 = arith.constant 0 : index
    %45 = vector.load %arg12[%c0_30, %c0_31] : memref<8x4xf32, #tpu.memory_space<vmem>>, vector<8x1xf32>
    tpu.vector_store %arg12[%c0_30, %c0_31], %44 {strides = array<i32>} : memref<8x4xf32, #tpu.memory_space<vmem>>, vector<8x1xf32>,
    %c0_32 = arith.constant 0 : index
    %c0_33 = arith.constant 0 : index
    %46 = vector.load %arg13[%c0_32, %c0_33] : memref<8x32xf32, #tpu.memory_space<vmem>>, vector<8x8xf32>
    %47 = vector.broadcast %36 : vector<8x1xf32> to vector<8x8xf32>
    %48 = arith.mulf %47, %46 : vector<8x8xf32>
    %49 = arith.truncf %39 : vector<8x8xf32> to vector<8x8xbf16>
    %cst_34 = arith.constant dense<0.000000e+00> : vector<8x8xf32>
    %50 = tpu.matmul %49, %29, %cst_34 {dimension_numbers = #tpu.dot_dimension_numbers<[1], [0], [0], [1], [0, 0, 1, 1], [], []>} : vector<8x8xbf16>, vector<8x8xbf16>, vector<8x8xf32> -> vector<8x8xf32>
    %51 = arith.addf %48, %50 : vector<8x8xf32>
    %c0_35 = arith.constant 0 : index
    %c0_36 = arith.constant 0 : index
    %52 = vector.load %arg13[%c0_35, %c0_36] : memref<8x32xf32, #tpu.memory_space<vmem>>, vector<8x8xf32>
    tpu.vector_store %arg13[%c0_35, %c0_36], %51 {strides = array<i32>} : memref<8x32xf32, #tpu.memory_space<vmem>>, vector<8x8xf32>,
    %c0_37 = arith.constant 0 : index
    %c0_38 = arith.constant 0 : index
    %53 = vector.load %arg11[%c0_37, %c0_38] : memref<8x4xf32, #tpu.memory_space<vmem>>, vector<8x1xf32>
    tpu.vector_store %arg11[%c0_37, %c0_38], %34 {strides = array<i32>} : memref<8x4xf32, #tpu.memory_space<vmem>>, vector<8x1xf32>,
    %54 = vector.extract_strided_slice %7 {offsets = [0, 8], sizes = [8, 8], strides = [1, 1]} : vector<8x32xbf16> to vector<8x8xbf16>
    %55 = vector.extract_strided_slice %26 {offsets = [0, 8], sizes = [8, 8], strides = [1, 1]} : vector<8x64xbf16> to vector<8x8xbf16>
    %56 = vector.extract_strided_slice %26 {offsets = [0, 40], sizes = [8, 8], strides = [1, 1]} : vector<8x64xbf16> to vector<8x8xbf16>
    %cst_39 = arith.constant dense<0.000000e+00> : vector<8x8xf32>
    %57 = tpu.matmul %54, %55, %cst_39 {dimension_numbers = #tpu.dot_dimension_numbers<[1], [1], [0], [0], [0, 0, 1, 0], [], []>} : vector<8x8xbf16>, vector<8x8xbf16>, vector<8x8xf32> -> vector<8x8xf32>
    %c0_40 = arith.constant 0 : index
    %c1 = arith.constant 1 : index
    %58 = vector.load %arg11[%c0_40, %c1] : memref<8x4xf32, #tpu.memory_space<vmem>>, vector<8x1xf32>
    %cst_41 = arith.constant dense<0xFF800000> : vector<8xf32>
    %59 = vector.multi_reduction <maximumf>, %57, %cst_41 [1] : vector<8x8xf32> to vector<8xf32>
    %60 = vector.shape_cast %59 : vector<8xf32> to vector<8x1xf32>
    %61 = arith.maximumf %58, %60 : vector<8x1xf32>
    %62 = arith.subf %58, %61 : vector<8x1xf32>
    %63 = math.exp %62 : vector<8x1xf32>
    %64 = vector.broadcast %61 : vector<8x1xf32> to vector<8x8xf32>
    %65 = arith.subf %57, %64 : vector<8x8xf32>
    %66 = math.exp %65 : vector<8x8xf32>
    %c0_42 = arith.constant 0 : index
    %c1_43 = arith.constant 1 : index
    %67 = vector.load %arg12[%c0_42, %c1_43] : memref<8x4xf32, #tpu.memory_space<vmem>>, vector<8x1xf32>
    %68 = arith.mulf %63, %67 : vector<8x1xf32>
    %cst_44 = arith.constant dense<0.000000e+00> : vector<8xf32>
    %69 = vector.multi_reduction <add>, %66, %cst_44 [1] : vector<8x8xf32> to vector<8xf32>
    %70 = vector.shape_cast %69 : vector<8xf32> to vector<8x1xf32>
    %71 = arith.addf %68, %70 : vector<8x1xf32>
    %c0_45 = arith.constant 0 : index
    %c1_46 = arith.constant 1 : index
    %72 = vector.load %arg12[%c0_45, %c1_46] : memref<8x4xf32, #tpu.memory_space<vmem>>, vector<8x1xf32>
    tpu.vector_store %arg12[%c0_45, %c1_46], %71 {strides = array<i32>} : memref<8x4xf32, #tpu.memory_space<vmem>>, vector<8x1xf32>,
    %c0_47 = arith.constant 0 : index
    %c8 = arith.constant 8 : index
    %73 = vector.load %arg13[%c0_47, %c8] : memref<8x32xf32, #tpu.memory_space<vmem>>, vector<8x8xf32>
    %74 = vector.broadcast %63 : vector<8x1xf32> to vector<8x8xf32>
    %75 = arith.mulf %74, %73 : vector<8x8xf32>
    %76 = arith.truncf %66 : vector<8x8xf32> to vector<8x8xbf16>
    %cst_48 = arith.constant dense<0.000000e+00> : vector<8x8xf32>
    %77 = tpu.matmul %76, %56, %cst_48 {dimension_numbers = #tpu.dot_dimension_numbers<[1], [0], [0], [1], [0, 0, 1, 1], [], []>} : vector<8x8xbf16>, vector<8x8xbf16>, vector<8x8xf32> -> vector<8x8xf32>
    %78 = arith.addf %75, %77 : vector<8x8xf32>
    %c0_49 = arith.constant 0 : index
    %c8_50 = arith.constant 8 : index
    %79 = vector.load %arg13[%c0_49, %c8_50] : memref<8x32xf32, #tpu.memory_space<vmem>>, vector<8x8xf32>
    tpu.vector_store %arg13[%c0_49, %c8_50], %78 {strides = array<i32>} : memref<8x32xf32, #tpu.memory_space<vmem>>, vector<8x8xf32>,
    %c0_51 = arith.constant 0 : index
    %c1_52 = arith.constant 1 : index
    %80 = vector.load %arg11[%c0_51, %c1_52] : memref<8x4xf32, #tpu.memory_space<vmem>>, vector<8x1xf32>
    tpu.vector_store %arg11[%c0_51, %c1_52], %61 {strides = array<i32>} : memref<8x4xf32, #tpu.memory_space<vmem>>, vector<8x1xf32>,
    %81 = vector.extract_strided_slice %7 {offsets = [0, 16], sizes = [8, 8], strides = [1, 1]} : vector<8x32xbf16> to vector<8x8xbf16>
    %82 = vector.extract_strided_slice %26 {offsets = [0, 16], sizes = [8, 8], strides = [1, 1]} : vector<8x64xbf16> to vector<8x8xbf16>
    %83 = vector.extract_strided_slice %26 {offsets = [0, 48], sizes = [8, 8], strides = [1, 1]} : vector<8x64xbf16> to vector<8x8xbf16>
    %cst_53 = arith.constant dense<0.000000e+00> : vector<8x8xf32>
    %84 = tpu.matmul %81, %82, %cst_53 {dimension_numbers = #tpu.dot_dimension_numbers<[1], [1], [0], [0], [0, 0, 1, 0], [], []>} : vector<8x8xbf16>, vector<8x8xbf16>, vector<8x8xf32> -> vector<8x8xf32>
    %c0_54 = arith.constant 0 : index
    %c2 = arith.constant 2 : index
    %85 = vector.load %arg11[%c0_54, %c2] : memref<8x4xf32, #tpu.memory_space<vmem>>, vector<8x1xf32>
    %cst_55 = arith.constant dense<0xFF800000> : vector<8xf32>
    %86 = vector.multi_reduction <maximumf>, %84, %cst_55 [1] : vector<8x8xf32> to vector<8xf32>
    %87 = vector.shape_cast %86 : vector<8xf32> to vector<8x1xf32>
    %88 = arith.maximumf %85, %87 : vector<8x1xf32>
    %89 = arith.subf %85, %88 : vector<8x1xf32>
    %90 = math.exp %89 : vector<8x1xf32>
    %91 = vector.broadcast %88 : vector<8x1xf32> to vector<8x8xf32>
    %92 = arith.subf %84, %91 : vector<8x8xf32>
    %93 = math.exp %92 : vector<8x8xf32>
    %c0_56 = arith.constant 0 : index
    %c2_57 = arith.constant 2 : index
    %94 = vector.load %arg12[%c0_56, %c2_57] : memref<8x4xf32, #tpu.memory_space<vmem>>, vector<8x1xf32>
    %95 = arith.mulf %90, %94 : vector<8x1xf32>
    %cst_58 = arith.constant dense<0.000000e+00> : vector<8xf32>
    %96 = vector.multi_reduction <add>, %93, %cst_58 [1] : vector<8x8xf32> to vector<8xf32>
    %97 = vector.shape_cast %96 : vector<8xf32> to vector<8x1xf32>
    %98 = arith.addf %95, %97 : vector<8x1xf32>
    %c0_59 = arith.constant 0 : index
    %c2_60 = arith.constant 2 : index
    %99 = vector.load %arg12[%c0_59, %c2_60] : memref<8x4xf32, #tpu.memory_space<vmem>>, vector<8x1xf32>
    tpu.vector_store %arg12[%c0_59, %c2_60], %98 {strides = array<i32>} : memref<8x4xf32, #tpu.memory_space<vmem>>, vector<8x1xf32>,
    %c0_61 = arith.constant 0 : index
    %c16 = arith.constant 16 : index
    %100 = vector.load %arg13[%c0_61, %c16] : memref<8x32xf32, #tpu.memory_space<vmem>>, vector<8x8xf32>
    %101 = vector.broadcast %90 : vector<8x1xf32> to vector<8x8xf32>
    %102 = arith.mulf %101, %100 : vector<8x8xf32>
    %103 = arith.truncf %93 : vector<8x8xf32> to vector<8x8xbf16>
    %cst_62 = arith.constant dense<0.000000e+00> : vector<8x8xf32>
    %104 = tpu.matmul %103, %83, %cst_62 {dimension_numbers = #tpu.dot_dimension_numbers<[1], [0], [0], [1], [0, 0, 1, 1], [], []>} : vector<8x8xbf16>, vector<8x8xbf16>, vector<8x8xf32> -> vector<8x8xf32>
    %105 = arith.addf %102, %104 : vector<8x8xf32>
    %c0_63 = arith.constant 0 : index
    %c16_64 = arith.constant 16 : index
    %106 = vector.load %arg13[%c0_63, %c16_64] : memref<8x32xf32, #tpu.memory_space<vmem>>, vector<8x8xf32>
    tpu.vector_store %arg13[%c0_63, %c16_64], %105 {strides = array<i32>} : memref<8x32xf32, #tpu.memory_space<vmem>>, vector<8x8xf32>,
    %c0_65 = arith.constant 0 : index
    %c2_66 = arith.constant 2 : index
    %107 = vector.load %arg11[%c0_65, %c2_66] : memref<8x4xf32, #tpu.memory_space<vmem>>, vector<8x1xf32>
    tpu.vector_store %arg11[%c0_65, %c2_66], %88 {strides = array<i32>} : memref<8x4xf32, #tpu.memory_space<vmem>>, vector<8x1xf32>,
    %108 = vector.extract_strided_slice %7 {offsets = [0, 24], sizes = [8, 8], strides = [1, 1]} : vector<8x32xbf16> to vector<8x8xbf16>
    %109 = vector.extract_strided_slice %26 {offsets = [0, 24], sizes = [8, 8], strides = [1, 1]} : vector<8x64xbf16> to vector<8x8xbf16>
    %110 = vector.extract_strided_slice %26 {offsets = [0, 56], sizes = [8, 8], strides = [1, 1]} : vector<8x64xbf16> to vector<8x8xbf16>
    %cst_67 = arith.constant dense<0.000000e+00> : vector<8x8xf32>
    %111 = tpu.matmul %108, %109, %cst_67 {dimension_numbers = #tpu.dot_dimension_numbers<[1], [1], [0], [0], [0, 0, 1, 0], [], []>} : vector<8x8xbf16>, vector<8x8xbf16>, vector<8x8xf32> -> vector<8x8xf32>
    %c0_68 = arith.constant 0 : index
    %c3 = arith.constant 3 : index
    %112 = vector.load %arg11[%c0_68, %c3] : memref<8x4xf32, #tpu.memory_space<vmem>>, vector<8x1xf32>
    %cst_69 = arith.constant dense<0xFF800000> : vector<8xf32>
    %113 = vector.multi_reduction <maximumf>, %111, %cst_69 [1] : vector<8x8xf32> to vector<8xf32>
    %114 = vector.shape_cast %113 : vector<8xf32> to vector<8x1xf32>
    %115 = arith.maximumf %112, %114 : vector<8x1xf32>
    %116 = arith.subf %112, %115 : vector<8x1xf32>
    %117 = math.exp %116 : vector<8x1xf32>
    %118 = vector.broadcast %115 : vector<8x1xf32> to vector<8x8xf32>
    %119 = arith.subf %111, %118 : vector<8x8xf32>
    %120 = math.exp %119 : vector<8x8xf32>
    %c0_70 = arith.constant 0 : index
    %c3_71 = arith.constant 3 : index
    %121 = vector.load %arg12[%c0_70, %c3_71] : memref<8x4xf32, #tpu.memory_space<vmem>>, vector<8x1xf32>
    %122 = arith.mulf %117, %121 : vector<8x1xf32>
    %cst_72 = arith.constant dense<0.000000e+00> : vector<8xf32>
    %123 = vector.multi_reduction <add>, %120, %cst_72 [1] : vector<8x8xf32> to vector<8xf32>
    %124 = vector.shape_cast %123 : vector<8xf32> to vector<8x1xf32>
    %125 = arith.addf %122, %124 : vector<8x1xf32>
    %c0_73 = arith.constant 0 : index
    %c3_74 = arith.constant 3 : index
    %126 = vector.load %arg12[%c0_73, %c3_74] : memref<8x4xf32, #tpu.memory_space<vmem>>, vector<8x1xf32>
    tpu.vector_store %arg12[%c0_73, %c3_74], %125 {strides = array<i32>} : memref<8x4xf32, #tpu.memory_space<vmem>>, vector<8x1xf32>,
    %c0_75 = arith.constant 0 : index
    %c24 = arith.constant 24 : index
    %127 = vector.load %arg13[%c0_75, %c24] : memref<8x32xf32, #tpu.memory_space<vmem>>, vector<8x8xf32>
    %128 = vector.broadcast %117 : vector<8x1xf32> to vector<8x8xf32>
    %129 = arith.mulf %128, %127 : vector<8x8xf32>
    %130 = arith.truncf %120 : vector<8x8xf32> to vector<8x8xbf16>
    %cst_76 = arith.constant dense<0.000000e+00> : vector<8x8xf32>
    %131 = tpu.matmul %130, %110, %cst_76 {dimension_numbers = #tpu.dot_dimension_numbers<[1], [0], [0], [1], [0, 0, 1, 1], [], []>} : vector<8x8xbf16>, vector<8x8xbf16>, vector<8x8xf32> -> vector<8x8xf32>
    %132 = arith.addf %129, %131 : vector<8x8xf32>
    %c0_77 = arith.constant 0 : index
    %c24_78 = arith.constant 24 : index
    %133 = vector.load %arg13[%c0_77, %c24_78] : memref<8x32xf32, #tpu.memory_space<vmem>>, vector<8x8xf32>
    tpu.vector_store %arg13[%c0_77, %c24_78], %132 {strides = array<i32>} : memref<8x32xf32, #tpu.memory_space<vmem>>, vector<8x8xf32>,
    %c0_79 = arith.constant 0 : index
    %c3_80 = arith.constant 3 : index
    %134 = vector.load %arg11[%c0_79, %c3_80] : memref<8x4xf32, #tpu.memory_space<vmem>>, vector<8x1xf32>
    tpu.vector_store %arg11[%c0_79, %c3_80], %115 {strides = array<i32>} : memref<8x4xf32, #tpu.memory_space<vmem>>, vector<8x1xf32>,
    %c1_i32_81 = arith.constant 1 : i32
    %c0_82 = arith.constant 0 : index
    %c0_83 = arith.constant 0 : index
    %135 = vector.load %arg12[%c0_82, %c0_83] : memref<8x4xf32, #tpu.memory_space<vmem>>, vector<8x4xf32>
    %136 = tpu.reciprocal %135 {approx = true} : vector<8x4xf32> -> vector<8x4xf32>
    %c0_84 = arith.constant 0 : index
    %c0_85 = arith.constant 0 : index
    %137 = vector.load %arg13[%c0_84, %c0_85] : memref<8x32xf32, #tpu.memory_space<vmem>>, vector<8x8xf32>
    %138 = vector.extract_strided_slice %136 {offsets = [0, 0], sizes = [8, 1], strides = [1, 1]} : vector<8x4xf32> to vector<8x1xf32>
    %139 = vector.broadcast %138 : vector<8x1xf32> to vector<8x8xf32>
    %140 = arith.mulf %137, %139 : vector<8x8xf32>
    %c0_86 = arith.constant 0 : index
    %c0_87 = arith.constant 0 : index
    %141 = vector.load %arg13[%c0_86, %c0_87] : memref<8x32xf32, #tpu.memory_space<vmem>>, vector<8x8xf32>
    tpu.vector_store %arg13[%c0_86, %c0_87], %140 {strides = array<i32>} : memref<8x32xf32, #tpu.memory_space<vmem>>, vector<8x8xf32>,
    %c0_88 = arith.constant 0 : index
    %c8_89 = arith.constant 8 : index
    %142 = vector.load %arg13[%c0_88, %c8_89] : memref<8x32xf32, #tpu.memory_space<vmem>>, vector<8x8xf32>
    %143 = vector.extract_strided_slice %136 {offsets = [0, 1], sizes = [8, 1], strides = [1, 1]} : vector<8x4xf32> to vector<8x1xf32>
    %144 = vector.broadcast %143 : vector<8x1xf32> to vector<8x8xf32>
    %145 = arith.mulf %142, %144 : vector<8x8xf32>
    %c0_90 = arith.constant 0 : index
    %c8_91 = arith.constant 8 : index
    %146 = vector.load %arg13[%c0_90, %c8_91] : memref<8x32xf32, #tpu.memory_space<vmem>>, vector<8x8xf32>
    tpu.vector_store %arg13[%c0_90, %c8_91], %145 {strides = array<i32>} : memref<8x32xf32, #tpu.memory_space<vmem>>, vector<8x8xf32>,
    %c0_92 = arith.constant 0 : index
    %c16_93 = arith.constant 16 : index
    %147 = vector.load %arg13[%c0_92, %c16_93] : memref<8x32xf32, #tpu.memory_space<vmem>>, vector<8x8xf32>
    %148 = vector.extract_strided_slice %136 {offsets = [0, 2], sizes = [8, 1], strides = [1, 1]} : vector<8x4xf32> to vector<8x1xf32>
    %149 = vector.broadcast %148 : vector<8x1xf32> to vector<8x8xf32>
    %150 = arith.mulf %147, %149 : vector<8x8xf32>
    %c0_94 = arith.constant 0 : index
    %c16_95 = arith.constant 16 : index
    %151 = vector.load %arg13[%c0_94, %c16_95] : memref<8x32xf32, #tpu.memory_space<vmem>>, vector<8x8xf32>
    tpu.vector_store %arg13[%c0_94, %c16_95], %150 {strides = array<i32>} : memref<8x32xf32, #tpu.memory_space<vmem>>, vector<8x8xf32>,
    %c0_96 = arith.constant 0 : index
    %c24_97 = arith.constant 24 : index
    %152 = vector.load %arg13[%c0_96, %c24_97] : memref<8x32xf32, #tpu.memory_space<vmem>>, vector<8x8xf32>
    %153 = vector.extract_strided_slice %136 {offsets = [0, 3], sizes = [8, 1], strides = [1, 1]} : vector<8x4xf32> to vector<8x1xf32>
    %154 = vector.broadcast %153 : vector<8x1xf32> to vector<8x8xf32>
    %155 = arith.mulf %152, %154 : vector<8x8xf32>
    %c0_98 = arith.constant 0 : index
    %c24_99 = arith.constant 24 : index
    %156 = vector.load %arg13[%c0_98, %c24_99] : memref<8x32xf32, #tpu.memory_space<vmem>>, vector<8x8xf32>
    tpu.vector_store %arg13[%c0_98, %c24_99], %155 {strides = array<i32>} : memref<8x32xf32, #tpu.memory_space<vmem>>, vector<8x8xf32>,
    %c0_100 = arith.constant 0 : index
    %c0_101 = arith.constant 0 : index
    %157 = vector.load %arg13[%c0_100, %c0_101] : memref<8x32xf32, #tpu.memory_space<vmem>>, vector<8x32xf32>
    %158 = arith.truncf %157 : vector<8x32xf32> to vector<8x32xbf16>
    %c0_102 = arith.constant 0 : index
    %c0_103 = arith.constant 0 : index
    %159 = vector.load %arg8[%c0_102, %c0_103] : memref<32x32xbf16, #tpu.memory_space<vmem>>, vector<32x32xbf16>
    %cst_104 = arith.constant dense<0.000000e+00> : vector<8x32xf32>
    %160 = tpu.matmul %158, %159, %cst_104 {dimension_numbers = #tpu.dot_dimension_numbers<[1], [0], [0], [1], [0, 0, 1, 1], [], []>} : vector<8x32xbf16>, vector<32x32xbf16>, vector<8x32xf32> -> vector<8x32xf32>
    %c0_105 = arith.constant 0 : index
    %c0_106 = arith.constant 0 : index
    %161 = vector.load %arg9[%c0_105, %c0_106] : memref<1x32xf32, #tpu.memory_space<vmem>>, vector<1x32xf32>
    %162 = vector.broadcast %161 : vector<1x32xf32> to vector<8x32xf32>
    %163 = arith.addf %160, %162 : vector<8x32xf32>
    %c0_107 = arith.constant 0 : index
    %c0_108 = arith.constant 0 : index
    %c0_109 = arith.constant 0 : index
    %164 = vector.load %arg10[%c0_107, %c0_108, %c0_109] : memref<1x8x32xf32, #tpu.memory_space<vmem>>, vector<1x8x32xf32>
    %165 = vector.shape_cast %164 : vector<1x8x32xf32> to vector<8x32xf32>
    %166 = vector.shape_cast %163 : vector<8x32xf32> to vector<1x8x32xf32>
    tpu.vector_store %arg10[%c0_107, %c0_108, %c0_109], %166 {strides = array<i32>} : memref<1x8x32xf32, #tpu.memory_space<vmem>>, vector<1x8x32xf32>,
    return
  }
  func.func @transform_0(%arg0: i32, %arg1: i32) -> (i32, i32, i32) {
    %c0_i32 = arith.constant 0 : i32
    %c0_i32_0 = arith.constant 0 : i32
    return %arg0, %arg1, %c0_i32 : i32, i32, i32
  }
  func.func @transform_1(%arg0: i32, %arg1: i32) -> (i32, i32, i32) {
    %c0_i32 = arith.constant 0 : i32
    %c0_i32_0 = arith.constant 0 : i32
    %c0_i32_1 = arith.constant 0 : i32
    return %arg0, %c0_i32, %c0_i32_0 : i32, i32, i32
  }
  func.func @transform_2(%arg0: i32, %arg1: i32) -> (i32, i32) {
    %c0_i32 = arith.constant 0 : i32
    %c0_i32_0 = arith.constant 0 : i32
    %c0_i32_1 = arith.constant 0 : i32
    return %c0_i32, %c0_i32_0 : i32, i32
  }
  func.func @transform_3(%arg0: i32, %arg1: i32) -> (i32, i32) {
    %c0_i32 = arith.constant 0 : i32
    %c0_i32_0 = arith.constant 0 : i32
    %c0_i32_1 = arith.constant 0 : i32
    return %c0_i32, %c0_i32_0 : i32, i32
  }
  func.func @transform_4(%arg0: i32, %arg1: i32) -> (i32, i32) {
    %c0_i32 = arith.constant 0 : i32
    %c0_i32_0 = arith.constant 0 : i32
    %c0_i32_1 = arith.constant 0 : i32
    return %c0_i32, %c0_i32_0 : i32, i32
  }
  func.func @transform_5(%arg0: i32, %arg1: i32) -> (i32, i32) {
    %c0_i32 = arith.constant 0 : i32
    %c0_i32_0 = arith.constant 0 : i32
    %c0_i32_1 = arith.constant 0 : i32
    return %c0_i32, %c0_i32_0 : i32, i32
  }
  func.func @transform_6(%arg0: i32, %arg1: i32) -> (i32, i32) {
    %c0_i32 = arith.constant 0 : i32
    %c0_i32_0 = arith.constant 0 : i32
    %c0_i32_1 = arith.constant 0 : i32
    return %c0_i32, %c0_i32_0 : i32, i32
  }
  func.func @transform_7(%arg0: i32, %arg1: i32) -> (i32, i32) {
    %c0_i32 = arith.constant 0 : i32
    %c0_i32_0 = arith.constant 0 : i32
    %c0_i32_1 = arith.constant 0 : i32
    return %c0_i32, %c0_i32_0 : i32, i32
  }
  func.func @transform_8(%arg0: i32, %arg1: i32) -> (i32, i32, i32) {
    %c0_i32 = arith.constant 0 : i32
    %c0_i32_0 = arith.constant 0 : i32
    return %arg0, %arg1, %c0_i32 : i32, i32, i32
  }
}

module attributes {stable_mosaic.version = 11 : i64} {
  func.func @_mha_flash_kernel(%arg0: i32, %arg1: i32, %arg2: memref<1x8x32xbf16, #tpu.memory_space<vmem>>, %arg3: memref<1x8x32xbf16, #tpu.memory_space<vmem>>, %arg4: memref<32x32xbf16, #tpu.memory_space<vmem>>, %arg5: memref<1x32xf32, #tpu.memory_space<vmem>>, %arg6: memref<32x64xbf16, #tpu.memory_space<vmem>>, %arg7: memref<1x64xf32, #tpu.memory_space<vmem>>, %arg8: memref<32x32xbf16, #tpu.memory_space<vmem>>, %arg9: memref<1x32xf32, #tpu.memory_space<vmem>>, %arg10: memref<1x8x32xf32, #tpu.memory_space<vmem>>, %arg11: memref<8x4xf32, #tpu.memory_space<vmem>>, %arg12: memref<8x4xf32, #tpu.memory_space<vmem>>, %arg13: memref<8x32xf32, #tpu.memory_space<vmem>>) attributes {dimension_semantics = [#tpu.dimension_semantics<parallel>, #tpu.dimension_semantics<parallel>], iteration_bounds = array<i64: 2, 1>, scalar_prefetch = 0 : i64, scratch_operands = 3 : i64, tpu.core_type = #tpu.core_type<tc>, window_params = [{transform_indices = @transform_0, window_bounds = array<i64: 1, 8, 32>}, {transform_indices = @transform_1, window_bounds = array<i64: 1, 8, 32>}, {pipeline_mode = #tpu.pipeline_mode<synchronous>, transform_indices = @transform_2, window_bounds = array<i64: 32, 32>}, {pipeline_mode = #tpu.pipeline_mode<synchronous>, transform_indices = @transform_3, window_bounds = array<i64: 1, 32>}, {pipeline_mode = #tpu.pipeline_mode<synchronous>, transform_indices = @transform_4, window_bounds = array<i64: 32, 64>}, {pipeline_mode = #tpu.pipeline_mode<synchronous>, transform_indices = @transform_5, window_bounds = array<i64: 1, 64>}, {pipeline_mode = #tpu.pipeline_mode<synchronous>, transform_indices = @transform_6, window_bounds = array<i64: 32, 32>}, {pipeline_mode = #tpu.pipeline_mode<synchronous>, transform_indices = @transform_7, window_bounds = array<i64: 1, 32>}, {transform_indices = @transform_8, window_bounds = array<i64: 1, 8, 32>}]} {
    %c0 = arith.constant 0 : index
    %c0_0 = arith.constant 0 : index
    %c0_1 = arith.constant 0 : index
    %0 = vector.load %arg2[%c0, %c0_0, %c0_1] : memref<1x8x32xbf16, #tpu.memory_space<vmem>>, vector<1x8x32xbf16>
    %1 = vector.shape_cast %0 : vector<1x8x32xbf16> to vector<8x32xbf16>
    %c0_2 = arith.constant 0 : index
    %c0_3 = arith.constant 0 : index
    %2 = vector.load %arg4[%c0_2, %c0_3] : memref<32x32xbf16, #tpu.memory_space<vmem>>, vector<32x32xbf16>
    %cst = arith.constant dense<0.000000e+00> : vector<8x32xf32>
    %3 = tpu.matmul %1, %2, %cst {dimension_numbers = #tpu.dot_dimension_numbers<[1], [0], [0], [1], [0, 0, 1, 1], [], []>} : vector<8x32xbf16>, vector<32x32xbf16>, vector<8x32xf32> -> vector<8x32xf32>
    %c0_4 = arith.constant 0 : index
    %c0_5 = arith.constant 0 : index
    %4 = vector.load %arg5[%c0_4, %c0_5] : memref<1x32xf32, #tpu.memory_space<vmem>>, vector<1x32xf32>
    %5 = vector.broadcast %4 : vector<1x32xf32> to vector<8x32xf32>
    %6 = arith.addf %3, %5 : vector<8x32xf32>
    %7 = arith.truncf %6 : vector<8x32xf32> to vector<8x32xbf16>
    %cst_6 = arith.constant 0xFF800000 : f32
    %8 = vector.broadcast %cst_6 : f32 to vector<8x4xf32>
    %c0_7 = arith.constant 0 : index
    %c0_8 = arith.constant 0 : index
    %9 = vector.load %arg11[%c0_7, %c0_8] : memref<8x4xf32, #tpu.memory_space<vmem>>, vector<8x4xf32>
    tpu.vector_store %arg11[%c0_7, %c0_8], %8 {strides = array<i32>} : memref<8x4xf32, #tpu.memory_space<vmem>>, vector<8x4xf32>,
    %cst_9 = arith.constant 0.000000e+00 : f32
    %10 = vector.broadcast %cst_9 : f32 to vector<8x4xf32>
    %c0_10 = arith.constant 0 : index
    %c0_11 = arith.constant 0 : index
    %11 = vector.load %arg12[%c0_10, %c0_11] : memref<8x4xf32, #tpu.memory_space<vmem>>, vector<8x4xf32>
    tpu.vector_store %arg12[%c0_10, %c0_11], %10 {strides = array<i32>} : memref<8x4xf32, #tpu.memory_space<vmem>>, vector<8x4xf32>,
    %cst_12 = arith.constant 0.000000e+00 : f32
    %12 = vector.broadcast %cst_12 : f32 to vector<8x32xf32>
    %c0_13 = arith.constant 0 : index
    %c0_14 = arith.constant 0 : index
    %13 = vector.load %arg13[%c0_13, %c0_14] : memref<8x32xf32, #tpu.memory_space<vmem>>, vector<8x32xf32>
    tpu.vector_store %arg13[%c0_13, %c0_14], %12 {strides = array<i32>} : memref<8x32xf32, #tpu.memory_space<vmem>>, vector<8x32xf32>,
    %c0_i32 = arith.constant 0 : i32
    %c1_i32 = arith.constant 1 : i32
    %14 = arith.muli %c0_i32, %c1_i32 : i32
    %c0_i32_15 = arith.constant 0 : i32
    %15 = arith.addi %c0_i32_15, %14 : i32
    %c8_i32 = arith.constant 8 : i32
    %16 = arith.muli %15, %c8_i32 : i32
    %17 = tpu.assume_multiple %16, 8 : i32
    %c0_16 = arith.constant 0 : index
    %18 = arith.index_cast %17 : i32 to index
    %c0_17 = arith.constant 0 : index
    %19 = vector.load %arg3[%c0_16, %18, %c0_17] : memref<1x8x32xbf16, #tpu.memory_space<vmem>>, vector<1x8x32xbf16>
    %20 = vector.shape_cast %19 : vector<1x8x32xbf16> to vector<8x32xbf16>
    %c0_18 = arith.constant 0 : index
    %c0_19 = arith.constant 0 : index
    %21 = vector.load %arg6[%c0_18, %c0_19] : memref<32x64xbf16, #tpu.memory_space<vmem>>, vector<32x64xbf16>
    %cst_20 = arith.constant dense<0.000000e+00> : vector<8x64xf32>
    %22 = tpu.matmul %20, %21, %cst_20 {dimension_numbers = #tpu.dot_dimension_numbers<[1], [0], [0], [1], [0, 0, 1, 1], [], []>} : vector<8x32xbf16>, vector<32x64xbf16>, vector<8x64xf32> -> vector<8x64xf32>
    %c0_21 = arith.constant 0 : index
    %c0_22 = arith.constant 0 : index
    %23 = vector.load %arg7[%c0_21, %c0_22] : memref<1x64xf32, #tpu.memory_space<vmem>>, vector<1x64xf32>
    %24 = vector.broadcast %23 : vector<1x64xf32> to vector<8x64xf32>
    %25 = arith.addf %22, %24 : vector<8x64xf32>
    %26 = arith.truncf %25 : vector<8x64xf32> to vector<8x64xbf16>
    %27 = vector.extract_strided_slice %7 {offsets = [0, 0], sizes = [8, 8], strides = [1, 1]} : vector<8x32xbf16> to vector<8x8xbf16>
    %28 = vector.extract_strided_slice %26 {offsets = [0, 0], sizes = [8, 8], strides = [1, 1]} : vector<8x64xbf16> to vector<8x8xbf16>
    %29 = vector.extract_strided_slice %26 {offsets = [0, 32], sizes = [8, 8], strides = [1, 1]} : vector<8x64xbf16> to vector<8x8xbf16>
    %cst_23 = arith.constant dense<0.000000e+00> : vector<8x8xf32>
    %30 = tpu.matmul %27, %28, %cst_23 {dimension_numbers = #tpu.dot_dimension_numbers<[1], [1], [0], [0], [0, 0, 1, 0], [], []>} : vector<8x8xbf16>, vector<8x8xbf16>, vector<8x8xf32> -> vector<8x8xf32>
    %c0_24 = arith.constant 0 : index
    %c0_25 = arith.constant 0 : index
    %31 = vector.load %arg11[%c0_24, %c0_25] : memref<8x4xf32, #tpu.memory_space<vmem>>, vector<8x1xf32>
    %cst_26 = arith.constant dense<0xFF800000> : vector<8xf32>
    %32 = vector.multi_reduction <maximumf>, %30, %cst_26 [1] : vector<8x8xf32> to vector<8xf32>
    %33 = vector.shape_cast %32 : vector<8xf32> to vector<8x1xf32>
    %34 = arith.maximumf %31, %33 : vector<8x1xf32>
    %35 = arith.subf %31, %34 : vector<8x1xf32>
    %36 = math.exp %35 : vector<8x1xf32>
    %37 = vector.broadcast %34 : vector<8x1xf32> to vector<8x8xf32>
    %38 = arith.subf %30, %37 : vector<8x8xf32>
    %39 = math.exp %38 : vector<8x8xf32>
    %c0_27 = arith.constant 0 : index
    %c0_28 = arith.constant 0 : index
    %40 = vector.load %arg12[%c0_27, %c0_28] : memref<8x4xf32, #tpu.memory_space<vmem>>, vector<8x1xf32>
    %41 = arith.mulf %36, %40 : vector<8x1xf32>
    %cst_29 = arith.constant dense<0.000000e+00> : vector<8xf32>
    %42 = vector.multi_reduction <add>, %39, %cst_29 [1] : vector<8x8xf32> to vector<8xf32>
    %43 = vector.shape_cast %42 : vector<8xf32> to vector<8x1xf32>
    %44 = arith.addf %41, %43 : vector<8x1xf32>
    %c0_30 = arith.constant 0 : index
    %c0_31 = arith.constant 0 : index
    %45 = vector.load %arg12[%c0_30, %c0_31] : memref<8x4xf32, #tpu.memory_space<vmem>>, vector<8x1xf32>
    tpu.vector_store %arg12[%c0_30, %c0_31], %44 {strides = array<i32>} : memref<8x4xf32, #tpu.memory_space<vmem>>, vector<8x1xf32>,
    %c0_32 = arith.constant 0 : index
    %c0_33 = arith.constant 0 : index
    %46 = vector.load %arg13[%c0_32, %c0_33] : memref<8x32xf32, #tpu.memory_space<vmem>>, vector<8x8xf32>
    %47 = vector.broadcast %36 : vector<8x1xf32> to vector<8x8xf32>
    %48 = arith.mulf %47, %46 : vector<8x8xf32>
    %49 = arith.truncf %39 : vector<8x8xf32> to vector<8x8xbf16>
    %cst_34 = arith.constant dense<0.000000e+00> : vector<8x8xf32>
    %50 = tpu.matmul %49, %29, %cst_34 {dimension_numbers = #tpu.dot_dimension_numbers<[1], [0], [0], [1], [0, 0, 1, 1], [], []>} : vector<8x8xbf16>, vector<8x8xbf16>, vector<8x8xf32> -> vector<8x8xf32>
    %51 = arith.addf %48, %50 : vector<8x8xf32>
    %c0_35 = arith.constant 0 : index
    %c0_36 = arith.constant 0 : index
    %52 = vector.load %arg13[%c0_35, %c0_36] : memref<8x32xf32, #tpu.memory_space<vmem>>, vector<8x8xf32>
    tpu.vector_store %arg13[%c0_35, %c0_36], %51 {strides = array<i32>} : memref<8x32xf32, #tpu.memory_space<vmem>>, vector<8x8xf32>,
    %c0_37 = arith.constant 0 : index
    %c0_38 = arith.constant 0 : index
    %53 = vector.load %arg11[%c0_37, %c0_38] : memref<8x4xf32, #tpu.memory_space<vmem>>, vector<8x1xf32>
    tpu.vector_store %arg11[%c0_37, %c0_38], %34 {strides = array<i32>} : memref<8x4xf32, #tpu.memory_space<vmem>>, vector<8x1xf32>,
    %54 = vector.extract_strided_slice %7 {offsets = [0, 8], sizes = [8, 8], strides = [1, 1]} : vector<8x32xbf16> to vector<8x8xbf16>
    %55 = vector.extract_strided_slice %26 {offsets = [0, 8], sizes = [8, 8], strides = [1, 1]} : vector<8x64xbf16> to vector<8x8xbf16>
    %56 = vector.extract_strided_slice %26 {offsets = [0, 40], sizes = [8, 8], strides = [1, 1]} : vector<8x64xbf16> to vector<8x8xbf16>
    %cst_39 = arith.constant dense<0.000000e+00> : vector<8x8xf32>
    %57 = tpu.matmul %54, %55, %cst_39 {dimension_numbers = #tpu.dot_dimension_numbers<[1], [1], [0], [0], [0, 0, 1, 0], [], []>} : vector<8x8xbf16>, vector<8x8xbf16>, vector<8x8xf32> -> vector<8x8xf32>
    %c0_40 = arith.constant 0 : index
    %c1 = arith.constant 1 : index
    %58 = vector.load %arg11[%c0_40, %c1] : memref<8x4xf32, #tpu.memory_space<vmem>>, vector<8x1xf32>
    %cst_41 = arith.constant dense<0xFF800000> : vector<8xf32>
    %59 = vector.multi_reduction <maximumf>, %57, %cst_41 [1] : vector<8x8xf32> to vector<8xf32>
    %60 = vector.shape_cast %59 : vector<8xf32> to vector<8x1xf32>
    %61 = arith.maximumf %58, %60 : vector<8x1xf32>
    %62 = arith.subf %58, %61 : vector<8x1xf32>
    %63 = math.exp %62 : vector<8x1xf32>
    %64 = vector.broadcast %61 : vector<8x1xf32> to vector<8x8xf32>
    %65 = arith.subf %57, %64 : vector<8x8xf32>
    %66 = math.exp %65 : vector<8x8xf32>
    %c0_42 = arith.constant 0 : index
    %c1_43 = arith.constant 1 : index
    %67 = vector.load %arg12[%c0_42, %c1_43] : memref<8x4xf32, #tpu.memory_space<vmem>>, vector<8x1xf32>
    %68 = arith.mulf %63, %67 : vector<8x1xf32>
    %cst_44 = arith.constant dense<0.000000e+00> : vector<8xf32>
    %69 = vector.multi_reduction <add>, %66, %cst_44 [1] : vector<8x8xf32> to vector<8xf32>
    %70 = vector.shape_cast %69 : vector<8xf32> to vector<8x1xf32>
    %71 = arith.addf %68, %70 : vector<8x1xf32>
    %c0_45 = arith.constant 0 : index
    %c1_46 = arith.constant 1 : index
    %72 = vector.load %arg12[%c0_45, %c1_46] : memref<8x4xf32, #tpu.memory_space<vmem>>, vector<8x1xf32>
    tpu.vector_store %arg12[%c0_45, %c1_46], %71 {strides = array<i32>} : memref<8x4xf32, #tpu.memory_space<vmem>>, vector<8x1xf32>,
    %c0_47 = arith.constant 0 : index
    %c8 = arith.constant 8 : index
    %73 = vector.load %arg13[%c0_47, %c8] : memref<8x32xf32, #tpu.memory_space<vmem>>, vector<8x8xf32>
    %74 = vector.broadcast %63 : vector<8x1xf32> to vector<8x8xf32>
    %75 = arith.mulf %74, %73 : vector<8x8xf32>
    %76 = arith.truncf %66 : vector<8x8xf32> to vector<8x8xbf16>
    %cst_48 = arith.constant dense<0.000000e+00> : vector<8x8xf32>
    %77 = tpu.matmul %76, %56, %cst_48 {dimension_numbers = #tpu.dot_dimension_numbers<[1], [0], [0], [1], [0, 0, 1, 1], [], []>} : vector<8x8xbf16>, vector<8x8xbf16>, vector<8x8xf32> -> vector<8x8xf32>
    %78 = arith.addf %75, %77 : vector<8x8xf32>
    %c0_49 = arith.constant 0 : index
    %c8_50 = arith.constant 8 : index
    %79 = vector.load %arg13[%c0_49, %c8_50] : memref<8x32xf32, #tpu.memory_space<vmem>>, vector<8x8xf32>
    tpu.vector_store %arg13[%c0_49, %c8_50], %78 {strides = array<i32>} : memref<8x32xf32, #tpu.memory_space<vmem>>, vector<8x8xf32>,
    %c0_51 = arith.constant 0 : index
    %c1_52 = arith.constant 1 : index
    %80 = vector.load %arg11[%c0_51, %c1_52] : memref<8x4xf32, #tpu.memory_space<vmem>>, vector<8x1xf32>
    tpu.vector_store %arg11[%c0_51, %c1_52], %61 {strides = array<i32>} : memref<8x4xf32, #tpu.memory_space<vmem>>, vector<8x1xf32>,
    %81 = vector.extract_strided_slice %7 {offsets = [0, 16], sizes = [8, 8], strides = [1, 1]} : vector<8x32xbf16> to vector<8x8xbf16>
    %82 = vector.extract_strided_slice %26 {offsets = [0, 16], sizes = [8, 8], strides = [1, 1]} : vector<8x64xbf16> to vector<8x8xbf16>
    %83 = vector.extract_strided_slice %26 {offsets = [0, 48], sizes = [8, 8], strides = [1, 1]} : vector<8x64xbf16> to vector<8x8xbf16>
    %cst_53 = arith.constant dense<0.000000e+00> : vector<8x8xf32>
    %84 = tpu.matmul %81, %82, %cst_53 {dimension_numbers = #tpu.dot_dimension_numbers<[1], [1], [0], [0], [0, 0, 1, 0], [], []>} : vector<8x8xbf16>, vector<8x8xbf16>, vector<8x8xf32> -> vector<8x8xf32>
    %c0_54 = arith.constant 0 : index
    %c2 = arith.constant 2 : index
    %85 = vector.load %arg11[%c0_54, %c2] : memref<8x4xf32, #tpu.memory_space<vmem>>, vector<8x1xf32>
    %cst_55 = arith.constant dense<0xFF800000> : vector<8xf32>
    %86 = vector.multi_reduction <maximumf>, %84, %cst_55 [1] : vector<8x8xf32> to vector<8xf32>
    %87 = vector.shape_cast %86 : vector<8xf32> to vector<8x1xf32>
    %88 = arith.maximumf %85, %87 : vector<8x1xf32>
    %89 = arith.subf %85, %88 : vector<8x1xf32>
    %90 = math.exp %89 : vector<8x1xf32>
    %91 = vector.broadcast %88 : vector<8x1xf32> to vector<8x8xf32>
    %92 = arith.subf %84, %91 : vector<8x8xf32>
    %93 = math.exp %92 : vector<8x8xf32>
    %c0_56 = arith.constant 0 : index
    %c2_57 = arith.constant 2 : index
    %94 = vector.load %arg12[%c0_56, %c2_57] : memref<8x4xf32, #tpu.memory_space<vmem>>, vector<8x1xf32>
    %95 = arith.mulf %90, %94 : vector<8x1xf32>
    %cst_58 = arith.constant dense<0.000000e+00> : vector<8xf32>
    %96 = vector.multi_reduction <add>, %93, %cst_58 [1] : vector<8x8xf32> to vector<8xf32>
    %97 = vector.shape_cast %96 : vector<8xf32> to vector<8x1xf32>
    %98 = arith.addf %95, %97 : vector<8x1xf32>
    %c0_59 = arith.constant 0 : index
    %c2_60 = arith.constant 2 : index
    %99 = vector.load %arg12[%c0_59, %c2_60] : memref<8x4xf32, #tpu.memory_space<vmem>>, vector<8x1xf32>
    tpu.vector_store %arg12[%c0_59, %c2_60], %98 {strides = array<i32>} : memref<8x4xf32, #tpu.memory_space<vmem>>, vector<8x1xf32>,
    %c0_61 = arith.constant 0 : index
    %c16 = arith.constant 16 : index
    %100 = vector.load %arg13[%c0_61, %c16] : memref<8x32xf32, #tpu.memory_space<vmem>>, vector<8x8xf32>
    %101 = vector.broadcast %90 : vector<8x1xf32> to vector<8x8xf32>
    %102 = arith.mulf %101, %100 : vector<8x8xf32>
    %103 = arith.truncf %93 : vector<8x8xf32> to vector<8x8xbf16>
    %cst_62 = arith.constant dense<0.000000e+00> : vector<8x8xf32>
    %104 = tpu.matmul %103, %83, %cst_62 {dimension_numbers = #tpu.dot_dimension_numbers<[1], [0], [0], [1], [0, 0, 1, 1], [], []>} : vector<8x8xbf16>, vector<8x8xbf16>, vector<8x8xf32> -> vector<8x8xf32>
    %105 = arith.addf %102, %104 : vector<8x8xf32>
    %c0_63 = arith.constant 0 : index
    %c16_64 = arith.constant 16 : index
    %106 = vector.load %arg13[%c0_63, %c16_64] : memref<8x32xf32, #tpu.memory_space<vmem>>, vector<8x8xf32>
    tpu.vector_store %arg13[%c0_63, %c16_64], %105 {strides = array<i32>} : memref<8x32xf32, #tpu.memory_space<vmem>>, vector<8x8xf32>,
    %c0_65 = arith.constant 0 : index
    %c2_66 = arith.constant 2 : index
    %107 = vector.load %arg11[%c0_65, %c2_66] : memref<8x4xf32, #tpu.memory_space<vmem>>, vector<8x1xf32>
    tpu.vector_store %arg11[%c0_65, %c2_66], %88 {strides = array<i32>} : memref<8x4xf32, #tpu.memory_space<vmem>>, vector<8x1xf32>,
    %108 = vector.extract_strided_slice %7 {offsets = [0, 24], sizes = [8, 8], strides = [1, 1]} : vector<8x32xbf16> to vector<8x8xbf16>
    %109 = vector.extract_strided_slice %26 {offsets = [0, 24], sizes = [8, 8], strides = [1, 1]} : vector<8x64xbf16> to vector<8x8xbf16>
    %110 = vector.extract_strided_slice %26 {offsets = [0, 56], sizes = [8, 8], strides = [1, 1]} : vector<8x64xbf16> to vector<8x8xbf16>
    %cst_67 = arith.constant dense<0.000000e+00> : vector<8x8xf32>
    %111 = tpu.matmul %108, %109, %cst_67 {dimension_numbers = #tpu.dot_dimension_numbers<[1], [1], [0], [0], [0, 0, 1, 0], [], []>} : vector<8x8xbf16>, vector<8x8xbf16>, vector<8x8xf32> -> vector<8x8xf32>
    %c0_68 = arith.constant 0 : index
    %c3 = arith.constant 3 : index
    %112 = vector.load %arg11[%c0_68, %c3] : memref<8x4xf32, #tpu.memory_space<vmem>>, vector<8x1xf32>
    %cst_69 = arith.constant dense<0xFF800000> : vector<8xf32>
    %113 = vector.multi_reduction <maximumf>, %111, %cst_69 [1] : vector<8x8xf32> to vector<8xf32>
    %114 = vector.shape_cast %113 : vector<8xf32> to vector<8x1xf32>
    %115 = arith.maximumf %112, %114 : vector<8x1xf32>
    %116 = arith.subf %112, %115 : vector<8x1xf32>
    %117 = math.exp %116 : vector<8x1xf32>
    %118 = vector.broadcast %115 : vector<8x1xf32> to vector<8x8xf32>
    %119 = arith.subf %111, %118 : vector<8x8xf32>
    %120 = math.exp %119 : vector<8x8xf32>
    %c0_70 = arith.constant 0 : index
    %c3_71 = arith.constant 3 : index
    %121 = vector.load %arg12[%c0_70, %c3_71] : memref<8x4xf32, #tpu.memory_space<vmem>>, vector<8x1xf32>
    %122 = arith.mulf %117, %121 : vector<8x1xf32>
    %cst_72 = arith.constant dense<0.000000e+00> : vector<8xf32>
    %123 = vector.multi_reduction <add>, %120, %cst_72 [1] : vector<8x8xf32> to vector<8xf32>
    %124 = vector.shape_cast %123 : vector<8xf32> to vector<8x1xf32>
    %125 = arith.addf %122, %124 : vector<8x1xf32>
    %c0_73 = arith.constant 0 : index
    %c3_74 = arith.constant 3 : index
    %126 = vector.load %arg12[%c0_73, %c3_74] : memref<8x4xf32, #tpu.memory_space<vmem>>, vector<8x1xf32>
    tpu.vector_store %arg12[%c0_73, %c3_74], %125 {strides = array<i32>} : memref<8x4xf32, #tpu.memory_space<vmem>>, vector<8x1xf32>,
    %c0_75 = arith.constant 0 : index
    %c24 = arith.constant 24 : index
    %127 = vector.load %arg13[%c0_75, %c24] : memref<8x32xf32, #tpu.memory_space<vmem>>, vector<8x8xf32>
    %128 = vector.broadcast %117 : vector<8x1xf32> to vector<8x8xf32>
    %129 = arith.mulf %128, %127 : vector<8x8xf32>
    %130 = arith.truncf %120 : vector<8x8xf32> to vector<8x8xbf16>
    %cst_76 = arith.constant dense<0.000000e+00> : vector<8x8xf32>
    %131 = tpu.matmul %130, %110, %cst_76 {dimension_numbers = #tpu.dot_dimension_numbers<[1], [0], [0], [1], [0, 0, 1, 1], [], []>} : vector<8x8xbf16>, vector<8x8xbf16>, vector<8x8xf32> -> vector<8x8xf32>
    %132 = arith.addf %129, %131 : vector<8x8xf32>
    %c0_77 = arith.constant 0 : index
    %c24_78 = arith.constant 24 : index
    %133 = vector.load %arg13[%c0_77, %c24_78] : memref<8x32xf32, #tpu.memory_space<vmem>>, vector<8x8xf32>
    tpu.vector_store %arg13[%c0_77, %c24_78], %132 {strides = array<i32>} : memref<8x32xf32, #tpu.memory_space<vmem>>, vector<8x8xf32>,
    %c0_79 = arith.constant 0 : index
    %c3_80 = arith.constant 3 : index
    %134 = vector.load %arg11[%c0_79, %c3_80] : memref<8x4xf32, #tpu.memory_space<vmem>>, vector<8x1xf32>
    tpu.vector_store %arg11[%c0_79, %c3_80], %115 {strides = array<i32>} : memref<8x4xf32, #tpu.memory_space<vmem>>, vector<8x1xf32>,
    %c1_i32_81 = arith.constant 1 : i32
    %c0_82 = arith.constant 0 : index
    %c0_83 = arith.constant 0 : index
    %135 = vector.load %arg12[%c0_82, %c0_83] : memref<8x4xf32, #tpu.memory_space<vmem>>, vector<8x4xf32>
    %136 = tpu.reciprocal %135 {approx = true} : vector<8x4xf32> -> vector<8x4xf32>
    %c0_84 = arith.constant 0 : index
    %c0_85 = arith.constant 0 : index
    %137 = vector.load %arg13[%c0_84, %c0_85] : memref<8x32xf32, #tpu.memory_space<vmem>>, vector<8x8xf32>
    %138 = vector.extract_strided_slice %136 {offsets = [0, 0], sizes = [8, 1], strides = [1, 1]} : vector<8x4xf32> to vector<8x1xf32>
    %139 = vector.broadcast %138 : vector<8x1xf32> to vector<8x8xf32>
    %140 = arith.mulf %137, %139 : vector<8x8xf32>
    %c0_86 = arith.constant 0 : index
    %c0_87 = arith.constant 0 : index
    %141 = vector.load %arg13[%c0_86, %c0_87] : memref<8x32xf32, #tpu.memory_space<vmem>>, vector<8x8xf32>
    tpu.vector_store %arg13[%c0_86, %c0_87], %140 {strides = array<i32>} : memref<8x32xf32, #tpu.memory_space<vmem>>, vector<8x8xf32>,
    %c0_88 = arith.constant 0 : index
    %c8_89 = arith.constant 8 : index
    %142 = vector.load %arg13[%c0_88, %c8_89] : memref<8x32xf32, #tpu.memory_space<vmem>>, vector<8x8xf32>
    %143 = vector.extract_strided_slice %136 {offsets = [0, 1], sizes = [8, 1], strides = [1, 1]} : vector<8x4xf32> to vector<8x1xf32>
    %144 = vector.broadcast %143 : vector<8x1xf32> to vector<8x8xf32>
    %145 = arith.mulf %142, %144 : vector<8x8xf32>
    %c0_90 = arith.constant 0 : index
    %c8_91 = arith.constant 8 : index
    %146 = vector.load %arg13[%c0_90, %c8_91] : memref<8x32xf32, #tpu.memory_space<vmem>>, vector<8x8xf32>
    tpu.vector_store %arg13[%c0_90, %c8_91], %145 {strides = array<i32>} : memref<8x32xf32, #tpu.memory_space<vmem>>, vector<8x8xf32>,
    %c0_92 = arith.constant 0 : index
    %c16_93 = arith.constant 16 : index
    %147 = vector.load %arg13[%c0_92, %c16_93] : memref<8x32xf32, #tpu.memory_space<vmem>>, vector<8x8xf32>
    %148 = vector.extract_strided_slice %136 {offsets = [0, 2], sizes = [8, 1], strides = [1, 1]} : vector<8x4xf32> to vector<8x1xf32>
    %149 = vector.broadcast %148 : vector<8x1xf32> to vector<8x8xf32>
    %150 = arith.mulf %147, %149 : vector<8x8xf32>
    %c0_94 = arith.constant 0 : index
    %c16_95 = arith.constant 16 : index
    %151 = vector.load %arg13[%c0_94, %c16_95] : memref<8x32xf32, #tpu.memory_space<vmem>>, vector<8x8xf32>
    tpu.vector_store %arg13[%c0_94, %c16_95], %150 {strides = array<i32>} : memref<8x32xf32, #tpu.memory_space<vmem>>, vector<8x8xf32>,
    %c0_96 = arith.constant 0 : index
    %c24_97 = arith.constant 24 : index
    %152 = vector.load %arg13[%c0_96, %c24_97] : memref<8x32xf32, #tpu.memory_space<vmem>>, vector<8x8xf32>
    %153 = vector.extract_strided_slice %136 {offsets = [0, 3], sizes = [8, 1], strides = [1, 1]} : vector<8x4xf32> to vector<8x1xf32>
    %154 = vector.broadcast %153 : vector<8x1xf32> to vector<8x8xf32>
    %155 = arith.mulf %152, %154 : vector<8x8xf32>
    %c0_98 = arith.constant 0 : index
    %c24_99 = arith.constant 24 : index
    %156 = vector.load %arg13[%c0_98, %c24_99] : memref<8x32xf32, #tpu.memory_space<vmem>>, vector<8x8xf32>
    tpu.vector_store %arg13[%c0_98, %c24_99], %155 {strides = array<i32>} : memref<8x32xf32, #tpu.memory_space<vmem>>, vector<8x8xf32>,
    %c0_100 = arith.constant 0 : index
    %c0_101 = arith.constant 0 : index
    %157 = vector.load %arg13[%c0_100, %c0_101] : memref<8x32xf32, #tpu.memory_space<vmem>>, vector<8x32xf32>
    %158 = arith.truncf %157 : vector<8x32xf32> to vector<8x32xbf16>
    %c0_102 = arith.constant 0 : index
    %c0_103 = arith.constant 0 : index
    %159 = vector.load %arg8[%c0_102, %c0_103] : memref<32x32xbf16, #tpu.memory_space<vmem>>, vector<32x32xbf16>
    %cst_104 = arith.constant dense<0.000000e+00> : vector<8x32xf32>
    %160 = tpu.matmul %158, %159, %cst_104 {dimension_numbers = #tpu.dot_dimension_numbers<[1], [0], [0], [1], [0, 0, 1, 1], [], []>} : vector<8x32xbf16>, vector<32x32xbf16>, vector<8x32xf32> -> vector<8x32xf32>
    %c0_105 = arith.constant 0 : index
    %c0_106 = arith.constant 0 : index
    %161 = vector.load %arg9[%c0_105, %c0_106] : memref<1x32xf32, #tpu.memory_space<vmem>>, vector<1x32xf32>
    %162 = vector.broadcast %161 : vector<1x32xf32> to vector<8x32xf32>
    %163 = arith.addf %160, %162 : vector<8x32xf32>
    %c0_107 = arith.constant 0 : index
    %c0_108 = arith.constant 0 : index
    %c0_109 = arith.constant 0 : index
    %164 = vector.load %arg10[%c0_107, %c0_108, %c0_109] : memref<1x8x32xf32, #tpu.memory_space<vmem>>, vector<1x8x32xf32>
    %165 = vector.shape_cast %164 : vector<1x8x32xf32> to vector<8x32xf32>
    %166 = vector.shape_cast %163 : vector<8x32xf32> to vector<1x8x32xf32>
    tpu.vector_store %arg10[%c0_107, %c0_108, %c0_109], %166 {strides = array<i32>} : memref<1x8x32xf32, #tpu.memory_space<vmem>>, vector<1x8x32xf32>,
    return
  }
  func.func @transform_0(%arg0: i32, %arg1: i32) -> (i32, i32, i32) {
    %c0_i32 = arith.constant 0 : i32
    %c0_i32_0 = arith.constant 0 : i32
    return %arg0, %arg1, %c0_i32 : i32, i32, i32
  }
  func.func @transform_1(%arg0: i32, %arg1: i32) -> (i32, i32, i32) {
    %c0_i32 = arith.constant 0 : i32
    %c0_i32_0 = arith.constant 0 : i32
    %c0_i32_1 = arith.constant 0 : i32
    return %arg0, %c0_i32, %c0_i32_0 : i32, i32, i32
  }
  func.func @transform_2(%arg0: i32, %arg1: i32) -> (i32, i32) {
    %c0_i32 = arith.constant 0 : i32
    %c0_i32_0 = arith.constant 0 : i32
    %c0_i32_1 = arith.constant 0 : i32
    return %c0_i32, %c0_i32_0 : i32, i32
  }
  func.func @transform_3(%arg0: i32, %arg1: i32) -> (i32, i32) {
    %c0_i32 = arith.constant 0 : i32
    %c0_i32_0 = arith.constant 0 : i32
    %c0_i32_1 = arith.constant 0 : i32
    return %c0_i32, %c0_i32_0 : i32, i32
  }
  func.func @transform_4(%arg0: i32, %arg1: i32) -> (i32, i32) {
    %c0_i32 = arith.constant 0 : i32
    %c0_i32_0 = arith.constant 0 : i32
    %c0_i32_1 = arith.constant 0 : i32
    return %c0_i32, %c0_i32_0 : i32, i32
  }
  func.func @transform_5(%arg0: i32, %arg1: i32) -> (i32, i32) {
    %c0_i32 = arith.constant 0 : i32
    %c0_i32_0 = arith.constant 0 : i32
    %c0_i32_1 = arith.constant 0 : i32
    return %c0_i32, %c0_i32_0 : i32, i32
  }
  func.func @transform_6(%arg0: i32, %arg1: i32) -> (i32, i32) {
    %c0_i32 = arith.constant 0 : i32
    %c0_i32_0 = arith.constant 0 : i32
    %c0_i32_1 = arith.constant 0 : i32
    return %c0_i32, %c0_i32_0 : i32, i32
  }
  func.func @transform_7(%arg0: i32, %arg1: i32) -> (i32, i32) {
    %c0_i32 = arith.constant 0 : i32
    %c0_i32_0 = arith.constant 0 : i32
    %c0_i32_1 = arith.constant 0 : i32
    return %c0_i32, %c0_i32_0 : i32, i32
  }
  func.func @transform_8(%arg0: i32, %arg1: i32) -> (i32, i32, i32) {
    %c0_i32 = arith.constant 0 : i32
    %c0_i32_0 = arith.constant 0 : i32
    return %arg0, %arg1, %c0_i32 : i32, i32, i32
  }
}

</mosaic_0001>

<bundles_post_ra>
// kernel: tpu_custom_call.1
= control target key start
LH: loop header
LB: loop body
LE: loop exit
PB: predicated region body
PF: predicated region fallthrough
CT: control target
= control target key end

     0   :  { %s2700_s0 = inlined_call_operand.hbm [shape: bf16[2,8,32], index: 0, kind: input, shape index: {}]   ;;  %s2701_s1 = inlined_call_operand.hbm [shape: bf16[2,8,32], index: 1, kind: input, shape index: {}]   ;;  %s2702_s2 = inlined_call_operand.hbm [shape: bf16[32,32], index: 2, kind: input, shape index: {}]   ;;  %s2703_s3 = inlined_call_operand.hbm [shape: f32[1,32], index: 3, kind: input, shape index: {}]   ;;  %s2704_s4 = inlined_call_operand.hbm [shape: bf16[32,64], index: 4, kind: input, shape index: {}]   ;;  %s2705_s5 = inlined_call_operand.hbm [shape: f32[1,64], index: 5, kind: input, shape index: {}]   ;;  %s2706_s6 = inlined_call_operand.hbm [shape: bf16[32,32], index: 6, kind: input, shape index: {}]   ;;  %s2707_s7 = inlined_call_operand.hbm [shape: f32[1,32], index: 7, kind: input, shape index: {}]   ;;  %s2708_s8 = inlined_call_operand.hbm [shape: f32[2,8,32], index: 8, kind: output, shape index: {}]  }
   0x1   :  { %2716 = sst [smem:[#allocation28_spill]] %s2702_s2 }
   0x2   :  { %2717 = sst [smem:[#allocation29_spill]] %s2703_s3 }
   0x3   :  { %2718 = sst [smem:[#allocation30_spill]] %s2704_s4 }
   0x4   :  { %2719 = sst [smem:[#allocation31_spill]] %s2705_s5 }
   0x5   :  { %2720 = sst [smem:[#allocation32_spill]] %s2706_s6 }
   0x6   :  { %2721 = sst [smem:[#allocation33_spill]] %s2708_s8 }
   0x7   :  { %13 = vsyncpa [#allocation6], 0 }
   0x8   :  { %15 = vsyncpa [#allocation6 + $0x1], 0 }
   0x9   :  { %16 = vsyncpa [#allocation9], 0 }
   0xa   :  { %18 = vsyncpa [#allocation9 + $0x1], 0 }
   0xb   :  { %19 = vsyncpa [#allocation12], 0 }
   0xc   :  { %20 = vsyncpa [#allocation15], 0 }
   0xd   :  { %21 = vsyncpa [#allocation18], 0 }
   0xe   :  { %22 = vsyncpa [#allocation7], 0 }
   0xf   :  { %24 = vsyncpa [#allocation7 + $0x1], 0  ;;  %s2151_s27 = smov 0   ;;  %s2153_s28 = smov 0  }
  0x10   :  { %s2155_s29 = smov 0   ;;  %s2157_s30 = smov 0  }
  0x11   :  { %s2159_s9 = smov 0   ;;  %s2161_s10 = smov 0  }
  0x12 LB: > { %2722 = sst [smem:[#allocation27_spill]] %s2068_s30  ;;  %s2182_s11 = sadd.s32 4294967295, %s2076_s10   ;;  %s2076_s10 = sphi %s2161_s10, %s30_s10   ;;  %s2072_s9 = sphi %s2159_s9, %s2757_s9   ;;  %s2068_s30 = sphi %s2157_s30, %s2756_s30   ;;  %s2064_s29 = sphi %s2155_s29, %s2755_s29   ;;  %s2060_s28 = sphi %s2153_s28, %s2754_s28   ;;  %s2056_s27 = sphi %s2151_s27, %s2753_s27  }
  0x13   : > { %p1422_p0 = scmp.ge.s32.totalorder %s2076_s10, 1  ;;  %p2710_p1 = scmp.eq.s32.totalorder %s2182_s11, 0 }
  0x14   : > { %p255_p2 = scmp.lt.s32.totalorder %s2076_s10, 3  ;;  %s2078_s13 = smov [#allocation10]  }
  0x15   : > { %s267_s14 = sshll.u32 %s2078_s13, 4  ;;  %s2079_s16 = smov [#allocation11]   ;;  %s2191_s14 = int_to_ptr.vmem [resolvable:$true] %s267_s14 }
  0x16   : > { %p2187_p3 = pnand %p1422_p0, %p255_p2  ;;  %s281_s17 = sshll.u32 %s2079_s16, 4  ;;  %s2202_s17 = int_to_ptr.vmem [resolvable:$true] %s281_s17 }
  0x17   : > { %s2080_s18 = smov [#allocation14]   ;;  %s2725_s2 = sld [smem:[#allocation28_spill]] }
  0x18   : > { %s2723_s12 = scalar_select %p2187_p3, 1, 0 }
  0x19   : > { %p1595_p4 = pneg %p2187_p3  ;;  %s2204_s19 = sshll.u32 %s2080_s18, 4  ;;  %s306_s19 = int_to_ptr.vmem [resolvable:$true] %s2204_s19 }
  0x1b   : > { %p2198_p6 = pnand %p1595_p4, %p2710_p1 }
  0x1d   : > { %s1746_s22 = scalar_lea.hbm %s2725_s2, 256  ;;  %p2214_p8 = pneg %p2198_p6 }
  0x1e   : > { %p1747_p7 = scmp.ne.s32.totalorder %s2725_s2, %s1746_s22  ;;  %p1753_p11 = scmp.lt.u32.totalorder %s1746_s22, %s2725_s2 }
  0x20   : > { %p1749_p9 = pnand %p2214_p8, %p1747_p7 }
  0x22   : > { %p1750_p10 = pneg %p1749_p9 }
  0x24   : > { %p1755_p12 = pnand %p1753_p11, %p1750_p10 }
  0x26   : > { %1758 = shalt.err (!%p1755_p12)
}
  0x27   : > { %s1759_s16 = scalar_lea.vmem %s2191_s14, 256  ;;  %p1767_p4 = scmp.lt.s32.totalorder %s2191_s14, %s2191_s14 }
  0x28   : > { %p1760_p13 = scmp.ne.s32.totalorder %s2191_s14, %s1759_s16  ;;  %p1768_p5 = scmp.lt.s32.totalorder %s1759_s16, %s1759_s16 }
  0x2a   : > { %p1762_p0 = pnand %p1760_p13, %p2214_p8  ;;  %p1769_p7 = por %p1768_p5, %p1767_p4 }
  0x2c   : > { %p1763_p2 = pneg %p1762_p0 }
  0x2e   : > { %p1770_p9 = pnand %p1769_p7, %p1763_p2 }
  0x30   : > { %1773 = shalt.err (!%p1770_p9)
}
  0x31   : > { %s2712_s18 = smov 64   ;;  %s2082_s20 = smov 4  }
  0x32   : > { %1598 = dma.hbm_to_vmem [thread:$0]  (!%p2198_p6), %s2725_s2, 256, %s2191_s14, [#allocation9], %s2712_s18, %s2712_s18, %s2082_s20  }
  0x33   : > { %s2727_s3 = sld [smem:[#allocation29_spill]] }
  0x39   : > { %s1774_s26 = scalar_lea.hbm %s2727_s3, 16 }
  0x3a   : > { %p1775_p5 = scmp.ne.s32.totalorder %s2727_s3, %s1774_s26  ;;  %p1781_p12 = scmp.lt.u32.totalorder %s1774_s26, %s2727_s3 }
  0x3c   : > { %p1777_p10 = pnand %p1775_p5, %p2214_p8 }
  0x3e   : > { %p1778_p11 = pneg %p1777_p10 }
  0x40   : > { %p1783_p13 = pnand %p1781_p12, %p1778_p11 }
  0x42   : > { %1786 = shalt.err (!%p1783_p13)
}
  0x43   : > { %s1787_s14 = scalar_lea.vmem %s2202_s17, 16  ;;  %s1794_s21 = scalar_lea.vmem %s2202_s17, 32 }
  0x44   : > { %p1788_p0 = scmp.ne.s32.totalorder %s2202_s17, %s1787_s14  ;;  %p1795_p7 = scmp.lt.s32.totalorder %s2202_s17, %s2202_s17 }
  0x45   : > { %p1796_p9 = scmp.lt.s32.totalorder %s1794_s21, %s1787_s14 }
  0x46   : > { %p1790_p2 = pnand %p1788_p0, %p2214_p8 }
  0x47   : > { %p1797_p5 = por %p1796_p9, %p1795_p7 }
  0x48   : > { %p1791_p4 = pneg %p1790_p2 }
  0x4a   : > { %p1798_p10 = pnand %p1797_p5, %p1791_p4 }
  0x4c   : > { %1801 = shalt.err (!%p1798_p10)
}
  0x4d   : > { %1601 = dma.hbm_to_vmem [thread:$0]  (!%p2198_p6), %s2727_s3, 16, %s2202_s17, [#allocation12]  }
  0x4e   : > { %s2728_s5 = sld [smem:[#allocation31_spill]] }
  0x54   : > { %s1802_s24 = scalar_lea.hbm %s2728_s5, 16 }
  0x55   : > { %p1803_p11 = scmp.ne.s32.totalorder %s2728_s5, %s1802_s24  ;;  %p1809_p0 = scmp.lt.u32.totalorder %s1802_s24, %s2728_s5 }
  0x57   : > { %p1805_p12 = pnand %p1803_p11, %p2214_p8 }
  0x59   : > { %p1806_p13 = pneg %p1805_p12 }
  0x5b   : > { %p1811_p2 = pnand %p1809_p0, %p1806_p13 }
  0x5d   : > { %1814 = shalt.err (!%p1811_p2)
}
  0x5e   : > { %s1815_s21 = scalar_lea.vmem %s306_s19, 16  ;;  %s1822_s17 = scalar_lea.vmem %s306_s19, 32 }
  0x5f   : > { %p1816_p4 = scmp.ne.s32.totalorder %s306_s19, %s1815_s21  ;;  %p1823_p5 = scmp.lt.s32.totalorder %s306_s19, %s306_s19 }
  0x60   : > { %p1824_p10 = scmp.lt.s32.totalorder %s1822_s17, %s1815_s21 }
  0x61   : > { %p1818_p7 = pnand %p1816_p4, %p2214_p8 }
  0x62   : > { %p1825_p1 = por %p1824_p10, %p1823_p5 }
  0x63   : > { %p1819_p9 = pneg %p1818_p7 }
  0x65   : > { %p1826_p3 = pnand %p1825_p1, %p1819_p9 }
  0x67   : > { %1829 = shalt.err (!%p1826_p3)
}
  0x68   : > { %1607 = dma.hbm_to_vmem [thread:$0]  (!%p2198_p6), %s2728_s5, 16, %s306_s19, [#allocation15]  }
  0x69   : > { %s2083_s22 = smov [#allocation13]   ;;  %s2084_s24 = smov [#allocation16]  }
  0x6a   : > { %s291_s23 = sshll.u32 %s2083_s22, 4  ;;  %s315_s26 = sshll.u32 %s2084_s24, 4  ;;  %s292_s23 = int_to_ptr.vmem [resolvable:$true] %s291_s23  ;;  %s316_s26 = int_to_ptr.vmem [resolvable:$true] %s315_s26 }
  0x6b   : > { %s2729_s4 = sld [smem:[#allocation30_spill]] }
  0x71   : > { %s1830_s14 = scalar_lea.hbm %s2729_s4, 256 }
  0x72   : > { %p1831_p1 = scmp.ne.s32.totalorder %s2729_s4, %s1830_s14  ;;  %p1837_p12 = scmp.lt.u32.totalorder %s1830_s14, %s2729_s4 }
  0x74   : > { %p1833_p3 = pnand %p1831_p1, %p2214_p8 }
  0x76   : > { %p1834_p11 = pneg %p1833_p3 }
  0x78   : > { %p1839_p13 = pnand %p1837_p12, %p1834_p11 }
  0x7a   : > { %1842 = shalt.err (!%p1839_p13)
}
  0x7b   : > { %s1843_s19 = scalar_lea.vmem %s292_s23, 256  ;;  %p1851_p7 = scmp.lt.s32.totalorder %s292_s23, %s292_s23 }
  0x7c   : > { %p1844_p0 = scmp.ne.s32.totalorder %s292_s23, %s1843_s19  ;;  %p1852_p9 = scmp.lt.s32.totalorder %s1843_s19, %s1843_s19 }
  0x7e   : > { %p1846_p2 = pnand %p1844_p0, %p2214_p8  ;;  %p1853_p5 = por %p1852_p9, %p1851_p7 }
  0x80   : > { %p1847_p4 = pneg %p1846_p2 }
  0x82   : > { %p1854_p10 = pnand %p1853_p5, %p1847_p4 }
  0x84   : > { %1857 = shalt.err (!%p1854_p10)
}
  0x85   : > { %s2730_s30 = smov 64   ;;  %s2731_s6 = sld [smem:[#allocation32_spill]] }
  0x86   : > { %1604 = dma.hbm_to_vmem [thread:$0]  (!%p2198_p6), %s2729_s4, 256, %s292_s23, [#allocation12], %s2730_s30, %s2730_s30, %s2082_s20  }
  0x8b   : > { %s1858_s16 = scalar_lea.hbm %s2731_s6, 256 }
  0x8c   : > { %p1859_p1 = scmp.ne.s32.totalorder %s2731_s6, %s1858_s16  ;;  %p1865_p12 = scmp.lt.u32.totalorder %s1858_s16, %s2731_s6 }
  0x8e   : > { %p1861_p3 = pnand %p1859_p1, %p2214_p8 }
  0x90   : > { %p1862_p11 = pneg %p1861_p3 }
  0x92   : > { %p1867_p13 = pnand %p1865_p12, %p1862_p11 }
  0x94   : > { %1870 = shalt.err (!%p1867_p13)
}
  0x95   : > { %s1871_s19 = scalar_lea.vmem %s316_s26, 256  ;;  %p1879_p7 = scmp.lt.s32.totalorder %s316_s26, %s316_s26 }
  0x96   : > { %p1872_p0 = scmp.ne.s32.totalorder %s316_s26, %s1871_s19  ;;  %p1880_p9 = scmp.lt.s32.totalorder %s1871_s19, %s1871_s19 }
  0x98   : > { %p1874_p2 = pnand %p1872_p0, %p2214_p8  ;;  %p1881_p5 = por %p1880_p9, %p1879_p7 }
  0x9a   : > { %p1875_p4 = pneg %p1874_p2 }
  0x9c   : > { %p1882_p10 = pnand %p1881_p5, %p1875_p4 }
  0x9e   : > { %1885 = shalt.err (!%p1882_p10)
}
  0x9f   : > { %1610 = dma.hbm_to_vmem [thread:$0]  (!%p2198_p6), %s2731_s6, 256, %s316_s26, [#allocation15], %s2730_s30, %s2730_s30, %s2082_s20  }
  0xa0   : > { %s2085_s22 = smov [#allocation17]   ;;  %s1886_s14 = scalar_lea.hbm %s2707_s7, 16 }
  0xa1   : > { %s329_s24 = sshll.u32 %s2085_s22, 4  ;;  %p1887_p1 = scmp.ne.s32.totalorder %s2707_s7, %s1886_s14  ;;  %s330_s24 = int_to_ptr.vmem [resolvable:$true] %s329_s24 }
  0xa2   : > { %p1893_p12 = scmp.lt.u32.totalorder %s1886_s14, %s2707_s7 }
  0xa3   : > { %p1889_p3 = pnand %p1887_p1, %p2214_p8 }
  0xa5   : > { %p1890_p11 = pneg %p1889_p3 }
  0xa7   : > { %p1895_p13 = pnand %p1893_p12, %p1890_p11 }
  0xa9   : > { %1898 = shalt.err (!%p1895_p13)
}
  0xaa   : > { %s1899_s20 = scalar_lea.vmem %s330_s24, 16  ;;  %s1906_s26 = scalar_lea.vmem %s330_s24, 32 }
  0xab   : > { %p1900_p0 = scmp.ne.s32.totalorder %s330_s24, %s1899_s20  ;;  %p1907_p7 = scmp.lt.s32.totalorder %s330_s24, %s330_s24 }
  0xac   : > { %p1908_p9 = scmp.lt.s32.totalorder %s1906_s26, %s1899_s20 }
  0xad   : > { %p1902_p2 = pnand %p1900_p0, %p2214_p8 }
  0xae   : > { %p1909_p5 = por %p1908_p9, %p1907_p7 }
  0xaf   : > { %p1903_p4 = pneg %p1902_p2 }
  0xb1   : > { %p1910_p10 = pnand %p1909_p5, %p1903_p4 }
  0xb3   : > { %1913 = shalt.err (!%p1910_p10)
}
  0xb4   : > { %1613 = dma.hbm_to_vmem [thread:$0]  (!%p2198_p6), %s2707_s7, 16, %s330_s24, [#allocation18]  }
  0xb5   : > { %s1421_s25 = sadd.s32 4294967294, %s2076_s10   ;;  %s42_s18 = sadd.s32 1, %s2072_s9 }
  0xb6   : > { %p44_p8 = scmp.ge.s32.totalorder %s42_s18, 2  ;;  %s51_s15 = sadd.s32 1, %s2064_s29 }
  0xb7   : > { %p58_p1 = scmp.ne.s32.totalorder %s2064_s29, %s2060_s28  ;;  %p59_p3 = scmp.eq.s32.totalorder %s2076_s10, 0 }
  0xb8   : > { %s2759_s18 = smov (%p44_p8, %s42_s18), 0  ;;  %p64_p12 = scmp.ne.s32.totalorder %s2060_s28, %s2056_s27 }
  0xb9   : > { %p2349_p11 = por %p59_p3, %p58_p1  ;;  %s46_s24 = ssub.s32 %s2072_s9, %s2759_s18 }
  0xba   : > { %p242_p6 = scmp.eq.s32.totalorder %s2182_s11, 1  ;;  %p49_p13 = scmp.eq.s32.totalorder %s46_s24, 0 }
  0xbb   : > { %p2733_p0 = scmp.eq.s32.totalorder %s2182_s11, 0  ;;  %p248_p7 = scmp.eq.s32.totalorder %s1421_s25, 1 }
  0xbc   : > { %p2364_p4 = por %p242_p6, %p58_p1  ;;  %p1631_p5 = scmp.lt.s32.totalorder %s2076_s10, 2 }
  0xbd   : > { %p2360_p2 = por %p2733_p0, %p64_p12  ;;  %p2371_p9 = por %p248_p7, %p64_p12 }
  0xbe   : > { %s2735_s16 = scalar_select %p2364_p4, 1, 0 }
  0xbf   : > { %s2734_s13 = scalar_select %p2360_p2, 1, 0 }
  0xc0   : > { %s2369_s14 = scalar_select %p49_p13, %s2064_s29, %s51_s15  }
  0xc1   : > { %s2736_s21 = scalar_select %p2371_p9, 1, 0 }
  0xc2   : > { %s340_s17 = sand.u32 1, %s2064_s29   ;;  %s1431_s8 = sshll.u32 %s2072_s9, 6 }
  0xc3   : > { %s2378_s19 = sshll.u32 %s340_s17, 2  ;;  %s2383_s30 = scalar_lea.hbm %s2700_s0, %s1431_s8 }
  0xc4   : > { %s344_s23 = scalar_lea.vmem [#allocation5], %s2378_s19  ;;  %p2388_p10 = pnand %p1631_p5, %p2349_p11 }
  0xc5   : > { %s352_s25 = sshll.u32 %s344_s23, 4  ;;  %s2397_s26 = scalar_lea.hbm %s2701_s1, %s1431_s8  ;;  %s2392_s25 = int_to_ptr.vmem [resolvable:$true] %s352_s25 }
  0xc6   : > { %s341_s2 = scalar_lea.sflag [#allocation6], %s340_s17  ;;  %s1914_s3 = scalar_lea.hbm %s2383_s30, 64 }
  0xc7   : > { %p1915_p8 = scmp.ne.s32.totalorder %s2383_s30, %s1914_s3  ;;  %p1916_p1 = pneg %p2388_p10 }
  0xc8   : > { %s1919_s4 = scalar_lea.hbm %s2700_s0, 128  ;;  %p1920_p12 = scmp.lt.u32.totalorder %s2383_s30, %s2700_s0 }
  0xc9   : > { %p1917_p3 = pnand %p1916_p1, %p1915_p8  ;;  %p1921_p6 = scmp.lt.u32.totalorder %s1919_s4, %s1914_s3 }
  0xca   : > { %p1923_p0 = scmp.lt.u32.totalorder %s1914_s3, %s2383_s30 }
  0xcb   : > { %p1918_p11 = pneg %p1917_p3  ;;  %p1922_p13 = por %p1921_p6, %p1920_p12 }
  0xcd   : > { %p1924_p7 = por %p1923_p0, %p1922_p13 }
  0xcf   : > { %p1925_p5 = pnand %p1924_p7, %p1918_p11 }
  0xd1   : > { %1928 = shalt.err (!%p1925_p5)
}
  0xd2   : > { %s1929_s17 = scalar_lea.vmem %s2392_s25, 64  ;;  %s2086_s8 = smov [#allocation5]  }
  0xd3   : > { %p1930_p8 = scmp.ne.s32.totalorder %s2392_s25, %s1929_s17  ;;  %s1934_s24 = sshll.u32 %s2086_s8, 4  ;;  %s1935_s24 = int_to_ptr.vmem [resolvable:$false] %s1934_s24 }
  0xd4   : > { %s1936_s5 = scalar_lea.vmem %s1935_s24, 128  ;;  %p1937_p4 = scmp.lt.s32.totalorder %s2392_s25, %s1935_s24 }
  0xd5   : > { %p1932_p3 = pnand %p1930_p8, %p1916_p1  ;;  %p1938_p12 = scmp.lt.s32.totalorder %s1936_s5, %s1929_s17 }
  0xd7   : > { %p1933_p9 = pneg %p1932_p3  ;;  %p1939_p6 = por %p1938_p12, %p1937_p4 }
  0xd9   : > { %p1940_p13 = pnand %p1939_p6, %p1933_p9 }
  0xdb   : > { %1943 = shalt.err (!%p1940_p13)
}
  0xdc   : > { %1617 = dma.hbm_to_vmem [thread:$0]  (!%p2388_p10), %s2383_s30, 64, %s2392_s25, %s341_s2  }
  0xdd   : > { %s359_s3 = sand.u32 1, %s2076_s10   ;;  %s363_s4 = scalar_lea.vmem [#allocation8], %s2378_s19 }
  0xde   : > { %s370_s6 = sshll.u32 %s363_s4, 4  ;;  %s360_s20 = scalar_lea.sflag [#allocation9], %s359_s3  ;;  %s371_s6 = int_to_ptr.vmem [resolvable:$true] %s370_s6 }
  0xdf   : > { %s1944_s22 = scalar_lea.hbm %s2397_s26, 64  ;;  %s1949_s8 = scalar_lea.hbm %s2701_s1, 128 }
  0xe0   : > { %p1945_p4 = scmp.ne.s32.totalorder %s2397_s26, %s1944_s22  ;;  %p1950_p0 = scmp.lt.u32.totalorder %s2397_s26, %s2701_s1 }
  0xe1   : > { %p1951_p7 = scmp.lt.u32.totalorder %s1949_s8, %s1944_s22  ;;  %p1953_p8 = scmp.lt.u32.totalorder %s1944_s22, %s2397_s26 }
  0xe2   : > { %p1947_p9 = pnand %p1945_p4, %p1916_p1 }
  0xe3   : > { %p1952_p5 = por %p1951_p7, %p1950_p0 }
  0xe4   : > { %p1948_p11 = pneg %p1947_p9 }
  0xe5   : > { %p1954_p3 = por %p1953_p8, %p1952_p5 }
  0xe7   : > { %p1955_p12 = pnand %p1954_p3, %p1948_p11 }
  0xe9   : > { %1958 = shalt.err (!%p1955_p12)
}
  0xea   : > { %s1959_s2 = scalar_lea.vmem %s371_s6, 64  ;;  %s2087_s19 = smov [#allocation8]  }
  0xeb   : > { %p1960_p6 = scmp.ne.s32.totalorder %s371_s6, %s1959_s2  ;;  %s1964_s30 = sshll.u32 %s2087_s19, 4  ;;  %s1965_s30 = int_to_ptr.vmem [resolvable:$false] %s1964_s30 }
  0xec   : > { %s1966_s25 = scalar_lea.vmem %s1965_s30, 128  ;;  %p1967_p9 = scmp.lt.s32.totalorder %s371_s6, %s1965_s30 }
  0xed   : > { %p1962_p13 = pnand %p1960_p6, %p1916_p1  ;;  %p1968_p2 = scmp.lt.s32.totalorder %s1966_s25, %s1959_s2 }
  0xef   : > { %p1963_p4 = pneg %p1962_p13  ;;  %p1969_p0 = por %p1968_p2, %p1967_p9 }
  0xf1   : > { %p1970_p7 = pnand %p1969_p0, %p1963_p4 }
  0xf3   : > { %1973 = shalt.err (!%p1970_p7)
}
  0xf4   : > { %1620 = dma.hbm_to_vmem [thread:$0]  (!%p2388_p10), %s2397_s26, 64, %s371_s6, %s360_s20  }
  0xf5   : > { %p2738_p11 = scmp.ne.s32.totalorder %s2723_s12, 0 }
  0xf6   : > { %s2448_s3 = sand.u32 (!%p2738_p11), 1, %s2060_s28   ;;  %p2739_p2 = scmp.ne.s32.totalorder (!%p2738_p11), %s2734_s13, 0 }
  0xf7   : > { %379 = sbr.rel (%p2738_p11) target bundleno = 1761 (0x6e1), region = 52  ;;  %s1435_s4 = sshll.u32 (!%p2738_p11), %s2448_s3, 2 }
  0xf8   : > { %s382_s22 = scalar_lea.sflag (!%p2738_p11), [#allocation6], %s2448_s3  ;;  %s2452_s23 = scalar_lea.vmem (!%p2738_p11), [#allocation5], %s1435_s4 }
  0xfe   : > { %2027 = dma.done.wait (%p2739_p2), %s382_s22, 64  }
  0xff   : > { %2029 = vsyncadd (%p2739_p2), %s382_s22, 4294967232  ;;  %s390_s15 = sand.u32 1, %s2182_s11   ;;  %s394_s26 = scalar_lea.vmem [#allocation8], %s1435_s4 }
 0x100   : > { %s391_s12 = scalar_lea.sflag [#allocation9], %s390_s15 }
 0x101   : > { %2031 = dma.done.wait (%p2739_p2), %s391_s12, 64  }
 0x102   : > { %2033 = vsyncadd (%p2739_p2), %s391_s12, 4294967232  ;;  %p2740_p10 = scmp.eq.s32.totalorder %s2182_s11, 0 }
 0x104   : > { %2035 = dma.done.wait (%p2740_p10), [#allocation9], 256   ;;  %p2741_p1 = pmov %p2740_p10 }
 0x106   : > { %2037 = vsyncadd (%p2741_p1), [#allocation9], 4294967040  ;;  %p2742_p5 = pmov %p2741_p1 }
 0x107   : > { %p2743_p8 = pmov %p2741_p1 }
 0x108   : > { %2039 = dma.done.wait (%p2742_p5), [#allocation12], 272  }
 0x109   : > { %2041 = vsyncadd (%p2743_p8), [#allocation12], 4294967024  ;;  %p2744_p3 = pmov %p2741_p1 }
 0x10a   : > { %p2745_p12 = pmov %p2741_p1 }
 0x10b   : > { %2043 = dma.done.wait (%p2744_p3), [#allocation15], 272  }
 0x10c   : > { %2045 = vsyncadd (%p2745_p12), [#allocation15], 4294967024  ;;  %p2746_p6 = pmov %p2741_p1 }
 0x10d   : > { %p2747_p13 = pmov %p2741_p1 }
 0x10e   : > { %2047 = dma.done.wait (%p2746_p6), [#allocation18], 16  }
 0x10f   : > { %2049 = vsyncadd (%p2747_p13), [#allocation18], 4294967280  ;;  %vm481_vm0 = vcmask 261120   ;;  %v2088_v0 = vmov 0.0   ;;  %vm2089_vm1 = vmmov 0   ;;  %v1722_v1 = vld [vmem:[#allocation13] sm:$0xff]  }
 0x110   : > { %1501 = vmatprep.subr.bf16.mxu1 %v2088_v0  ;;  %1493 = vmatprep.subr.bf16.mxu0 %v2088_v0  ;;  %529 = vst.msk [vmem:[#allocation4] sm:$0xff] %vm481_vm0, %v2088_v0  ;;  %v1723_v2 = vld [vmem:[#allocation10] sm:$0xff]   ;;  %v1725_v4 = vld [vmem:[#allocation10 + $0x8] sm:$0xff]   ;;  %v530_v5 = vld [vmem:[%s394_s26] sm:$0xf]  ;;  %vm598_vm2 = vcmask 64512  }
 0x111   : > { %1505 = vmatprep.mubr.msk.bf16.mxu1 %vm2089_vm1, %v2088_v0  ;;  %1497 = vmatprep.mubr.msk.bf16.mxu0 %vm2089_vm1, %v2088_v0  ;;  %v1724_v3 = vld [vmem:[#allocation13 + $0x8] sm:$0xff]   ;;  %v457_v6 = vld [vmem:[%s2452_s23] sm:$0xf]  ;;  %v1448_v7 = vld [vmem:[#allocation14] ss:$0 sm:$0xff]  ;;  %s2090_s11 = smov 112  }
 0x112   : > { %1502 = vmatpush3.bf16.msra.mxu1 %v1722_v1  ;;  %1494 = vmatpush3.bf16.msra.mxu0 %v1723_v2  ;;  %v1444_v8 = vld [vmem:[#allocation11] ss:$0 sm:$0xff]  ;;  %s2091_s13 = smov 120   ;;  %s2092_s6 = smov 104   ;;  %vm526_vm3 = vcmask 31744   ;;  %v2093_v36 = vmov -inf  }
 0x113   : > { %1503 = vmatprep.subr.bf16.mxu1 %v2088_v0  ;;  %1495 = vmatprep.subr.bf16.mxu0 %v2088_v0  ;;  %527 = vst.msk [vmem:[#allocation2] sm:$0xff] %vm526_vm3, %v2093_v36  ;;  %528 = vst.msk [vmem:[#allocation3] sm:$0xff] %vm526_vm3, %v2088_v0  ;;  %v2094_v37 = vmov 0   ;;  %v2095_v53 = vmov 1   ;;  %vm667_vm4 = vcmask 7168   ;;  %s2096_s20 = smov 96  }
 0x114   : > { %1712 = vset.pattern.permute.xlu1 %v2094_v37  ;;  %1713 = vset.pattern.permute.xlu0 %v2095_v53  ;;  %v2097_v58 = vmov 2   ;;  %vm803_vm5 = vcmask 15368   ;;  %vm941_vm6 = vcmask 23568   ;;  %s2098_s17 = smov 88   ;;  %vm683_vm7 = vcmask 1043456   ;;  %s2100_s8 = smov 80  }
 0x115   : > { %vm1079_vm8 = vcmask 31768   ;;  %s2101_s24 = smov 72   ;;  %s2102_s5 = smov 8   ;;  %vm866_vm9 = vcmask 130112   ;;  %vm1004_vm10 = vcmask 195712   ;;  %vm1142_vm11 = vcmask 261312  }
 0x116   : > { %1504 = vmatpush3.bf16.msra.mxu1 %v1724_v3  ;;  %1496 = vmatpush3.bf16.msra.mxu0 %v1725_v4  ;;  %s2103_s2 = smov 16   ;;  %s2104_s19 = smov 24  }
 0x117   : > { %1515 = vmatprep.subr.bf16.mxu1 %v2088_v0  ;;  %1509 = vmatprep.subr.bf16.mxu0 %v2088_v0  ;;  %s2748_s30 = sld [smem:[#allocation27_spill]]  ;;  %s1443_s25 = sshll.u32 %s2448_s3, 3 }
 0x118   : > { %s455_s22 = scalar_lea.vmem [#allocation19], %s1443_s25  ;;  %s2749_s26 = sld [smem:[#allocation33_spill]] }
 0x119   : > { %1506 = vmatmul.mubr.msk.bf16.vlgmr.msra.gmra.mrb[0].mxu1 %vm481_vm0, %v530_v5  ;;  %1498 = vmatmul.mubr.msk.bf16.vlgmr.msra.gmra.mrb[0].mxu0 %vm481_vm0, %v457_v6  ;;  %v2099_v6 = vmov 3   ;;  %s1260_s23 = sshll.u32 %s455_s22, 4  ;;  %p2750_p9 = scmp.ne.s32.totalorder %s2735_s16, 0  ;;  %s2652_s23 = int_to_ptr.vmem [resolvable:$true] %s1260_s23 }
 0x11a   : > { %1517 = vmatprep.mubr.msk.bf16.mxu1 %vm2089_vm1, %v2088_v0  ;;  %1511 = vmatprep.mubr.msk.bf16.mxu0 %vm2089_vm1, %v2088_v0  ;;  %v2542_v54 = vld [vmem:[#allocation2] sm:$0xff] }
 0x11d   : > { %s1465_s4 = sshll.u32 %s2748_s30, 7 }
 0x1ec   : > { %v591_v9 = vpop.f32.mrb[0].mxu1  ;;  %v519_v12 = vpop.f32.mrb[0].mxu0 }
 0x1ed   : > { %v592_v10 = vadd.f32 %v1448_v7, %v591_v9  ;;  %v1507_v11 = vpop.f32.mrb[1].mxu1  ;;  %v520_v14 = vadd.f32 %v1444_v8, %v519_v12  ;;  %v1499_v15 = vpop.f32.mrb[1].mxu0 }
 0x1ee   : > { %v594_v13 = vpop.f32.mrb[2].mxu1  ;;  %v522_v18 = vpop.f32.mrb[2].mxu0 }
 0x1ef   : > { %v2498_v16 = vpack.c.bf16 %v592_v10, %v592_v10  ;;  %v1508_v17 = vpop.f32.mrb[3].mxu1  ;;  %v1500_v19 = vpop.f32.mrb[3].mxu0  ;;  %v525_v20 = vpack.c.bf16 %v520_v14, %v520_v14 }
 0x1f1   : > { %871 = vrot.lane.b32.xlu1 %v2498_v16, %s2090_s11  ;;  %733 = vrot.lane.b32.xlu0 %v2498_v16, %s2091_s13  ;;  %v603_v21 = vsel %vm598_vm2, %v2498_v16, 0 }
 0x1f2   : > { %1510 = vmatpush3.bf16.xpose.msra.mxu0 %v603_v21 }
 0x1f3   : > { %1521 = vmatprep.subr.bf16.mxu0 %v2088_v0 }
 0x1f5   : > { %869 = vrot.lane.b32.xlu1 %v525_v20, %s2090_s11  ;;  %731 = vrot.lane.b32.xlu0 %v525_v20, %s2091_s13  ;;  %s2650_s11 = scalar_lea.hbm %s2749_s26, %s1465_s4  ;;  %s1246_s13 = scalar_lea.sflag [#allocation7], %s2448_s3 }
 0x1f9   : > { %1007 = vrot.lane.b32.xlu1 %v525_v20, %s2092_s6  ;;  %1009 = vrot.lane.b32.xlu0 %v2498_v16, %s2092_s6  ;;  %s1974_s6 = scalar_lea.vmem %s2652_s23, 128 }
 0x1fa   : > { %1512 = vmatmul.mubr.msk.bf16.vlgmr.msra.gmra.mrb[4].mxu0 %vm598_vm2, %v525_v20  ;;  %p1975_p4 = scmp.ne.s32.totalorder %s2652_s23, %s1974_s6 }
 0x1fb   : > { %1523 = vmatprep.mubr.msk.bf16.mxu0 %vm2089_vm1, %v2088_v0 }
 0x1fc   : > { %p1976_p0 = pnand %p1975_p4, %p2750_p9 }
 0x1fe   : > { %p1977_p7 = pneg %p1976_p0 }
 0x263   : > { %v734_v22 = vpop.permute.xlu0 %733  ;;  %v872_v24 = vpop.permute.xlu1 %871 }
 0x264   : > { %v739_v23 = vsel %vm598_vm2, %v734_v22, 0  ;;  %v877_v26 = vsel %vm598_vm2, %v872_v24, 0 }
 0x265   : > { %1522 = vmatpush3.bf16.xpose.msra.mxu0 %v739_v23 }
 0x266   : > { %1533 = vmatprep.subr.bf16.mxu0 %v2088_v0 }
 0x267   : > { %v732_v25 = vpop.permute.xlu0 %731  ;;  %v870_v28 = vpop.permute.xlu1 %869 }
 0x26b   : > { %v1010_v27 = vpop.permute.xlu0 %1009  ;;  %v1008_v30 = vpop.permute.xlu1 %1007 }
 0x26c   : > { %1524 = vmatmul.mubr.msk.bf16.vlgmr.msra.gmra.mrb[8].mxu0 %vm598_vm2, %v732_v25  ;;  %v1015_v29 = vsel %vm598_vm2, %v1010_v27, 0 }
 0x26d   : > { %1534 = vmatpush3.bf16.xpose.msra.mxu0 %v877_v26  ;;  %1535 = vmatprep.mubr.msk.bf16.mxu0 %vm2089_vm1, %v2088_v0 }
 0x26e   : > { %1545 = vmatprep.subr.bf16.mxu0 %v2088_v0 }
 0x274   : > { %1536 = vmatmul.mubr.msk.bf16.vlgmr.msra.gmra.mrb[12].mxu0 %vm598_vm2, %v870_v28 }
 0x275   : > { %1546 = vmatpush3.bf16.xpose.msra.mxu0 %v1015_v29  ;;  %1547 = vmatprep.mubr.msk.bf16.mxu0 %vm2089_vm1, %v2088_v0 }
 0x276   : > { %1557 = vmatprep.subr.bf16.mxu0 %v2088_v0 }
 0x27c   : > { %1548 = vmatmul.mubr.msk.bf16.vlgmr.msra.gmra.mrb[16].mxu0 %vm598_vm2, %v1008_v30 }
 0x27d   : > { %1561 = vmatprep.mubr.msk.bf16.mxu0 %vm2089_vm1, %v2088_v0 }
 0x2cd   : > { %v2524_v31 = vpop.f32.mrb[4].mxu0 }
 0x2ce   : > { %v1513_v32 = vpop.f32.mrb[5].mxu0  ;;  %v646_v33 = vsel %vm598_vm2, %v2524_v31, -inf }
 0x2cf   : > { %647 = vmax.xlane.f32.xlu0 %v646_v33  ;;  %v642_v34 = vpop.f32.mrb[6].mxu0 }
 0x2d0   : > { %v1514_v35 = vpop.f32.mrb[7].mxu0 }
 0x33f   : > { %v2530_v38 = vpop.f32.mrb[8].mxu0 }
 0x340   : > { %v1525_v39 = vpop.f32.mrb[9].mxu0  ;;  %v782_v40 = vsel %vm598_vm2, %v2530_v38, -inf }
 0x341   : > { %783 = vmax.xlane.f32.xlu1 %v782_v40  ;;  %v778_v41 = vpop.f32.mrb[10].mxu0 }
 0x342   : > { %v1526_v42 = vpop.f32.mrb[11].mxu0 }
 0x347   : > { %v2534_v43 = vpop.f32.mrb[12].mxu0 }
 0x348   : > { %v1537_v44 = vpop.f32.mrb[13].mxu0  ;;  %v920_v45 = vsel %vm598_vm2, %v2534_v43, -inf }
 0x349   : > { %921 = vmax.xlane.f32.xlu0 %v920_v45  ;;  %v916_v46 = vpop.f32.mrb[14].mxu0 }
 0x34a   : > { %v1538_v47 = vpop.f32.mrb[15].mxu0  ;;  %v661_v46 = vld [vmem:[#allocation3] sm:$0xff] }
 0x34f   : > { %v2538_v48 = vpop.f32.mrb[16].mxu0 }
 0x350   : > { %v1549_v49 = vpop.f32.mrb[17].mxu0  ;;  %v1058_v50 = vsel %vm598_vm2, %v2538_v48, -inf }
 0x351   : > { %1059 = vmax.xlane.f32.xlu0 %v1058_v50  ;;  %v1054_v51 = vpop.f32.mrb[18].mxu0 }
 0x352   : > { %v1550_v52 = vpop.f32.mrb[19].mxu0 }
 0x35c   : > { %v648_v55 = vpop.xlane.xlu0 %647 }
 0x35d   : > { %v2545_v56 = vmax.f32 %v2542_v54, %v648_v55 }
 0x35f   : > { %v650_v57 = vsub.f32 %v2542_v54, %v2545_v56  ;;  %729 = vst.msk [vmem:[#allocation2] sm:$0xff] %vm667_vm4, %v2545_v56  ;;  %655 = vperm.xlu1 %1712, %v2545_v56  }
 0x363   : > { %678 = vrot.lane.b32.xlu1 %v2498_v16, %s2096_s20  ;;  %s2105_s20 = smov [#allocation19]  }
 0x364   : > { %1714 = vset.pattern.permute.xlu1 %v2097_v58 }
 0x366   : > { %v2554_v59 = vld [vmem:[#allocation2] sm:$0xff] }
 0x3ce   : > { %v784_v60 = vpop.xlane.xlu1 %783 }
 0x3cf   : > { %v2557_v61 = vmax.f32 %v2554_v59, %v784_v60 }
 0x3d1   : > { %v786_v62 = vsub.f32 %v2554_v59, %v2557_v61  ;;  %868 = vst.msk [vmem:[#allocation2] sm:$0xff] %vm803_vm5, %v2557_v61  ;;  %791 = vperm.xlu0 %1713, %v2557_v61  }
 0x3d3   : > { %v787_v44 = vmul.f32 1.442695, %v786_v62 }
 0x3d6   : > { %v922_v1 = vpop.xlane.xlu0 %921 }
 0x3d8   : > { %v2564_v63 = vld [vmem:[#allocation2] sm:$0xff] }
 0x3d9   : > { %v2567_v2 = vmax.f32 %v2564_v63, %v922_v1 }
 0x3db   : > { %v924_v3 = vsub.f32 %v2564_v63, %v2567_v2  ;;  %1006 = vst.msk [vmem:[#allocation2] sm:$0xff] %vm941_vm6, %v2567_v2  ;;  %929 = vperm.xlu1 %1714, %v2567_v2  }
 0x3dd   : > { %v925_v54 = vmul.f32 1.442695, %v924_v3 }
 0x3de   : > { %v656_v4 = vpop.permute.xlu1 %655  ;;  %v1060_v9 = vpop.xlane.xlu0 %1059 }
 0x3df   : > { %v658_v5 = vsub.f32 %v2524_v31, %v656_v4  ;;  %813 = vrot.lane.b32.xlu1 %v2498_v16, %s2098_s17  ;;  %s1978_s17 = sshll.u32 %s2105_s20, 4  ;;  %s1979_s17 = int_to_ptr.vmem [resolvable:$false] %s1978_s17 }
 0x3e0   : > { %1715 = vset.pattern.permute.xlu1 %v2099_v6  ;;  %p1981_p11 = scmp.lt.s32.totalorder %s2652_s23, %s1979_s17 }
 0x3e1   : > { %v659_v7 = vmul.f32 1.442695, %v658_v5  ;;  %v669_v5 = vld [vmem:[#allocation4] sm:$0xff] }
 0x3e2   : > { %v2577_v8 = vld [vmem:[#allocation2] sm:$0xff]  ;;  %v679_v10 = vpop.permute.xlu1 %678 }
 0x3e3   : > { %1728 = vpow2.f32 %v659_v7  ;;  %v2580_v11 = vmax.f32 %v2577_v8, %v1060_v9  ;;  %v685_v12 = vsel %vm683_vm7, %v679_v10, 0 }
 0x3e4   : > { %1516 = vmatpush3.bf16.msra.mxu1 %v685_v12 }
 0x3e5   : > { %v1062_v13 = vsub.f32 %v2577_v8, %v2580_v11  ;;  %1144 = vst.msk [vmem:[#allocation2] sm:$0xff] %vm1079_vm8, %v2580_v11  ;;  %1067 = vperm.xlu1 %1715, %v2580_v11   ;;  %1527 = vmatprep.subr.bf16.mxu1 %v2088_v0 }
 0x3e7   : > { %v1063_v60 = vmul.f32 1.442695, %v1062_v13 }
 0x3e9   : > { %951 = vrot.lane.b32.xlu1 %v2498_v16, %s2100_s8  ;;  %s1980_s8 = scalar_lea.vmem %s1979_s17, 256 }
 0x3ea   : > { %1716 = vset.pattern.permute.xlu1 %v2094_v37  ;;  %p1982_p2 = scmp.lt.s32.totalorder %s1980_s8, %s1974_s6 }
 0x3ec   : > { %p1983_p10 = por %p1982_p2, %p1981_p11 }
 0x3ed   : > { %v1729_v14 = vpop.eup %1728  ;;  %1089 = vrot.lane.b32.xlu1 %v2498_v16, %s2101_s24 }
 0x3ee   : > { %v676_v15 = vpack.c.bf16 %v1729_v14, %v1729_v14  ;;  %v663_v17 = vsel %vm598_vm2, %v1729_v14, 0.0  ;;  %p1984_p1 = pnand %p1983_p10, %p1977_p7 }
 0x3f0   : > { %1518 = vmatmul.mubr.msk.bf16.vlgmr.msra.gmra.mrb[4].mxu1 %vm598_vm2, %v676_v15 }
 0x3f1   : > { %1529 = vmatprep.mubr.msk.bf16.mxu1 %vm2089_vm1, %v2088_v0 }
 0x411   : > { %664 = vadd.xlane.f32.xlu1 %v663_v17 }
 0x450   : > { %v792_v18 = vpop.permute.xlu0 %791 }
 0x451   : > { %v794_v19 = vsub.f32 %v2530_v38, %v792_v18  ;;  %v651_v38 = vmul.f32 1.442695, %v650_v57 }
 0x453   : > { %v795_v20 = vmul.f32 1.442695, %v794_v19 }
 0x455   : > { %1730 = vpow2.f32 %v795_v20 }
 0x45a   : > { %v930_v21 = vpop.permute.xlu1 %929 }
 0x45b   : > { %v932_v22 = vsub.f32 %v2534_v43, %v930_v21 }
 0x45d   : > { %v933_v23 = vmul.f32 1.442695, %v932_v22 }
 0x45e   : > { %v814_v24 = vpop.permute.xlu1 %813 }
 0x45f   : > { %v1731_v16 = vpop.eup %1730  ;;  %1732 = vpow2.f32 %v933_v23  ;;  %v819_v25 = vsel %vm683_vm7, %v814_v24, 0 }
 0x460   : > { %1528 = vmatpush3.bf16.msra.mxu1 %v819_v25  ;;  %v799_v26 = vsel %vm598_vm2, %v1731_v16, 0.0  ;;  %v812_v27 = vpack.c.bf16 %v1731_v16, %v1731_v16 }
 0x461   : > { %800 = vadd.xlane.f32.xlu0 %v799_v26  ;;  %1539 = vmatprep.subr.bf16.mxu1 %v2088_v0 }
 0x463   : > { %1530 = vmatmul.mubr.msk.bf16.vlgmr.msra.gmra.mrb[8].mxu1 %vm598_vm2, %v812_v27  ;;  %v1726_v27 = vld [vmem:[#allocation16] sm:$0xff]  }
 0x464   : > { %v1068_v28 = vpop.permute.xlu1 %1067  ;;  %1541 = vmatprep.mubr.msk.bf16.mxu1 %vm2089_vm1, %v2088_v0  ;;  %1558 = vmatpush3.bf16.msra.mxu0 %v1726_v27 }
 0x465   : > { %v1070_v29 = vsub.f32 %v2538_v48, %v1068_v28  ;;  %v1727_v28 = vld [vmem:[#allocation16 + $0x8] sm:$0xff]   ;;  %1559 = vmatprep.subr.bf16.mxu0 %v2088_v0 }
 0x467   : > { %v1071_v30 = vmul.f32 1.442695, %v1070_v29 }
 0x468   : > { %v952_v31 = vpop.permute.xlu1 %951  ;;  %1560 = vmatpush3.bf16.msra.mxu0 %v1727_v28 }
 0x469   : > { %v1733_v32 = vpop.eup %1732  ;;  %1734 = vpow2.f32 %v1071_v30  ;;  %v957_v33 = vsel %vm683_vm7, %v952_v31, 0 }
 0x46a   : > { %1540 = vmatpush3.bf16.msra.mxu1 %v957_v33  ;;  %v937_v34 = vsel %vm598_vm2, %v1733_v32, 0.0  ;;  %v950_v35 = vpack.c.bf16 %v1733_v32, %v1733_v32  ;;  %1736 = vpow2.f32 %v651_v38 }
 0x46b   : > { %938 = vadd.xlane.f32.xlu1 %v937_v34  ;;  %1551 = vmatprep.subr.bf16.mxu1 %v2088_v0  ;;  %1738 = vpow2.f32 %v787_v44 }
 0x46c   : > { %v1090_v36 = vpop.permute.xlu1 %1089  ;;  %1740 = vpow2.f32 %v925_v54 }
 0x46d   : > { %v1095_v39 = vsel %vm683_vm7, %v1090_v36, 0  ;;  %1542 = vmatmul.mubr.msk.bf16.vlgmr.msra.gmra.mrb[12].mxu1 %vm598_vm2, %v950_v35  ;;  %1742 = vpow2.f32 %v1063_v60 }
 0x46e   : > { %1552 = vmatpush3.bf16.msra.mxu1 %v1095_v39  ;;  %1553 = vmatprep.mubr.msk.bf16.mxu1 %vm2089_vm1, %v2088_v0 }
 0x473   : > { %v1735_v40 = vpop.eup %1734 }
 0x474   : > { %v1075_v41 = vsel %vm598_vm2, %v1735_v40, 0.0  ;;  %v1088_v42 = vpack.c.bf16 %v1735_v40, %v1735_v40  ;;  %v1737_v43 = vpop.eup %1736 }
 0x475   : > { %1076 = vadd.xlane.f32.xlu0 %v1075_v41  ;;  %v1739_v45 = vpop.eup %1738  ;;  %v662_v47 = vmul.f32 %v1737_v43, %v661_v46 }
 0x476   : > { %1554 = vmatmul.mubr.msk.bf16.vlgmr.msra.gmra.mrb[16].mxu1 %vm598_vm2, %v1088_v42  ;;  %v1741_v61 = vpop.eup %1740 }
 0x477   : > { %v1743_v9 = vpop.eup %1742 }
 0x47c   : > { %672 = vperm.xlu1 %1716, %v1737_v43  }
 0x480   : > { %1717 = vset.pattern.permute.xlu1 %v2097_v58 }
 0x48b   : > { %808 = vperm.xlu0 %1713, %v1739_v45  }
 0x49e   : > { %v665_v48 = vpop.xlane.xlu1 %664 }
 0x49f   : > { %v666_v49 = vadd.f32 %v665_v48, %v662_v47 }
 0x4a1   : > { %668 = vst.msk [vmem:[#allocation3] sm:$0xff] %vm667_vm4, %v666_v49 }
 0x4a8   : > { %v797_v55 = vld [vmem:[#allocation3] sm:$0xff] }
 0x4a9   : > { %v798_v56 = vmul.f32 %v1739_v45, %v797_v55  ;;  %v1460_v55 = vld [vmem:[#allocation17] ss:$0 sm:$0xff] }
 0x4c3   : > { %v721_v50 = vpop.f32.mrb[4].mxu1 }
 0x4c4   : > { %v1519_v51 = vpop.f32.mrb[5].mxu1 }
 0x4c5   : > { %v724_v52 = vpop.f32.mrb[6].mxu1 }
 0x4c6   : > { %v1520_v53 = vpop.f32.mrb[7].mxu1 }
 0x4ee   : > { %v801_v57 = vpop.xlane.xlu0 %800 }
 0x4ef   : > { %v802_v59 = vadd.f32 %v801_v57, %v798_v56 }
 0x4f1   : > { %804 = vst.msk [vmem:[#allocation3] sm:$0xff] %vm803_vm5, %v802_v59 }
 0x4f8   : > { %v939_v62 = vpop.xlane.xlu1 %938  ;;  %v935_v1 = vld [vmem:[#allocation3] sm:$0xff] }
 0x4f9   : > { %v936_v4 = vmul.f32 %v1741_v61, %v935_v1 }
 0x4fb   : > { %v940_v7 = vadd.f32 %v939_v62, %v936_v4 }
 0x4fc   : > { %v673_v63 = vpop.permute.xlu1 %672 }
 0x4fd   : > { %942 = vst.msk [vmem:[#allocation3] sm:$0xff] %vm941_vm6, %v940_v7  ;;  %v675_v2 = vmul.f32 %v673_v63, %v669_v5 }
 0x4ff   : > { %v727_v3 = vadd.f32 %v721_v50, %v675_v2 }
 0x501   : > { %728 = vst.msk [vmem:[#allocation4] sm:$0xff] %vm598_vm2, %v727_v3 }
 0x502   : > { %v1077_v14 = vpop.xlane.xlu0 %1076 }
 0x504   : > { %v1073_v10 = vld [vmem:[#allocation3] sm:$0xff] }
 0x505   : > { %v1074_v12 = vmul.f32 %v1743_v9, %v1073_v10 }
 0x507   : > { %v1078_v8 = vadd.f32 %v1077_v14, %v1074_v12 }
 0x508   : > { %v805_v29 = vld [vmem:[#allocation4] sm:$0xff] }
 0x509   : > { %1080 = vst.msk [vmem:[#allocation3] sm:$0xff] %vm1079_vm8, %v1078_v8 }
 0x510   : > { %v1145_v13 = vld [vmem:[#allocation3] sm:$0xff] }
 0x511   : > { %1744 = vrcp.f32 %v1145_v13 }
 0x51b   : > { %v1745_v23 = vpop.eup %1744 }
 0x536   : > { %v855_v11 = vpop.f32.mrb[8].mxu1 }
 0x537   : > { %862 = vrot.lane.b32.xlu1 %v855_v11, %s2102_s5  ;;  %v1531_v15 = vpop.f32.mrb[9].mxu1 }
 0x538   : > { %v858_v17 = vpop.f32.mrb[10].mxu1 }
 0x539   : > { %v1532_v18 = vpop.f32.mrb[11].mxu1 }
 0x53b   : > { %946 = vperm.xlu1 %1717, %v1741_v61  }
 0x53f   : > { %1718 = vset.pattern.permute.xlu1 %v2099_v6 }
 0x540   : > { %1084 = vperm.xlu1 %1718, %v1743_v9   ;;  %v993_v19 = vpop.f32.mrb[12].mxu1 }
 0x541   : > { %v1543_v20 = vpop.f32.mrb[13].mxu1  ;;  %1000 = vrot.lane.b32.xlu0 %v993_v19, %s2103_s2 }
 0x542   : > { %v996_v21 = vpop.f32.mrb[14].mxu1 }
 0x543   : > { %v1544_v22 = vpop.f32.mrb[15].mxu1 }
 0x544   : > { %1719 = vset.pattern.permute.xlu1 %v2094_v37  ;;  %v809_v37 = vpop.permute.xlu0 %808 }
 0x545   : > { %1150 = vperm.xlu1 %1719, %v1745_v23   ;;  %v811_v30 = vmul.f32 %v809_v37, %v805_v29 }
 0x549   : > { %v1131_v24 = vpop.f32.mrb[16].mxu1  ;;  %1720 = vset.pattern.permute.xlu1 %v2097_v58 }
 0x54a   : > { %v1555_v16 = vpop.f32.mrb[17].mxu1  ;;  %1138 = vrot.lane.b32.xlu0 %v1131_v24, %s2104_s19  ;;  %1164 = vperm.xlu1 %1720, %v1745_v23  }
 0x54b   : > { %v1134_v25 = vpop.f32.mrb[18].mxu1 }
 0x54c   : > { %v1556_v26 = vpop.f32.mrb[19].mxu1 }
 0x54e   : > { %1157 = vperm.xlu0 %1713, %v1745_v23  }
 0x552   : > { %1721 = vset.pattern.permute.xlu0 %v2099_v6 }
 0x553   : > { %1171 = vperm.xlu0 %1721, %v1745_v23  }
 0x5a9   : > { %v863_v58 = vpop.permute.xlu1 %862 }
 0x5aa   : > { %v865_v31 = vadd.f32 %v863_v58, %v811_v30 }
 0x5ac   : > { %867 = vst.msk [vmem:[#allocation4] sm:$0xff] %vm866_vm9, %v865_v31 }
 0x5b3   : > { %v943_v33 = vld [vmem:[#allocation4] sm:$0xff]  ;;  %v1001_v35 = vpop.permute.xlu0 %1000 }
 0x5ba   : > { %v947_v32 = vpop.permute.xlu1 %946 }
 0x5bb   : > { %v949_v34 = vmul.f32 %v947_v32, %v943_v33 }
 0x5bc   : > { %v1139_v39 = vpop.permute.xlu0 %1138 }
 0x5bd   : > { %v1003_v6 = vadd.f32 %v1001_v35, %v949_v34 }
 0x5bf   : > { %1005 = vst.msk [vmem:[#allocation4] sm:$0xff] %vm1004_vm10, %v1003_v6  ;;  %v1085_v36 = vpop.permute.xlu1 %1084 }
 0x5c4   : > { %v1151_v41 = vpop.permute.xlu1 %1150 }
 0x5c6   : > { %v1081_v38 = vld [vmem:[#allocation4] sm:$0xff] }
 0x5c7   : > { %v1087_v0 = vmul.f32 %v1085_v36, %v1081_v38 }
 0x5c9   : > { %v1141_v40 = vadd.f32 %v1139_v39, %v1087_v0  ;;  %v1165_v47 = vpop.permute.xlu1 %1164 }
 0x5cb   : > { %1143 = vst.msk [vmem:[#allocation4] sm:$0xff] %vm1142_vm11, %v1141_v40 }
 0x5cd   : > { %v1158_v45 = vpop.permute.xlu0 %1157 }
 0x5d2   : > { %v1147_v42 = vld [vmem:[#allocation4] sm:$0xff]  ;;  %v1172_v51 = vpop.permute.xlu0 %1171 }
 0x5d3   : > { %v1153_v43 = vmul.f32 %v1151_v41, %v1147_v42 }
 0x5d5   : > { %1154 = vst.msk [vmem:[#allocation4] sm:$0xff] %vm598_vm2, %v1153_v43 }
 0x5dc   : > { %v1155_v44 = vld [vmem:[#allocation4] sm:$0xff] }
 0x5dd   : > { %v1160_v46 = vmul.f32 %v1158_v45, %v1155_v44 }
 0x5df   : > { %1161 = vst.msk [vmem:[#allocation4] sm:$0xff] %vm866_vm9, %v1160_v46 }
 0x5e6   : > { %v1162_v48 = vld [vmem:[#allocation4] sm:$0xff] }
 0x5e7   : > { %v1167_v49 = vmul.f32 %v1165_v47, %v1162_v48 }
 0x5e9   : > { %1168 = vst.msk [vmem:[#allocation4] sm:$0xff] %vm1004_vm10, %v1167_v49 }
 0x5f0   : > { %v1169_v50 = vld [vmem:[#allocation4] sm:$0xff] }
 0x5f1   : > { %v1174_v52 = vmul.f32 %v1172_v51, %v1169_v50 }
 0x5f3   : > { %1175 = vst.msk [vmem:[#allocation4] sm:$0xff] %vm1142_vm11, %v1174_v52 }
 0x5fa   : > { %v1176_v53 = vld [vmem:[#allocation4] sm:$0xff] }
 0x5fb   : > { %v1177_v54 = vpack.c.bf16 %v1176_v53, %v1176_v53 }
 0x5fd   : > { %1562 = vmatmul.mubr.msk.bf16.vlgmr.msra.gmra.mrb[20].mxu0 %vm481_vm0, %v1177_v54 }
 0x6d0   : > { %v1238_v56 = vpop.f32.mrb[20].mxu0 }
 0x6d1   : > { %v1239_v57 = vadd.f32 %v1460_v55, %v1238_v56  ;;  %v1563_v59 = vpop.f32.mrb[21].mxu0 }
 0x6d2   : > { %v1241_v60 = vpop.f32.mrb[22].mxu0 }
 0x6d3   : > { %v1564_v61 = vpop.f32.mrb[23].mxu0  ;;  %1244 = vst.msk [vmem:[%s455_s22] sm:$0xff] %vm481_vm0, %v1239_v57 }
 0x6d4   : > { %1987 = shalt.err (!%p1984_p1)
}
 0x6d5   : > { %s1988_s3 = scalar_lea.hbm %s2650_s11, 128  ;;  %s1992_s2 = scalar_lea.hbm %s2749_s26, 256 }
 0x6d6   : > { %p1989_p5 = scmp.ne.s32.totalorder %s2650_s11, %s1988_s3  ;;  %p1993_p12 = scmp.lt.u32.totalorder %s2650_s11, %s2749_s26 }
 0x6d7   : > { %p1994_p6 = scmp.lt.u32.totalorder %s1992_s2, %s1988_s3  ;;  %p1996_p4 = scmp.lt.u32.totalorder %s1988_s3, %s2650_s11 }
 0x6d8   : > { %p1990_p8 = pnand %p1989_p5, %p2750_p9 }
 0x6d9   : > { %p1995_p13 = por %p1994_p6, %p1993_p12 }
 0x6da   : > { %p1991_p3 = pneg %p1990_p8 }
 0x6db   : > { %p1997_p0 = por %p1996_p4, %p1995_p13 }
 0x6dd   : > { %p1998_p7 = pnand %p1997_p0, %p1991_p3 }
 0x6df   : > { %2001 = shalt.err (!%p1998_p7)
}
 0x6e0   : > { %1593 = dma.vmem_to_hbm [thread:$0]  (%p2750_p9), %s2652_s23, 128, %s2650_s11, %s1246_s13  }
 0x6e1 PF: > { %s1272_s25 = sand.u32 1, %s2056_s27   ;;  %p2751_p11 = scmp.ne.s32.totalorder %s2736_s21, 0 }
 0x6e2   : > { %p2752_p2 = scmp.ge.s32.totalorder %s2076_s10, 2  ;;  %s1273_s4 = scalar_lea.sflag [#allocation7], %s1272_s25 }
 0x6e4   : > { %p1622_p10 = pnand %p2752_p2, %p2751_p11 }
 0x6e6   : > { %2051 = dma.done.wait (!%p1622_p10), %s1273_s4, 128  }
 0x6e7   : > { %2053 = vsyncadd (!%p1622_p10), %s1273_s4, 4294967168  ;;  %s30_s10 = sadd.s32 1, %s2076_s10   ;;  %s2753_s27 = smov %s2060_s28 }
 0x6e8   : > { %p27_p1 = scmp.ge.s32.totalorder %s30_s10, 4   ;;  %s2754_s28 = smov %s2064_s29 }
 0x6e9   : > { %s2755_s29 = smov %s2369_s14  ;;  %s2756_s30 = smov %s2072_s9 }
 0x6ea   : > { %s2757_s9 = smov %s2759_s18  ;;  %29 = sbr.rel (!%p27_p1) target bundleno = 18 (0x12), region = 134 }
 0x6f1   :  { %1278 = vsyncpa [#allocation6], 1 }
 0x6f2   :  { %1280 = vsyncpa [#allocation6 + $0x1], 1 }
 0x6f3   :  { %1281 = vsyncpa [#allocation9], 1 }
 0x6f4   :  { %1283 = vsyncpa [#allocation9 + $0x1], 1 }
 0x6f5   :  { %1284 = vsyncpa [#allocation12], 1 }
 0x6f6   :  { %1285 = vsyncpa [#allocation15], 1 }
 0x6f7   :  { %1286 = vsyncpa [#allocation18], 1 }
 0x6f8   :  { %1287 = vsyncpa [#allocation7], 1 }
 0x6f9   :  { %1289 = vsyncpa [#allocation7 + $0x1], 1 }

// kernel: tpu_custom_call.1
= control target key start
LH: loop header
LB: loop body
LE: loop exit
PB: predicated region body
PF: predicated region fallthrough
CT: control target
= control target key end

     0   :  { %s2700_s0 = inlined_call_operand.hbm [shape: bf16[2,8,32], index: 0, kind: input, shape index: {}]   ;;  %s2701_s1 = inlined_call_operand.hbm [shape: bf16[2,8,32], index: 1, kind: input, shape index: {}]   ;;  %s2702_s2 = inlined_call_operand.hbm [shape: bf16[32,32], index: 2, kind: input, shape index: {}]   ;;  %s2703_s3 = inlined_call_operand.hbm [shape: f32[1,32], index: 3, kind: input, shape index: {}]   ;;  %s2704_s4 = inlined_call_operand.hbm [shape: bf16[32,64], index: 4, kind: input, shape index: {}]   ;;  %s2705_s5 = inlined_call_operand.hbm [shape: f32[1,64], index: 5, kind: input, shape index: {}]   ;;  %s2706_s6 = inlined_call_operand.hbm [shape: bf16[32,32], index: 6, kind: input, shape index: {}]   ;;  %s2707_s7 = inlined_call_operand.hbm [shape: f32[1,32], index: 7, kind: input, shape index: {}]   ;;  %s2708_s8 = inlined_call_operand.hbm [shape: f32[2,8,32], index: 8, kind: output, shape index: {}]  }
   0x1   :  { %2716 = sst [smem:[#allocation28_spill]] %s2702_s2 }
   0x2   :  { %2717 = sst [smem:[#allocation29_spill]] %s2703_s3 }
   0x3   :  { %2718 = sst [smem:[#allocation30_spill]] %s2704_s4 }
   0x4   :  { %2719 = sst [smem:[#allocation31_spill]] %s2705_s5 }
   0x5   :  { %2720 = sst [smem:[#allocation32_spill]] %s2706_s6 }
   0x6   :  { %2721 = sst [smem:[#allocation33_spill]] %s2708_s8 }
   0x7   :  { %13 = vsyncpa [#allocation6], 0 }
   0x8   :  { %15 = vsyncpa [#allocation6 + $0x1], 0 }
   0x9   :  { %16 = vsyncpa [#allocation9], 0 }
   0xa   :  { %18 = vsyncpa [#allocation9 + $0x1], 0 }
   0xb   :  { %19 = vsyncpa [#allocation12], 0 }
   0xc   :  { %20 = vsyncpa [#allocation15], 0 }
   0xd   :  { %21 = vsyncpa [#allocation18], 0 }
   0xe   :  { %22 = vsyncpa [#allocation7], 0 }
   0xf   :  { %24 = vsyncpa [#allocation7 + $0x1], 0  ;;  %s2151_s27 = smov 0   ;;  %s2153_s28 = smov 0  }
  0x10   :  { %s2155_s29 = smov 0   ;;  %s2157_s30 = smov 0  }
  0x11   :  { %s2159_s9 = smov 0   ;;  %s2161_s10 = smov 0  }
  0x12 LB: > { %2722 = sst [smem:[#allocation27_spill]] %s2068_s30  ;;  %s2182_s11 = sadd.s32 4294967295, %s2076_s10   ;;  %s2076_s10 = sphi %s2161_s10, %s30_s10   ;;  %s2072_s9 = sphi %s2159_s9, %s2757_s9   ;;  %s2068_s30 = sphi %s2157_s30, %s2756_s30   ;;  %s2064_s29 = sphi %s2155_s29, %s2755_s29   ;;  %s2060_s28 = sphi %s2153_s28, %s2754_s28   ;;  %s2056_s27 = sphi %s2151_s27, %s2753_s27  }
  0x13   : > { %p1422_p0 = scmp.ge.s32.totalorder %s2076_s10, 1  ;;  %p2710_p1 = scmp.eq.s32.totalorder %s2182_s11, 0 }
  0x14   : > { %p255_p2 = scmp.lt.s32.totalorder %s2076_s10, 3  ;;  %s2078_s13 = smov [#allocation10]  }
  0x15   : > { %s267_s14 = sshll.u32 %s2078_s13, 4  ;;  %s2079_s16 = smov [#allocation11]   ;;  %s2191_s14 = int_to_ptr.vmem [resolvable:$true] %s267_s14 }
  0x16   : > { %p2187_p3 = pnand %p1422_p0, %p255_p2  ;;  %s281_s17 = sshll.u32 %s2079_s16, 4  ;;  %s2202_s17 = int_to_ptr.vmem [resolvable:$true] %s281_s17 }
  0x17   : > { %s2080_s18 = smov [#allocation14]   ;;  %s2725_s2 = sld [smem:[#allocation28_spill]] }
  0x18   : > { %s2723_s12 = scalar_select %p2187_p3, 1, 0 }
  0x19   : > { %p1595_p4 = pneg %p2187_p3  ;;  %s2204_s19 = sshll.u32 %s2080_s18, 4  ;;  %s306_s19 = int_to_ptr.vmem [resolvable:$true] %s2204_s19 }
  0x1b   : > { %p2198_p6 = pnand %p1595_p4, %p2710_p1 }
  0x1d   : > { %s1746_s22 = scalar_lea.hbm %s2725_s2, 256  ;;  %p2214_p8 = pneg %p2198_p6 }
  0x1e   : > { %p1747_p7 = scmp.ne.s32.totalorder %s2725_s2, %s1746_s22  ;;  %p1753_p11 = scmp.lt.u32.totalorder %s1746_s22, %s2725_s2 }
  0x20   : > { %p1749_p9 = pnand %p2214_p8, %p1747_p7 }
  0x22   : > { %p1750_p10 = pneg %p1749_p9 }
  0x24   : > { %p1755_p12 = pnand %p1753_p11, %p1750_p10 }
  0x26   : > { %1758 = shalt.err (!%p1755_p12)
}
  0x27   : > { %s1759_s16 = scalar_lea.vmem %s2191_s14, 256  ;;  %p1767_p4 = scmp.lt.s32.totalorder %s2191_s14, %s2191_s14 }
  0x28   : > { %p1760_p13 = scmp.ne.s32.totalorder %s2191_s14, %s1759_s16  ;;  %p1768_p5 = scmp.lt.s32.totalorder %s1759_s16, %s1759_s16 }
  0x2a   : > { %p1762_p0 = pnand %p1760_p13, %p2214_p8  ;;  %p1769_p7 = por %p1768_p5, %p1767_p4 }
  0x2c   : > { %p1763_p2 = pneg %p1762_p0 }
  0x2e   : > { %p1770_p9 = pnand %p1769_p7, %p1763_p2 }
  0x30   : > { %1773 = shalt.err (!%p1770_p9)
}
  0x31   : > { %s2712_s18 = smov 64   ;;  %s2082_s20 = smov 4  }
  0x32   : > { %1598 = dma.hbm_to_vmem [thread:$0]  (!%p2198_p6), %s2725_s2, 256, %s2191_s14, [#allocation9], %s2712_s18, %s2712_s18, %s2082_s20  }
  0x33   : > { %s2727_s3 = sld [smem:[#allocation29_spill]] }
  0x39   : > { %s1774_s26 = scalar_lea.hbm %s2727_s3, 16 }
  0x3a   : > { %p1775_p5 = scmp.ne.s32.totalorder %s2727_s3, %s1774_s26  ;;  %p1781_p12 = scmp.lt.u32.totalorder %s1774_s26, %s2727_s3 }
  0x3c   : > { %p1777_p10 = pnand %p1775_p5, %p2214_p8 }
  0x3e   : > { %p1778_p11 = pneg %p1777_p10 }
  0x40   : > { %p1783_p13 = pnand %p1781_p12, %p1778_p11 }
  0x42   : > { %1786 = shalt.err (!%p1783_p13)
}
  0x43   : > { %s1787_s14 = scalar_lea.vmem %s2202_s17, 16  ;;  %s1794_s21 = scalar_lea.vmem %s2202_s17, 32 }
  0x44   : > { %p1788_p0 = scmp.ne.s32.totalorder %s2202_s17, %s1787_s14  ;;  %p1795_p7 = scmp.lt.s32.totalorder %s2202_s17, %s2202_s17 }
  0x45   : > { %p1796_p9 = scmp.lt.s32.totalorder %s1794_s21, %s1787_s14 }
  0x46   : > { %p1790_p2 = pnand %p1788_p0, %p2214_p8 }
  0x47   : > { %p1797_p5 = por %p1796_p9, %p1795_p7 }
  0x48   : > { %p1791_p4 = pneg %p1790_p2 }
  0x4a   : > { %p1798_p10 = pnand %p1797_p5, %p1791_p4 }
  0x4c   : > { %1801 = shalt.err (!%p1798_p10)
}
  0x4d   : > { %1601 = dma.hbm_to_vmem [thread:$0]  (!%p2198_p6), %s2727_s3, 16, %s2202_s17, [#allocation12]  }
  0x4e   : > { %s2728_s5 = sld [smem:[#allocation31_spill]] }
  0x54   : > { %s1802_s24 = scalar_lea.hbm %s2728_s5, 16 }
  0x55   : > { %p1803_p11 = scmp.ne.s32.totalorder %s2728_s5, %s1802_s24  ;;  %p1809_p0 = scmp.lt.u32.totalorder %s1802_s24, %s2728_s5 }
  0x57   : > { %p1805_p12 = pnand %p1803_p11, %p2214_p8 }
  0x59   : > { %p1806_p13 = pneg %p1805_p12 }
  0x5b   : > { %p1811_p2 = pnand %p1809_p0, %p1806_p13 }
  0x5d   : > { %1814 = shalt.err (!%p1811_p2)
}
  0x5e   : > { %s1815_s21 = scalar_lea.vmem %s306_s19, 16  ;;  %s1822_s17 = scalar_lea.vmem %s306_s19, 32 }
  0x5f   : > { %p1816_p4 = scmp.ne.s32.totalorder %s306_s19, %s1815_s21  ;;  %p1823_p5 = scmp.lt.s32.totalorder %s306_s19, %s306_s19 }
  0x60   : > { %p1824_p10 = scmp.lt.s32.totalorder %s1822_s17, %s1815_s21 }
  0x61   : > { %p1818_p7 = pnand %p1816_p4, %p2214_p8 }
  0x62   : > { %p1825_p1 = por %p1824_p10, %p1823_p5 }
  0x63   : > { %p1819_p9 = pneg %p1818_p7 }
  0x65   : > { %p1826_p3 = pnand %p1825_p1, %p1819_p9 }
  0x67   : > { %1829 = shalt.err (!%p1826_p3)
}
  0x68   : > { %1607 = dma.hbm_to_vmem [thread:$0]  (!%p2198_p6), %s2728_s5, 16, %s306_s19, [#allocation15]  }
  0x69   : > { %s2083_s22 = smov [#allocation13]   ;;  %s2084_s24 = smov [#allocation16]  }
  0x6a   : > { %s291_s23 = sshll.u32 %s2083_s22, 4  ;;  %s315_s26 = sshll.u32 %s2084_s24, 4  ;;  %s292_s23 = int_to_ptr.vmem [resolvable:$true] %s291_s23  ;;  %s316_s26 = int_to_ptr.vmem [resolvable:$true] %s315_s26 }
  0x6b   : > { %s2729_s4 = sld [smem:[#allocation30_spill]] }
  0x71   : > { %s1830_s14 = scalar_lea.hbm %s2729_s4, 256 }
  0x72   : > { %p1831_p1 = scmp.ne.s32.totalorder %s2729_s4, %s1830_s14  ;;  %p1837_p12 = scmp.lt.u32.totalorder %s1830_s14, %s2729_s4 }
  0x74   : > { %p1833_p3 = pnand %p1831_p1, %p2214_p8 }
  0x76   : > { %p1834_p11 = pneg %p1833_p3 }
  0x78   : > { %p1839_p13 = pnand %p1837_p12, %p1834_p11 }
  0x7a   : > { %1842 = shalt.err (!%p1839_p13)
}
  0x7b   : > { %s1843_s19 = scalar_lea.vmem %s292_s23, 256  ;;  %p1851_p7 = scmp.lt.s32.totalorder %s292_s23, %s292_s23 }
  0x7c   : > { %p1844_p0 = scmp.ne.s32.totalorder %s292_s23, %s1843_s19  ;;  %p1852_p9 = scmp.lt.s32.totalorder %s1843_s19, %s1843_s19 }
  0x7e   : > { %p1846_p2 = pnand %p1844_p0, %p2214_p8  ;;  %p1853_p5 = por %p1852_p9, %p1851_p7 }
  0x80   : > { %p1847_p4 = pneg %p1846_p2 }
  0x82   : > { %p1854_p10 = pnand %p1853_p5, %p1847_p4 }
  0x84   : > { %1857 = shalt.err (!%p1854_p10)
}
  0x85   : > { %s2730_s30 = smov 64   ;;  %s2731_s6 = sld [smem:[#allocation32_spill]] }
  0x86   : > { %1604 = dma.hbm_to_vmem [thread:$0]  (!%p2198_p6), %s2729_s4, 256, %s292_s23, [#allocation12], %s2730_s30, %s2730_s30, %s2082_s20  }
  0x8b   : > { %s1858_s16 = scalar_lea.hbm %s2731_s6, 256 }
  0x8c   : > { %p1859_p1 = scmp.ne.s32.totalorder %s2731_s6, %s1858_s16  ;;  %p1865_p12 = scmp.lt.u32.totalorder %s1858_s16, %s2731_s6 }
  0x8e   : > { %p1861_p3 = pnand %p1859_p1, %p2214_p8 }
  0x90   : > { %p1862_p11 = pneg %p1861_p3 }
  0x92   : > { %p1867_p13 = pnand %p1865_p12, %p1862_p11 }
  0x94   : > { %1870 = shalt.err (!%p1867_p13)
}
  0x95   : > { %s1871_s19 = scalar_lea.vmem %s316_s26, 256  ;;  %p1879_p7 = scmp.lt.s32.totalorder %s316_s26, %s316_s26 }
  0x96   : > { %p1872_p0 = scmp.ne.s32.totalorder %s316_s26, %s1871_s19  ;;  %p1880_p9 = scmp.lt.s32.totalorder %s1871_s19, %s1871_s19 }
  0x98   : > { %p1874_p2 = pnand %p1872_p0, %p2214_p8  ;;  %p1881_p5 = por %p1880_p9, %p1879_p7 }
  0x9a   : > { %p1875_p4 = pneg %p1874_p2 }
  0x9c   : > { %p1882_p10 = pnand %p1881_p5, %p1875_p4 }
  0x9e   : > { %1885 = shalt.err (!%p1882_p10)
}
  0x9f   : > { %1610 = dma.hbm_to_vmem [thread:$0]  (!%p2198_p6), %s2731_s6, 256, %s316_s26, [#allocation15], %s2730_s30, %s2730_s30, %s2082_s20  }
  0xa0   : > { %s2085_s22 = smov [#allocation17]   ;;  %s1886_s14 = scalar_lea.hbm %s2707_s7, 16 }
  0xa1   : > { %s329_s24 = sshll.u32 %s2085_s22, 4  ;;  %p1887_p1 = scmp.ne.s32.totalorder %s2707_s7, %s1886_s14  ;;  %s330_s24 = int_to_ptr.vmem [resolvable:$true] %s329_s24 }
  0xa2   : > { %p1893_p12 = scmp.lt.u32.totalorder %s1886_s14, %s2707_s7 }
  0xa3   : > { %p1889_p3 = pnand %p1887_p1, %p2214_p8 }
  0xa5   : > { %p1890_p11 = pneg %p1889_p3 }
  0xa7   : > { %p1895_p13 = pnand %p1893_p12, %p1890_p11 }
  0xa9   : > { %1898 = shalt.err (!%p1895_p13)
}
  0xaa   : > { %s1899_s20 = scalar_lea.vmem %s330_s24, 16  ;;  %s1906_s26 = scalar_lea.vmem %s330_s24, 32 }
  0xab   : > { %p1900_p0 = scmp.ne.s32.totalorder %s330_s24, %s1899_s20  ;;  %p1907_p7 = scmp.lt.s32.totalorder %s330_s24, %s330_s24 }
  0xac   : > { %p1908_p9 = scmp.lt.s32.totalorder %s1906_s26, %s1899_s20 }
  0xad   : > { %p1902_p2 = pnand %p1900_p0, %p2214_p8 }
  0xae   : > { %p1909_p5 = por %p1908_p9, %p1907_p7 }
  0xaf   : > { %p1903_p4 = pneg %p1902_p2 }
  0xb1   : > { %p1910_p10 = pnand %p1909_p5, %p1903_p4 }
  0xb3   : > { %1913 = shalt.err (!%p1910_p10)
}
  0xb4   : > { %1613 = dma.hbm_to_vmem [thread:$0]  (!%p2198_p6), %s2707_s7, 16, %s330_s24, [#allocation18]  }
  0xb5   : > { %s1421_s25 = sadd.s32 4294967294, %s2076_s10   ;;  %s42_s18 = sadd.s32 1, %s2072_s9 }
  0xb6   : > { %p44_p8 = scmp.ge.s32.totalorder %s42_s18, 2  ;;  %s51_s15 = sadd.s32 1, %s2064_s29 }
  0xb7   : > { %p58_p1 = scmp.ne.s32.totalorder %s2064_s29, %s2060_s28  ;;  %p59_p3 = scmp.eq.s32.totalorder %s2076_s10, 0 }
  0xb8   : > { %s2759_s18 = smov (%p44_p8, %s42_s18), 0  ;;  %p64_p12 = scmp.ne.s32.totalorder %s2060_s28, %s2056_s27 }
  0xb9   : > { %p2349_p11 = por %p59_p3, %p58_p1  ;;  %s46_s24 = ssub.s32 %s2072_s9, %s2759_s18 }
  0xba   : > { %p242_p6 = scmp.eq.s32.totalorder %s2182_s11, 1  ;;  %p49_p13 = scmp.eq.s32.totalorder %s46_s24, 0 }
  0xbb   : > { %p2733_p0 = scmp.eq.s32.totalorder %s2182_s11, 0  ;;  %p248_p7 = scmp.eq.s32.totalorder %s1421_s25, 1 }
  0xbc   : > { %p2364_p4 = por %p242_p6, %p58_p1  ;;  %p1631_p5 = scmp.lt.s32.totalorder %s2076_s10, 2 }
  0xbd   : > { %p2360_p2 = por %p2733_p0, %p64_p12  ;;  %p2371_p9 = por %p248_p7, %p64_p12 }
  0xbe   : > { %s2735_s16 = scalar_select %p2364_p4, 1, 0 }
  0xbf   : > { %s2734_s13 = scalar_select %p2360_p2, 1, 0 }
  0xc0   : > { %s2369_s14 = scalar_select %p49_p13, %s2064_s29, %s51_s15  }
  0xc1   : > { %s2736_s21 = scalar_select %p2371_p9, 1, 0 }
  0xc2   : > { %s340_s17 = sand.u32 1, %s2064_s29   ;;  %s1431_s8 = sshll.u32 %s2072_s9, 6 }
  0xc3   : > { %s2378_s19 = sshll.u32 %s340_s17, 2  ;;  %s2383_s30 = scalar_lea.hbm %s2700_s0, %s1431_s8 }
  0xc4   : > { %s344_s23 = scalar_lea.vmem [#allocation5], %s2378_s19  ;;  %p2388_p10 = pnand %p1631_p5, %p2349_p11 }
  0xc5   : > { %s352_s25 = sshll.u32 %s344_s23, 4  ;;  %s2397_s26 = scalar_lea.hbm %s2701_s1, %s1431_s8  ;;  %s2392_s25 = int_to_ptr.vmem [resolvable:$true] %s352_s25 }
  0xc6   : > { %s341_s2 = scalar_lea.sflag [#allocation6], %s340_s17  ;;  %s1914_s3 = scalar_lea.hbm %s2383_s30, 64 }
  0xc7   : > { %p1915_p8 = scmp.ne.s32.totalorder %s2383_s30, %s1914_s3  ;;  %p1916_p1 = pneg %p2388_p10 }
  0xc8   : > { %s1919_s4 = scalar_lea.hbm %s2700_s0, 128  ;;  %p1920_p12 = scmp.lt.u32.totalorder %s2383_s30, %s2700_s0 }
  0xc9   : > { %p1917_p3 = pnand %p1916_p1, %p1915_p8  ;;  %p1921_p6 = scmp.lt.u32.totalorder %s1919_s4, %s1914_s3 }
  0xca   : > { %p1923_p0 = scmp.lt.u32.totalorder %s1914_s3, %s2383_s30 }
  0xcb   : > { %p1918_p11 = pneg %p1917_p3  ;;  %p1922_p13 = por %p1921_p6, %p1920_p12 }
  0xcd   : > { %p1924_p7 = por %p1923_p0, %p1922_p13 }
  0xcf   : > { %p1925_p5 = pnand %p1924_p7, %p1918_p11 }
  0xd1   : > { %1928 = shalt.err (!%p1925_p5)
}
  0xd2   : > { %s1929_s17 = scalar_lea.vmem %s2392_s25, 64  ;;  %s2086_s8 = smov [#allocation5]  }
  0xd3   : > { %p1930_p8 = scmp.ne.s32.totalorder %s2392_s25, %s1929_s17  ;;  %s1934_s24 = sshll.u32 %s2086_s8, 4  ;;  %s1935_s24 = int_to_ptr.vmem [resolvable:$false] %s1934_s24 }
  0xd4   : > { %s1936_s5 = scalar_lea.vmem %s1935_s24, 128  ;;  %p1937_p4 = scmp.lt.s32.totalorder %s2392_s25, %s1935_s24 }
  0xd5   : > { %p1932_p3 = pnand %p1930_p8, %p1916_p1  ;;  %p1938_p12 = scmp.lt.s32.totalorder %s1936_s5, %s1929_s17 }
  0xd7   : > { %p1933_p9 = pneg %p1932_p3  ;;  %p1939_p6 = por %p1938_p12, %p1937_p4 }
  0xd9   : > { %p1940_p13 = pnand %p1939_p6, %p1933_p9 }
  0xdb   : > { %1943 = shalt.err (!%p1940_p13)
}
  0xdc   : > { %1617 = dma.hbm_to_vmem [thread:$0]  (!%p2388_p10), %s2383_s30, 64, %s2392_s25, %s341_s2  }
  0xdd   : > { %s359_s3 = sand.u32 1, %s2076_s10   ;;  %s363_s4 = scalar_lea.vmem [#allocation8], %s2378_s19 }
  0xde   : > { %s370_s6 = sshll.u32 %s363_s4, 4  ;;  %s360_s20 = scalar_lea.sflag [#allocation9], %s359_s3  ;;  %s371_s6 = int_to_ptr.vmem [resolvable:$true] %s370_s6 }
  0xdf   : > { %s1944_s22 = scalar_lea.hbm %s2397_s26, 64  ;;  %s1949_s8 = scalar_lea.hbm %s2701_s1, 128 }
  0xe0   : > { %p1945_p4 = scmp.ne.s32.totalorder %s2397_s26, %s1944_s22  ;;  %p1950_p0 = scmp.lt.u32.totalorder %s2397_s26, %s2701_s1 }
  0xe1   : > { %p1951_p7 = scmp.lt.u32.totalorder %s1949_s8, %s1944_s22  ;;  %p1953_p8 = scmp.lt.u32.totalorder %s1944_s22, %s2397_s26 }
  0xe2   : > { %p1947_p9 = pnand %p1945_p4, %p1916_p1 }
  0xe3   : > { %p1952_p5 = por %p1951_p7, %p1950_p0 }
  0xe4   : > { %p1948_p11 = pneg %p1947_p9 }
  0xe5   : > { %p1954_p3 = por %p1953_p8, %p1952_p5 }
  0xe7   : > { %p1955_p12 = pnand %p1954_p3, %p1948_p11 }
  0xe9   : > { %1958 = shalt.err (!%p1955_p12)
}
  0xea   : > { %s1959_s2 = scalar_lea.vmem %s371_s6, 64  ;;  %s2087_s19 = smov [#allocation8]  }
  0xeb   : > { %p1960_p6 = scmp.ne.s32.totalorder %s371_s6, %s1959_s2  ;;  %s1964_s30 = sshll.u32 %s2087_s19, 4  ;;  %s1965_s30 = int_to_ptr.vmem [resolvable:$false] %s1964_s30 }
  0xec   : > { %s1966_s25 = scalar_lea.vmem %s1965_s30, 128  ;;  %p1967_p9 = scmp.lt.s32.totalorder %s371_s6, %s1965_s30 }
  0xed   : > { %p1962_p13 = pnand %p1960_p6, %p1916_p1  ;;  %p1968_p2 = scmp.lt.s32.totalorder %s1966_s25, %s1959_s2 }
  0xef   : > { %p1963_p4 = pneg %p1962_p13  ;;  %p1969_p0 = por %p1968_p2, %p1967_p9 }
  0xf1   : > { %p1970_p7 = pnand %p1969_p0, %p1963_p4 }
  0xf3   : > { %1973 = shalt.err (!%p1970_p7)
}
  0xf4   : > { %1620 = dma.hbm_to_vmem [thread:$0]  (!%p2388_p10), %s2397_s26, 64, %s371_s6, %s360_s20  }
  0xf5   : > { %p2738_p11 = scmp.ne.s32.totalorder %s2723_s12, 0 }
  0xf6   : > { %s2448_s3 = sand.u32 (!%p2738_p11), 1, %s2060_s28   ;;  %p2739_p2 = scmp.ne.s32.totalorder (!%p2738_p11), %s2734_s13, 0 }
  0xf7   : > { %379 = sbr.rel (%p2738_p11) target bundleno = 1761 (0x6e1), region = 52  ;;  %s1435_s4 = sshll.u32 (!%p2738_p11), %s2448_s3, 2 }
  0xf8   : > { %s382_s22 = scalar_lea.sflag (!%p2738_p11), [#allocation6], %s2448_s3  ;;  %s2452_s23 = scalar_lea.vmem (!%p2738_p11), [#allocation5], %s1435_s4 }
  0xfe   : > { %2027 = dma.done.wait (%p2739_p2), %s382_s22, 64  }
  0xff   : > { %2029 = vsyncadd (%p2739_p2), %s382_s22, 4294967232  ;;  %s390_s15 = sand.u32 1, %s2182_s11   ;;  %s394_s26 = scalar_lea.vmem [#allocation8], %s1435_s4 }
 0x100   : > { %s391_s12 = scalar_lea.sflag [#allocation9], %s390_s15 }
 0x101   : > { %2031 = dma.done.wait (%p2739_p2), %s391_s12, 64  }
 0x102   : > { %2033 = vsyncadd (%p2739_p2), %s391_s12, 4294967232  ;;  %p2740_p10 = scmp.eq.s32.totalorder %s2182_s11, 0 }
 0x104   : > { %2035 = dma.done.wait (%p2740_p10), [#allocation9], 256   ;;  %p2741_p1 = pmov %p2740_p10 }
 0x106   : > { %2037 = vsyncadd (%p2741_p1), [#allocation9], 4294967040  ;;  %p2742_p5 = pmov %p2741_p1 }
 0x107   : > { %p2743_p8 = pmov %p2741_p1 }
 0x108   : > { %2039 = dma.done.wait (%p2742_p5), [#allocation12], 272  }
 0x109   : > { %2041 = vsyncadd (%p2743_p8), [#allocation12], 4294967024  ;;  %p2744_p3 = pmov %p2741_p1 }
 0x10a   : > { %p2745_p12 = pmov %p2741_p1 }
 0x10b   : > { %2043 = dma.done.wait (%p2744_p3), [#allocation15], 272  }
 0x10c   : > { %2045 = vsyncadd (%p2745_p12), [#allocation15], 4294967024  ;;  %p2746_p6 = pmov %p2741_p1 }
 0x10d   : > { %p2747_p13 = pmov %p2741_p1 }
 0x10e   : > { %2047 = dma.done.wait (%p2746_p6), [#allocation18], 16  }
 0x10f   : > { %2049 = vsyncadd (%p2747_p13), [#allocation18], 4294967280  ;;  %vm481_vm0 = vcmask 261120   ;;  %v2088_v0 = vmov 0.0   ;;  %vm2089_vm1 = vmmov 0   ;;  %v1722_v1 = vld [vmem:[#allocation13] sm:$0xff]  }
 0x110   : > { %1501 = vmatprep.subr.bf16.mxu1 %v2088_v0  ;;  %1493 = vmatprep.subr.bf16.mxu0 %v2088_v0  ;;  %529 = vst.msk [vmem:[#allocation4] sm:$0xff] %vm481_vm0, %v2088_v0  ;;  %v1723_v2 = vld [vmem:[#allocation10] sm:$0xff]   ;;  %v1725_v4 = vld [vmem:[#allocation10 + $0x8] sm:$0xff]   ;;  %v530_v5 = vld [vmem:[%s394_s26] sm:$0xf]  ;;  %vm598_vm2 = vcmask 64512  }
 0x111   : > { %1505 = vmatprep.mubr.msk.bf16.mxu1 %vm2089_vm1, %v2088_v0  ;;  %1497 = vmatprep.mubr.msk.bf16.mxu0 %vm2089_vm1, %v2088_v0  ;;  %v1724_v3 = vld [vmem:[#allocation13 + $0x8] sm:$0xff]   ;;  %v457_v6 = vld [vmem:[%s2452_s23] sm:$0xf]  ;;  %v1448_v7 = vld [vmem:[#allocation14] ss:$0 sm:$0xff]  ;;  %s2090_s11 = smov 112  }
 0x112   : > { %1502 = vmatpush3.bf16.msra.mxu1 %v1722_v1  ;;  %1494 = vmatpush3.bf16.msra.mxu0 %v1723_v2  ;;  %v1444_v8 = vld [vmem:[#allocation11] ss:$0 sm:$0xff]  ;;  %s2091_s13 = smov 120   ;;  %s2092_s6 = smov 104   ;;  %vm526_vm3 = vcmask 31744   ;;  %v2093_v36 = vmov -inf  }
 0x113   : > { %1503 = vmatprep.subr.bf16.mxu1 %v2088_v0  ;;  %1495 = vmatprep.subr.bf16.mxu0 %v2088_v0  ;;  %527 = vst.msk [vmem:[#allocation2] sm:$0xff] %vm526_vm3, %v2093_v36  ;;  %528 = vst.msk [vmem:[#allocation3] sm:$0xff] %vm526_vm3, %v2088_v0  ;;  %v2094_v37 = vmov 0   ;;  %v2095_v53 = vmov 1   ;;  %vm667_vm4 = vcmask 7168   ;;  %s2096_s20 = smov 96  }
 0x114   : > { %1712 = vset.pattern.permute.xlu1 %v2094_v37  ;;  %1713 = vset.pattern.permute.xlu0 %v2095_v53  ;;  %v2097_v58 = vmov 2   ;;  %vm803_vm5 = vcmask 15368   ;;  %vm941_vm6 = vcmask 23568   ;;  %s2098_s17 = smov 88   ;;  %vm683_vm7 = vcmask 1043456   ;;  %s2100_s8 = smov 80  }
 0x115   : > { %vm1079_vm8 = vcmask 31768   ;;  %s2101_s24 = smov 72   ;;  %s2102_s5 = smov 8   ;;  %vm866_vm9 = vcmask 130112   ;;  %vm1004_vm10 = vcmask 195712   ;;  %vm1142_vm11 = vcmask 261312  }
 0x116   : > { %1504 = vmatpush3.bf16.msra.mxu1 %v1724_v3  ;;  %1496 = vmatpush3.bf16.msra.mxu0 %v1725_v4  ;;  %s2103_s2 = smov 16   ;;  %s2104_s19 = smov 24  }
 0x117   : > { %1515 = vmatprep.subr.bf16.mxu1 %v2088_v0  ;;  %1509 = vmatprep.subr.bf16.mxu0 %v2088_v0  ;;  %s2748_s30 = sld [smem:[#allocation27_spill]]  ;;  %s1443_s25 = sshll.u32 %s2448_s3, 3 }
 0x118   : > { %s455_s22 = scalar_lea.vmem [#allocation19], %s1443_s25  ;;  %s2749_s26 = sld [smem:[#allocation33_spill]] }
 0x119   : > { %1506 = vmatmul.mubr.msk.bf16.vlgmr.msra.gmra.mrb[0].mxu1 %vm481_vm0, %v530_v5  ;;  %1498 = vmatmul.mubr.msk.bf16.vlgmr.msra.gmra.mrb[0].mxu0 %vm481_vm0, %v457_v6  ;;  %v2099_v6 = vmov 3   ;;  %s1260_s23 = sshll.u32 %s455_s22, 4  ;;  %p2750_p9 = scmp.ne.s32.totalorder %s2735_s16, 0  ;;  %s2652_s23 = int_to_ptr.vmem [resolvable:$true] %s1260_s23 }
 0x11a   : > { %1517 = vmatprep.mubr.msk.bf16.mxu1 %vm2089_vm1, %v2088_v0  ;;  %1511 = vmatprep.mubr.msk.bf16.mxu0 %vm2089_vm1, %v2088_v0  ;;  %v2542_v54 = vld [vmem:[#allocation2] sm:$0xff] }
 0x11d   : > { %s1465_s4 = sshll.u32 %s2748_s30, 7 }
 0x1ec   : > { %v591_v9 = vpop.f32.mrb[0].mxu1  ;;  %v519_v12 = vpop.f32.mrb[0].mxu0 }
 0x1ed   : > { %v592_v10 = vadd.f32 %v1448_v7, %v591_v9  ;;  %v1507_v11 = vpop.f32.mrb[1].mxu1  ;;  %v520_v14 = vadd.f32 %v1444_v8, %v519_v12  ;;  %v1499_v15 = vpop.f32.mrb[1].mxu0 }
 0x1ee   : > { %v594_v13 = vpop.f32.mrb[2].mxu1  ;;  %v522_v18 = vpop.f32.mrb[2].mxu0 }
 0x1ef   : > { %v2498_v16 = vpack.c.bf16 %v592_v10, %v592_v10  ;;  %v1508_v17 = vpop.f32.mrb[3].mxu1  ;;  %v1500_v19 = vpop.f32.mrb[3].mxu0  ;;  %v525_v20 = vpack.c.bf16 %v520_v14, %v520_v14 }
 0x1f1   : > { %871 = vrot.lane.b32.xlu1 %v2498_v16, %s2090_s11  ;;  %733 = vrot.lane.b32.xlu0 %v2498_v16, %s2091_s13  ;;  %v603_v21 = vsel %vm598_vm2, %v2498_v16, 0 }
 0x1f2   : > { %1510 = vmatpush3.bf16.xpose.msra.mxu0 %v603_v21 }
 0x1f3   : > { %1521 = vmatprep.subr.bf16.mxu0 %v2088_v0 }
 0x1f5   : > { %869 = vrot.lane.b32.xlu1 %v525_v20, %s2090_s11  ;;  %731 = vrot.lane.b32.xlu0 %v525_v20, %s2091_s13  ;;  %s2650_s11 = scalar_lea.hbm %s2749_s26, %s1465_s4  ;;  %s1246_s13 = scalar_lea.sflag [#allocation7], %s2448_s3 }
 0x1f9   : > { %1007 = vrot.lane.b32.xlu1 %v525_v20, %s2092_s6  ;;  %1009 = vrot.lane.b32.xlu0 %v2498_v16, %s2092_s6  ;;  %s1974_s6 = scalar_lea.vmem %s2652_s23, 128 }
 0x1fa   : > { %1512 = vmatmul.mubr.msk.bf16.vlgmr.msra.gmra.mrb[4].mxu0 %vm598_vm2, %v525_v20  ;;  %p1975_p4 = scmp.ne.s32.totalorder %s2652_s23, %s1974_s6 }
 0x1fb   : > { %1523 = vmatprep.mubr.msk.bf16.mxu0 %vm2089_vm1, %v2088_v0 }
 0x1fc   : > { %p1976_p0 = pnand %p1975_p4, %p2750_p9 }
 0x1fe   : > { %p1977_p7 = pneg %p1976_p0 }
 0x263   : > { %v734_v22 = vpop.permute.xlu0 %733  ;;  %v872_v24 = vpop.permute.xlu1 %871 }
 0x264   : > { %v739_v23 = vsel %vm598_vm2, %v734_v22, 0  ;;  %v877_v26 = vsel %vm598_vm2, %v872_v24, 0 }
 0x265   : > { %1522 = vmatpush3.bf16.xpose.msra.mxu0 %v739_v23 }
 0x266   : > { %1533 = vmatprep.subr.bf16.mxu0 %v2088_v0 }
 0x267   : > { %v732_v25 = vpop.permute.xlu0 %731  ;;  %v870_v28 = vpop.permute.xlu1 %869 }
 0x26b   : > { %v1010_v27 = vpop.permute.xlu0 %1009  ;;  %v1008_v30 = vpop.permute.xlu1 %1007 }
 0x26c   : > { %1524 = vmatmul.mubr.msk.bf16.vlgmr.msra.gmra.mrb[8].mxu0 %vm598_vm2, %v732_v25  ;;  %v1015_v29 = vsel %vm598_vm2, %v1010_v27, 0 }
 0x26d   : > { %1534 = vmatpush3.bf16.xpose.msra.mxu0 %v877_v26  ;;  %1535 = vmatprep.mubr.msk.bf16.mxu0 %vm2089_vm1, %v2088_v0 }
 0x26e   : > { %1545 = vmatprep.subr.bf16.mxu0 %v2088_v0 }
 0x274   : > { %1536 = vmatmul.mubr.msk.bf16.vlgmr.msra.gmra.mrb[12].mxu0 %vm598_vm2, %v870_v28 }
 0x275   : > { %1546 = vmatpush3.bf16.xpose.msra.mxu0 %v1015_v29  ;;  %1547 = vmatprep.mubr.msk.bf16.mxu0 %vm2089_vm1, %v2088_v0 }
 0x276   : > { %1557 = vmatprep.subr.bf16.mxu0 %v2088_v0 }
 0x27c   : > { %1548 = vmatmul.mubr.msk.bf16.vlgmr.msra.gmra.mrb[16].mxu0 %vm598_vm2, %v1008_v30 }
 0x27d   : > { %1561 = vmatprep.mubr.msk.bf16.mxu0 %vm2089_vm1, %v2088_v0 }
 0x2cd   : > { %v2524_v31 = vpop.f32.mrb[4].mxu0 }
 0x2ce   : > { %v1513_v32 = vpop.f32.mrb[5].mxu0  ;;  %v646_v33 = vsel %vm598_vm2, %v2524_v31, -inf }
 0x2cf   : > { %647 = vmax.xlane.f32.xlu0 %v646_v33  ;;  %v642_v34 = vpop.f32.mrb[6].mxu0 }
 0x2d0   : > { %v1514_v35 = vpop.f32.mrb[7].mxu0 }
 0x33f   : > { %v2530_v38 = vpop.f32.mrb[8].mxu0 }
 0x340   : > { %v1525_v39 = vpop.f32.mrb[9].mxu0  ;;  %v782_v40 = vsel %vm598_vm2, %v2530_v38, -inf }
 0x341   : > { %783 = vmax.xlane.f32.xlu1 %v782_v40  ;;  %v778_v41 = vpop.f32.mrb[10].mxu0 }
 0x342   : > { %v1526_v42 = vpop.f32.mrb[11].mxu0 }
 0x347   : > { %v2534_v43 = vpop.f32.mrb[12].mxu0 }
 0x348   : > { %v1537_v44 = vpop.f32.mrb[13].mxu0  ;;  %v920_v45 = vsel %vm598_vm2, %v2534_v43, -inf }
 0x349   : > { %921 = vmax.xlane.f32.xlu0 %v920_v45  ;;  %v916_v46 = vpop.f32.mrb[14].mxu0 }
 0x34a   : > { %v1538_v47 = vpop.f32.mrb[15].mxu0  ;;  %v661_v46 = vld [vmem:[#allocation3] sm:$0xff] }
 0x34f   : > { %v2538_v48 = vpop.f32.mrb[16].mxu0 }
 0x350   : > { %v1549_v49 = vpop.f32.mrb[17].mxu0  ;;  %v1058_v50 = vsel %vm598_vm2, %v2538_v48, -inf }
 0x351   : > { %1059 = vmax.xlane.f32.xlu0 %v1058_v50  ;;  %v1054_v51 = vpop.f32.mrb[18].mxu0 }
 0x352   : > { %v1550_v52 = vpop.f32.mrb[19].mxu0 }
 0x35c   : > { %v648_v55 = vpop.xlane.xlu0 %647 }
 0x35d   : > { %v2545_v56 = vmax.f32 %v2542_v54, %v648_v55 }
 0x35f   : > { %v650_v57 = vsub.f32 %v2542_v54, %v2545_v56  ;;  %729 = vst.msk [vmem:[#allocation2] sm:$0xff] %vm667_vm4, %v2545_v56  ;;  %655 = vperm.xlu1 %1712, %v2545_v56  }
 0x363   : > { %678 = vrot.lane.b32.xlu1 %v2498_v16, %s2096_s20  ;;  %s2105_s20 = smov [#allocation19]  }
 0x364   : > { %1714 = vset.pattern.permute.xlu1 %v2097_v58 }
 0x366   : > { %v2554_v59 = vld [vmem:[#allocation2] sm:$0xff] }
 0x3ce   : > { %v784_v60 = vpop.xlane.xlu1 %783 }
 0x3cf   : > { %v2557_v61 = vmax.f32 %v2554_v59, %v784_v60 }
 0x3d1   : > { %v786_v62 = vsub.f32 %v2554_v59, %v2557_v61  ;;  %868 = vst.msk [vmem:[#allocation2] sm:$0xff] %vm803_vm5, %v2557_v61  ;;  %791 = vperm.xlu0 %1713, %v2557_v61  }
 0x3d3   : > { %v787_v44 = vmul.f32 1.442695, %v786_v62 }
 0x3d6   : > { %v922_v1 = vpop.xlane.xlu0 %921 }
 0x3d8   : > { %v2564_v63 = vld [vmem:[#allocation2] sm:$0xff] }
 0x3d9   : > { %v2567_v2 = vmax.f32 %v2564_v63, %v922_v1 }
 0x3db   : > { %v924_v3 = vsub.f32 %v2564_v63, %v2567_v2  ;;  %1006 = vst.msk [vmem:[#allocation2] sm:$0xff] %vm941_vm6, %v2567_v2  ;;  %929 = vperm.xlu1 %1714, %v2567_v2  }
 0x3dd   : > { %v925_v54 = vmul.f32 1.442695, %v924_v3 }
 0x3de   : > { %v656_v4 = vpop.permute.xlu1 %655  ;;  %v1060_v9 = vpop.xlane.xlu0 %1059 }
 0x3df   : > { %v658_v5 = vsub.f32 %v2524_v31, %v656_v4  ;;  %813 = vrot.lane.b32.xlu1 %v2498_v16, %s2098_s17  ;;  %s1978_s17 = sshll.u32 %s2105_s20, 4  ;;  %s1979_s17 = int_to_ptr.vmem [resolvable:$false] %s1978_s17 }
 0x3e0   : > { %1715 = vset.pattern.permute.xlu1 %v2099_v6  ;;  %p1981_p11 = scmp.lt.s32.totalorder %s2652_s23, %s1979_s17 }
 0x3e1   : > { %v659_v7 = vmul.f32 1.442695, %v658_v5  ;;  %v669_v5 = vld [vmem:[#allocation4] sm:$0xff] }
 0x3e2   : > { %v2577_v8 = vld [vmem:[#allocation2] sm:$0xff]  ;;  %v679_v10 = vpop.permute.xlu1 %678 }
 0x3e3   : > { %1728 = vpow2.f32 %v659_v7  ;;  %v2580_v11 = vmax.f32 %v2577_v8, %v1060_v9  ;;  %v685_v12 = vsel %vm683_vm7, %v679_v10, 0 }
 0x3e4   : > { %1516 = vmatpush3.bf16.msra.mxu1 %v685_v12 }
 0x3e5   : > { %v1062_v13 = vsub.f32 %v2577_v8, %v2580_v11  ;;  %1144 = vst.msk [vmem:[#allocation2] sm:$0xff] %vm1079_vm8, %v2580_v11  ;;  %1067 = vperm.xlu1 %1715, %v2580_v11   ;;  %1527 = vmatprep.subr.bf16.mxu1 %v2088_v0 }
 0x3e7   : > { %v1063_v60 = vmul.f32 1.442695, %v1062_v13 }
 0x3e9   : > { %951 = vrot.lane.b32.xlu1 %v2498_v16, %s2100_s8  ;;  %s1980_s8 = scalar_lea.vmem %s1979_s17, 256 }
 0x3ea   : > { %1716 = vset.pattern.permute.xlu1 %v2094_v37  ;;  %p1982_p2 = scmp.lt.s32.totalorder %s1980_s8, %s1974_s6 }
 0x3ec   : > { %p1983_p10 = por %p1982_p2, %p1981_p11 }
 0x3ed   : > { %v1729_v14 = vpop.eup %1728  ;;  %1089 = vrot.lane.b32.xlu1 %v2498_v16, %s2101_s24 }
 0x3ee   : > { %v676_v15 = vpack.c.bf16 %v1729_v14, %v1729_v14  ;;  %v663_v17 = vsel %vm598_vm2, %v1729_v14, 0.0  ;;  %p1984_p1 = pnand %p1983_p10, %p1977_p7 }
 0x3f0   : > { %1518 = vmatmul.mubr.msk.bf16.vlgmr.msra.gmra.mrb[4].mxu1 %vm598_vm2, %v676_v15 }
 0x3f1   : > { %1529 = vmatprep.mubr.msk.bf16.mxu1 %vm2089_vm1, %v2088_v0 }
 0x411   : > { %664 = vadd.xlane.f32.xlu1 %v663_v17 }
 0x450   : > { %v792_v18 = vpop.permute.xlu0 %791 }
 0x451   : > { %v794_v19 = vsub.f32 %v2530_v38, %v792_v18  ;;  %v651_v38 = vmul.f32 1.442695, %v650_v57 }
 0x453   : > { %v795_v20 = vmul.f32 1.442695, %v794_v19 }
 0x455   : > { %1730 = vpow2.f32 %v795_v20 }
 0x45a   : > { %v930_v21 = vpop.permute.xlu1 %929 }
 0x45b   : > { %v932_v22 = vsub.f32 %v2534_v43, %v930_v21 }
 0x45d   : > { %v933_v23 = vmul.f32 1.442695, %v932_v22 }
 0x45e   : > { %v814_v24 = vpop.permute.xlu1 %813 }
 0x45f   : > { %v1731_v16 = vpop.eup %1730  ;;  %1732 = vpow2.f32 %v933_v23  ;;  %v819_v25 = vsel %vm683_vm7, %v814_v24, 0 }
 0x460   : > { %1528 = vmatpush3.bf16.msra.mxu1 %v819_v25  ;;  %v799_v26 = vsel %vm598_vm2, %v1731_v16, 0.0  ;;  %v812_v27 = vpack.c.bf16 %v1731_v16, %v1731_v16 }
 0x461   : > { %800 = vadd.xlane.f32.xlu0 %v799_v26  ;;  %1539 = vmatprep.subr.bf16.mxu1 %v2088_v0 }
 0x463   : > { %1530 = vmatmul.mubr.msk.bf16.vlgmr.msra.gmra.mrb[8].mxu1 %vm598_vm2, %v812_v27  ;;  %v1726_v27 = vld [vmem:[#allocation16] sm:$0xff]  }
 0x464   : > { %v1068_v28 = vpop.permute.xlu1 %1067  ;;  %1541 = vmatprep.mubr.msk.bf16.mxu1 %vm2089_vm1, %v2088_v0  ;;  %1558 = vmatpush3.bf16.msra.mxu0 %v1726_v27 }
 0x465   : > { %v1070_v29 = vsub.f32 %v2538_v48, %v1068_v28  ;;  %v1727_v28 = vld [vmem:[#allocation16 + $0x8] sm:$0xff]   ;;  %1559 = vmatprep.subr.bf16.mxu0 %v2088_v0 }
 0x467   : > { %v1071_v30 = vmul.f32 1.442695, %v1070_v29 }
 0x468   : > { %v952_v31 = vpop.permute.xlu1 %951  ;;  %1560 = vmatpush3.bf16.msra.mxu0 %v1727_v28 }
 0x469   : > { %v1733_v32 = vpop.eup %1732  ;;  %1734 = vpow2.f32 %v1071_v30  ;;  %v957_v33 = vsel %vm683_vm7, %v952_v31, 0 }
 0x46a   : > { %1540 = vmatpush3.bf16.msra.mxu1 %v957_v33  ;;  %v937_v34 = vsel %vm598_vm2, %v1733_v32, 0.0  ;;  %v950_v35 = vpack.c.bf16 %v1733_v32, %v1733_v32  ;;  %1736 = vpow2.f32 %v651_v38 }
 0x46b   : > { %938 = vadd.xlane.f32.xlu1 %v937_v34  ;;  %1551 = vmatprep.subr.bf16.mxu1 %v2088_v0  ;;  %1738 = vpow2.f32 %v787_v44 }
 0x46c   : > { %v1090_v36 = vpop.permute.xlu1 %1089  ;;  %1740 = vpow2.f32 %v925_v54 }
 0x46d   : > { %v1095_v39 = vsel %vm683_vm7, %v1090_v36, 0  ;;  %1542 = vmatmul.mubr.msk.bf16.vlgmr.msra.gmra.mrb[12].mxu1 %vm598_vm2, %v950_v35  ;;  %1742 = vpow2.f32 %v1063_v60 }
 0x46e   : > { %1552 = vmatpush3.bf16.msra.mxu1 %v1095_v39  ;;  %1553 = vmatprep.mubr.msk.bf16.mxu1 %vm2089_vm1, %v2088_v0 }
 0x473   : > { %v1735_v40 = vpop.eup %1734 }
 0x474   : > { %v1075_v41 = vsel %vm598_vm2, %v1735_v40, 0.0  ;;  %v1088_v42 = vpack.c.bf16 %v1735_v40, %v1735_v40  ;;  %v1737_v43 = vpop.eup %1736 }
 0x475   : > { %1076 = vadd.xlane.f32.xlu0 %v1075_v41  ;;  %v1739_v45 = vpop.eup %1738  ;;  %v662_v47 = vmul.f32 %v1737_v43, %v661_v46 }
 0x476   : > { %1554 = vmatmul.mubr.msk.bf16.vlgmr.msra.gmra.mrb[16].mxu1 %vm598_vm2, %v1088_v42  ;;  %v1741_v61 = vpop.eup %1740 }
 0x477   : > { %v1743_v9 = vpop.eup %1742 }
 0x47c   : > { %672 = vperm.xlu1 %1716, %v1737_v43  }
 0x480   : > { %1717 = vset.pattern.permute.xlu1 %v2097_v58 }
 0x48b   : > { %808 = vperm.xlu0 %1713, %v1739_v45  }
 0x49e   : > { %v665_v48 = vpop.xlane.xlu1 %664 }
 0x49f   : > { %v666_v49 = vadd.f32 %v665_v48, %v662_v47 }
 0x4a1   : > { %668 = vst.msk [vmem:[#allocation3] sm:$0xff] %vm667_vm4, %v666_v49 }
 0x4a8   : > { %v797_v55 = vld [vmem:[#allocation3] sm:$0xff] }
 0x4a9   : > { %v798_v56 = vmul.f32 %v1739_v45, %v797_v55  ;;  %v1460_v55 = vld [vmem:[#allocation17] ss:$0 sm:$0xff] }
 0x4c3   : > { %v721_v50 = vpop.f32.mrb[4].mxu1 }
 0x4c4   : > { %v1519_v51 = vpop.f32.mrb[5].mxu1 }
 0x4c5   : > { %v724_v52 = vpop.f32.mrb[6].mxu1 }
 0x4c6   : > { %v1520_v53 = vpop.f32.mrb[7].mxu1 }
 0x4ee   : > { %v801_v57 = vpop.xlane.xlu0 %800 }
 0x4ef   : > { %v802_v59 = vadd.f32 %v801_v57, %v798_v56 }
 0x4f1   : > { %804 = vst.msk [vmem:[#allocation3] sm:$0xff] %vm803_vm5, %v802_v59 }
 0x4f8   : > { %v939_v62 = vpop.xlane.xlu1 %938  ;;  %v935_v1 = vld [vmem:[#allocation3] sm:$0xff] }
 0x4f9   : > { %v936_v4 = vmul.f32 %v1741_v61, %v935_v1 }
 0x4fb   : > { %v940_v7 = vadd.f32 %v939_v62, %v936_v4 }
 0x4fc   : > { %v673_v63 = vpop.permute.xlu1 %672 }
 0x4fd   : > { %942 = vst.msk [vmem:[#allocation3] sm:$0xff] %vm941_vm6, %v940_v7  ;;  %v675_v2 = vmul.f32 %v673_v63, %v669_v5 }
 0x4ff   : > { %v727_v3 = vadd.f32 %v721_v50, %v675_v2 }
 0x501   : > { %728 = vst.msk [vmem:[#allocation4] sm:$0xff] %vm598_vm2, %v727_v3 }
 0x502   : > { %v1077_v14 = vpop.xlane.xlu0 %1076 }
 0x504   : > { %v1073_v10 = vld [vmem:[#allocation3] sm:$0xff] }
 0x505   : > { %v1074_v12 = vmul.f32 %v1743_v9, %v1073_v10 }
 0x507   : > { %v1078_v8 = vadd.f32 %v1077_v14, %v1074_v12 }
 0x508   : > { %v805_v29 = vld [vmem:[#allocation4] sm:$0xff] }
 0x509   : > { %1080 = vst.msk [vmem:[#allocation3] sm:$0xff] %vm1079_vm8, %v1078_v8 }
 0x510   : > { %v1145_v13 = vld [vmem:[#allocation3] sm:$0xff] }
 0x511   : > { %1744 = vrcp.f32 %v1145_v13 }
 0x51b   : > { %v1745_v23 = vpop.eup %1744 }
 0x536   : > { %v855_v11 = vpop.f32.mrb[8].mxu1 }
 0x537   : > { %862 = vrot.lane.b32.xlu1 %v855_v11, %s2102_s5  ;;  %v1531_v15 = vpop.f32.mrb[9].mxu1 }
 0x538   : > { %v858_v17 = vpop.f32.mrb[10].mxu1 }
 0x539   : > { %v1532_v18 = vpop.f32.mrb[11].mxu1 }
 0x53b   : > { %946 = vperm.xlu1 %1717, %v1741_v61  }
 0x53f   : > { %1718 = vset.pattern.permute.xlu1 %v2099_v6 }
 0x540   : > { %1084 = vperm.xlu1 %1718, %v1743_v9   ;;  %v993_v19 = vpop.f32.mrb[12].mxu1 }
 0x541   : > { %v1543_v20 = vpop.f32.mrb[13].mxu1  ;;  %1000 = vrot.lane.b32.xlu0 %v993_v19, %s2103_s2 }
 0x542   : > { %v996_v21 = vpop.f32.mrb[14].mxu1 }
 0x543   : > { %v1544_v22 = vpop.f32.mrb[15].mxu1 }
 0x544   : > { %1719 = vset.pattern.permute.xlu1 %v2094_v37  ;;  %v809_v37 = vpop.permute.xlu0 %808 }
 0x545   : > { %1150 = vperm.xlu1 %1719, %v1745_v23   ;;  %v811_v30 = vmul.f32 %v809_v37, %v805_v29 }
 0x549   : > { %v1131_v24 = vpop.f32.mrb[16].mxu1  ;;  %1720 = vset.pattern.permute.xlu1 %v2097_v58 }
 0x54a   : > { %v1555_v16 = vpop.f32.mrb[17].mxu1  ;;  %1138 = vrot.lane.b32.xlu0 %v1131_v24, %s2104_s19  ;;  %1164 = vperm.xlu1 %1720, %v1745_v23  }
 0x54b   : > { %v1134_v25 = vpop.f32.mrb[18].mxu1 }
 0x54c   : > { %v1556_v26 = vpop.f32.mrb[19].mxu1 }
 0x54e   : > { %1157 = vperm.xlu0 %1713, %v1745_v23  }
 0x552   : > { %1721 = vset.pattern.permute.xlu0 %v2099_v6 }
 0x553   : > { %1171 = vperm.xlu0 %1721, %v1745_v23  }
 0x5a9   : > { %v863_v58 = vpop.permute.xlu1 %862 }
 0x5aa   : > { %v865_v31 = vadd.f32 %v863_v58, %v811_v30 }
 0x5ac   : > { %867 = vst.msk [vmem:[#allocation4] sm:$0xff] %vm866_vm9, %v865_v31 }
 0x5b3   : > { %v943_v33 = vld [vmem:[#allocation4] sm:$0xff]  ;;  %v1001_v35 = vpop.permute.xlu0 %1000 }
 0x5ba   : > { %v947_v32 = vpop.permute.xlu1 %946 }
 0x5bb   : > { %v949_v34 = vmul.f32 %v947_v32, %v943_v33 }
 0x5bc   : > { %v1139_v39 = vpop.permute.xlu0 %1138 }
 0x5bd   : > { %v1003_v6 = vadd.f32 %v1001_v35, %v949_v34 }
 0x5bf   : > { %1005 = vst.msk [vmem:[#allocation4] sm:$0xff] %vm1004_vm10, %v1003_v6  ;;  %v1085_v36 = vpop.permute.xlu1 %1084 }
 0x5c4   : > { %v1151_v41 = vpop.permute.xlu1 %1150 }
 0x5c6   : > { %v1081_v38 = vld [vmem:[#allocation4] sm:$0xff] }
 0x5c7   : > { %v1087_v0 = vmul.f32 %v1085_v36, %v1081_v38 }
 0x5c9   : > { %v1141_v40 = vadd.f32 %v1139_v39, %v1087_v0  ;;  %v1165_v47 = vpop.permute.xlu1 %1164 }
 0x5cb   : > { %1143 = vst.msk [vmem:[#allocation4] sm:$0xff] %vm1142_vm11, %v1141_v40 }
 0x5cd   : > { %v1158_v45 = vpop.permute.xlu0 %1157 }
 0x5d2   : > { %v1147_v42 = vld [vmem:[#allocation4] sm:$0xff]  ;;  %v1172_v51 = vpop.permute.xlu0 %1171 }
 0x5d3   : > { %v1153_v43 = vmul.f32 %v1151_v41, %v1147_v42 }
 0x5d5   : > { %1154 = vst.msk [vmem:[#allocation4] sm:$0xff] %vm598_vm2, %v1153_v43 }
 0x5dc   : > { %v1155_v44 = vld [vmem:[#allocation4] sm:$0xff] }
 0x5dd   : > { %v1160_v46 = vmul.f32 %v1158_v45, %v1155_v44 }
 0x5df   : > { %1161 = vst.msk [vmem:[#allocation4] sm:$0xff] %vm866_vm9, %v1160_v46 }
 0x5e6   : > { %v1162_v48 = vld [vmem:[#allocation4] sm:$0xff] }
 0x5e7   : > { %v1167_v49 = vmul.f32 %v1165_v47, %v1162_v48 }
 0x5e9   : > { %1168 = vst.msk [vmem:[#allocation4] sm:$0xff] %vm1004_vm10, %v1167_v49 }
 0x5f0   : > { %v1169_v50 = vld [vmem:[#allocation4] sm:$0xff] }
 0x5f1   : > { %v1174_v52 = vmul.f32 %v1172_v51, %v1169_v50 }
 0x5f3   : > { %1175 = vst.msk [vmem:[#allocation4] sm:$0xff] %vm1142_vm11, %v1174_v52 }
 0x5fa   : > { %v1176_v53 = vld [vmem:[#allocation4] sm:$0xff] }
 0x5fb   : > { %v1177_v54 = vpack.c.bf16 %v1176_v53, %v1176_v53 }
 0x5fd   : > { %1562 = vmatmul.mubr.msk.bf16.vlgmr.msra.gmra.mrb[20].mxu0 %vm481_vm0, %v1177_v54 }
 0x6d0   : > { %v1238_v56 = vpop.f32.mrb[20].mxu0 }
 0x6d1   : > { %v1239_v57 = vadd.f32 %v1460_v55, %v1238_v56  ;;  %v1563_v59 = vpop.f32.mrb[21].mxu0 }
 0x6d2   : > { %v1241_v60 = vpop.f32.mrb[22].mxu0 }
 0x6d3   : > { %v1564_v61 = vpop.f32.mrb[23].mxu0  ;;  %1244 = vst.msk [vmem:[%s455_s22] sm:$0xff] %vm481_vm0, %v1239_v57 }
 0x6d4   : > { %1987 = shalt.err (!%p1984_p1)
}
 0x6d5   : > { %s1988_s3 = scalar_lea.hbm %s2650_s11, 128  ;;  %s1992_s2 = scalar_lea.hbm %s2749_s26, 256 }
 0x6d6   : > { %p1989_p5 = scmp.ne.s32.totalorder %s2650_s11, %s1988_s3  ;;  %p1993_p12 = scmp.lt.u32.totalorder %s2650_s11, %s2749_s26 }
 0x6d7   : > { %p1994_p6 = scmp.lt.u32.totalorder %s1992_s2, %s1988_s3  ;;  %p1996_p4 = scmp.lt.u32.totalorder %s1988_s3, %s2650_s11 }
 0x6d8   : > { %p1990_p8 = pnand %p1989_p5, %p2750_p9 }
 0x6d9   : > { %p1995_p13 = por %p1994_p6, %p1993_p12 }
 0x6da   : > { %p1991_p3 = pneg %p1990_p8 }
 0x6db   : > { %p1997_p0 = por %p1996_p4, %p1995_p13 }
 0x6dd   : > { %p1998_p7 = pnand %p1997_p0, %p1991_p3 }
 0x6df   : > { %2001 = shalt.err (!%p1998_p7)
}
 0x6e0   : > { %1593 = dma.vmem_to_hbm [thread:$0]  (%p2750_p9), %s2652_s23, 128, %s2650_s11, %s1246_s13  }
 0x6e1 PF: > { %s1272_s25 = sand.u32 1, %s2056_s27   ;;  %p2751_p11 = scmp.ne.s32.totalorder %s2736_s21, 0 }
 0x6e2   : > { %p2752_p2 = scmp.ge.s32.totalorder %s2076_s10, 2  ;;  %s1273_s4 = scalar_lea.sflag [#allocation7], %s1272_s25 }
 0x6e4   : > { %p1622_p10 = pnand %p2752_p2, %p2751_p11 }
 0x6e6   : > { %2051 = dma.done.wait (!%p1622_p10), %s1273_s4, 128  }
 0x6e7   : > { %2053 = vsyncadd (!%p1622_p10), %s1273_s4, 4294967168  ;;  %s30_s10 = sadd.s32 1, %s2076_s10   ;;  %s2753_s27 = smov %s2060_s28 }
 0x6e8   : > { %p27_p1 = scmp.ge.s32.totalorder %s30_s10, 4   ;;  %s2754_s28 = smov %s2064_s29 }
 0x6e9   : > { %s2755_s29 = smov %s2369_s14  ;;  %s2756_s30 = smov %s2072_s9 }
 0x6ea   : > { %s2757_s9 = smov %s2759_s18  ;;  %29 = sbr.rel (!%p27_p1) target bundleno = 18 (0x12), region = 134 }
 0x6f1   :  { %1278 = vsyncpa [#allocation6], 1 }
 0x6f2   :  { %1280 = vsyncpa [#allocation6 + $0x1], 1 }
 0x6f3   :  { %1281 = vsyncpa [#allocation9], 1 }
 0x6f4   :  { %1283 = vsyncpa [#allocation9 + $0x1], 1 }
 0x6f5   :  { %1284 = vsyncpa [#allocation12], 1 }
 0x6f6   :  { %1285 = vsyncpa [#allocation15], 1 }
 0x6f7   :  { %1286 = vsyncpa [#allocation18], 1 }
 0x6f8   :  { %1287 = vsyncpa [#allocation7], 1 }
 0x6f9   :  { %1289 = vsyncpa [#allocation7 + $0x1], 1 }

</bundles_post_ra>
